<compile_context>
chip_gen: v7x
topology: tpu7x:2x2x1
jax: 0.10.0
libtpu: 0.0.40
codegen_flags: <defaults>
</compile_context>

<pallas_src>
import numpy as np
import jax
import jax.numpy as jnp
from jax.experimental import pallas as pl
from jax.experimental.pallas import tpu as pltpu


def _patch_conv_selector(patch_size):
    """0/1 selector S[t, p'*P+q', p*P+q] = 1 iff (p', q') == (p+dh, q+dw)."""
    P = patch_size
    PP = P * P
    S = np.zeros((9, PP, PP), np.float32)
    for dh in (-1, 0, 1):
        for dw in (-1, 0, 1):
            t = (dh + 1) * 3 + (dw + 1)
            for p in range(P):
                for q in range(P):
                    pp, qq = p + dh, q + dw
                    if 0 <= pp < P and 0 <= qq < P:
                        S[t, pp * P + qq, p * P + q] = 1.0
    return S


def keypoint_patch_forward(x, params, k=3, patch_size=5):
    """Forward pass of KeypointPatchModel as one fused Pallas TPU kernel."""
    B, C, H, W = x.shape
    assert C == 1 and H % 2 == 0 and W % 2 == 0
    HP, WP = H // 2, W // 2
    NP = HP * WP                       # pooled pixels per image (196)
    P = patch_size
    PP = P * P                         # 25
    KPP = k * PP                       # 75
    CC = params["cls_conv_b"].shape[0]     # 8
    F1 = params["cls_fc1_b"].shape[0]      # 64
    num_classes = params["cls_fc2_b"].shape[0]
    f32 = jnp.float32
    scale_y = (H - 1) * 0.5
    scale_x = (W - 1) * 0.5
    step = 2.0 / (P - 1)
    inv_np = 1.0 / NP
    GUARD = 16                         # zero guard rows for the conv2 taps

    # ------------------------- host-side (XLA) prep ---------------------------
    ximg = x[:, 0].astype(f32)                                        # (B,H,W)

    # pooled im2col of the raw input: uf[b, I*WP+J, oh*4+ow] = xpad[b,2I+oh,2J+ow]
    xp = jnp.pad(ximg, ((0, 0), (1, 1), (1, 1)))
    taps = [xp[:, oh:oh + H:2, ow:ow + W:2] for oh in range(4) for ow in range(4)]
    uf = jnp.stack(taps, axis=-1).reshape(B, NP, 16)

    # conv1 weights scattered per 2x2 pool offset, concatenated along out dim
    w1k = jnp.transpose(params["det_conv1_w"][:, 0], (1, 2, 0)).astype(f32)   # (3,3,16)
    m4 = jnp.zeros((2, 2, 4, 4, 16), f32)
    for di in range(2):
        for dj in range(2):
            m4 = m4.at[di, dj, di:di + 3, dj:dj + 3, :].set(w1k)
    m4 = m4.reshape(4, 16, 16)
    m4cat = jnp.concatenate([m4[0], m4[1], m4[2], m4[3]], axis=1)             # (16,64)
    b1 = params["det_conv1_b"].astype(f32).reshape(1, 16)

    # conv2 as a single im2col GEMM: prepacked (144,32) weight + column masks
    w2p = jnp.transpose(params["det_conv2_w"], (2, 3, 1, 0)).astype(f32).reshape(9 * 16, 32)
    b2 = params["det_conv2_b"].astype(f32).reshape(1, 32)
    Jcol = np.arange(NP) % WP
    jml = jnp.asarray((Jcol >= 1).astype(np.float32).reshape(NP, 1))          # dj = -1 valid
    jmr = jnp.asarray((Jcol <= WP - 2).astype(np.float32).reshape(NP, 1))     # dj = +1 valid

    wfc = params["det_fc_w"].T.astype(f32)                                    # (32,2k)
    bfc = params["det_fc_b"].astype(f32).reshape(1, 2 * k)

    # keypoint-coord -> patch-lane broadcast selectors and per-lane patch indices
    selx = np.zeros((2 * k, KPP), np.float32)
    sely = np.zeros((2 * k, KPP), np.float32)
    for kk in range(k):
        selx[2 * kk, kk * PP:(kk + 1) * PP] = 1.0
        sely[2 * kk + 1, kk * PP:(kk + 1) * PP] = 1.0
    selx, sely = jnp.asarray(selx), jnp.asarray(sely)
    pq = np.arange(PP)
    prow75 = jnp.asarray(np.tile(pq // P, k).astype(np.float32).reshape(1, KPP))
    qcol75 = jnp.asarray(np.tile(pq % P, k).astype(np.float32).reshape(1, KPP))
    ycolh = jnp.asarray(np.arange(H, dtype=np.float32).reshape(H, 1))
    xcolw = jnp.asarray(np.arange(W, dtype=np.float32).reshape(W, 1))

    # patch classifier (3x3 conv pad=1 -> fc1 -> fc2) folded into block-diag GEMMs
    S = jnp.asarray(_patch_conv_selector(P))                                  # (9,PP,PP)
    wc = params["cls_conv_w"].astype(f32).reshape(CC, 9)
    conv_mat = jnp.einsum("tij,ct->icj", S, wc).reshape(PP, CC * PP)          # (25,200)
    convbd = jnp.kron(jnp.eye(k, dtype=f32), conv_mat)                        # (75,600)
    bconv = jnp.tile(jnp.repeat(params["cls_conv_b"].astype(f32), PP), k).reshape(1, k * CC * PP)
    fc1r = params["cls_fc1_w"].T.astype(f32)                                  # (200,64) PyTorch flatten order
    fc1bd = jnp.kron(jnp.eye(k, dtype=f32), fc1r)                             # (600,192)
    bf1 = jnp.tile(params["cls_fc1_b"].astype(f32), k).reshape(1, k * F1)
    fc2r = params["cls_fc2_w"].T.astype(f32)                                  # (192,C)
    bf2 = params["cls_fc2_b"].astype(f32).reshape(1, num_classes)

    # ------------------------------ the kernel --------------------------------
    def kernel(uf_ref, ximg_ref, m4cat_ref, b1_ref, w2p_ref, b2_ref,
               wfc_ref, bfc_ref, jml_ref, jmr_ref,
               selx_ref, sely_ref, prow_ref, qcol_ref, ycol_ref, xcol_ref,
               convbd_ref, bconv_ref, fc1bd_ref, bf1_ref, fc2r_ref, bf2_ref,
               out_ref, hpad_ref, col_ref):
        F32 = jnp.float32

        # ---- detector: conv1 + ReLU + MaxPool(2) as one GEMM + lane-slice max
        ufb = uf_ref[0]                                                    # (NP,16)
        z = jnp.dot(ufb, m4cat_ref[...], preferred_element_type=F32)       # (NP,64)
        h1 = jnp.maximum(jnp.maximum(z[:, 0:16], z[:, 16:32]),
                         jnp.maximum(z[:, 32:48], z[:, 48:64]))
        h1 = jnp.maximum(h1 + b1_ref[...], 0.0)                            # (NP,16)

        # ---- detector: conv2 + ReLU via zero-guarded scratch + one K=144 GEMM
        hpad_ref[...] = jnp.zeros(hpad_ref.shape, F32)
        hpad_ref[pl.ds(GUARD, NP), :] = h1
        for i in range(3):
            for j in range(3):
                t = i * 3 + j
                s = (i - 1) * WP + (j - 1)
                tap = hpad_ref[pl.ds(GUARD + s, NP), :]                    # (NP,16)
                if j == 0:
                    tap = tap * jml_ref[...]
                elif j == 2:
                    tap = tap * jmr_ref[...]
                col_ref[:, pl.ds(16 * t, 16)] = tap
        h2 = jnp.dot(col_ref[...], w2p_ref[...], preferred_element_type=F32)
        h2 = jnp.maximum(h2 + b2_ref[...], 0.0)                            # (NP,32)

        # ---- detector: global average pool + fc + clamp -> keypoint coords
        avg = jnp.full((1, NP), inv_np, F32)
        feat = jnp.dot(avg, h2, preferred_element_type=F32)                # (1,32)
        coords = jnp.dot(feat, wfc_ref[...], preferred_element_type=F32) + bfc_ref[...]
        coords = jnp.clip(coords, -1.0, 1.0)                               # (1,2k)

        # ---- bilinear grid_sample (align_corners=True, zeros pad), all k patches
        img = ximg_ref[0]                                                  # (H,W)
        cx = jnp.dot(coords, selx_ref[...], preferred_element_type=F32)    # (1,KPP)
        cy = jnp.dot(coords, sely_ref[...], preferred_element_type=F32)    # (1,KPP)
        py = (step * prow_ref[...] + cy) * scale_y
        px = (step * qcol_ref[...] + cx) * scale_x
        y0 = jnp.floor(py)
        fy = py - y0
        x0 = jnp.floor(px)
        fx = px - x0
        wy = (jnp.where(ycol_ref[...] == y0, 1.0 - fy, 0.0)
              + jnp.where(ycol_ref[...] == y0 + 1.0, fy, 0.0))             # (H,KPP)
        wx = (jnp.where(xcol_ref[...] == x0, 1.0 - fx, 0.0)
              + jnp.where(xcol_ref[...] == x0 + 1.0, fx, 0.0))             # (W,KPP)
        g = jnp.dot(img, wx, preferred_element_type=F32)                   # (H,KPP)
        ones_h = jnp.full((1, H), 1.0, F32)
        patches = jnp.dot(ones_h, wy * g, preferred_element_type=F32)      # (1,KPP)

        # ---- patch classifier: conv3x3 | fc1 | fc2 as three block-diag GEMMs
        c1 = jnp.maximum(jnp.dot(patches, convbd_ref[...],
                                 preferred_element_type=F32) + bconv_ref[...], 0.0)   # (1,600)
        f1 = jnp.maximum(jnp.dot(c1, fc1bd_ref[...],
                                 preferred_element_type=F32) + bf1_ref[...], 0.0)     # (1,192)
        logits = jnp.dot(f1, fc2r_ref[...], preferred_element_type=F32) + bf2_ref[...]
        out_ref[0] = logits                                                # (1,C)

    # ------------------------------ pallas_call -------------------------------
    def vspec(shape):
        n = len(shape)
        return pl.BlockSpec(shape, lambda b, _n=n: (0,) * _n)

    inputs = (uf, ximg, m4cat, b1, w2p, b2, wfc, bfc, jml, jmr,
              selx, sely, prow75, qcol75, ycolh, xcolw,
              convbd, bconv, fc1bd, bf1, fc2r, bf2)
    in_specs = [pl.BlockSpec((1, NP, 16), lambda b: (b, 0, 0)),
                pl.BlockSpec((1, H, W), lambda b: (b, 0, 0))]
    in_specs += [vspec(a.shape) for a in inputs[2:]]

    out = pl.pallas_call(
        kernel,
        out_shape=jax.ShapeDtypeStruct((B, 1, num_classes), f32),
        grid=(B,),
        in_specs=in_specs,
        out_specs=pl.BlockSpec((1, 1, num_classes), lambda b: (b, 0, 0)),
        scratch_shapes=[pltpu.VMEM((NP + 2 * GUARD, 16), f32),   # zero-guarded h1
                        pltpu.VMEM((NP, 9 * 16), f32)],          # conv2 im2col
        compiler_params=pltpu.CompilerParams(dimension_semantics=("parallel",)),
    )(*inputs)
    return out.reshape(B, num_classes)


# ---------------------------------------------------------------------------
# Parameter init (PyTorch-layout weights) and driver
# ---------------------------------------------------------------------------
def init_params(key, k=3, patch_size=5, num_classes=10):
    ks = jax.random.split(key, 12)

    def w(kk, shape, scale=0.1):
        return jax.random.normal(kk, shape, dtype=jnp.float32) * scale

    P = patch_size
    return {
        "det_conv1_w": w(ks[0], (16, 1, 3, 3)),
        "det_conv1_b": w(ks[1], (16,)),
        "det_conv2_w": w(ks[2], (32, 16, 3, 3)),
        "det_conv2_b": w(ks[3], (32,)),
        "det_fc_w": w(ks[4], (2 * k, 32)),
        "det_fc_b": w(ks[5], (2 * k,)),
        "cls_conv_w": w(ks[6], (8, 1, 3, 3)),
        "cls_conv_b": w(ks[7], (8,)),
        "cls_fc1_w": w(ks[8], (64, 8 * P * P)),
        "cls_fc1_b": w(ks[9], (64,)),
        "cls_fc2_w": w(ks[10], (num_classes, 64 * k)),
        "cls_fc2_b": w(ks[11], (num_classes,)),
    }


if __name__ == "__main__":
    key = jax.random.PRNGKey(0)
    kx, kp = jax.random.split(key)

    B, C, H, W = 2, 1, 28, 28            # image_size=28, in-channels=1 per module
    k, patch_size = 3, 5

    x = jax.random.normal(kx, (B, C, H, W), dtype=jnp.float32)
    params = init_params(kp, k=k, patch_size=patch_size)

    fwd = jax.jit(keypoint_patch_forward)
    out = jax.block_until_ready(fwd(x, params))
    assert out.shape == (B, 10), out.shape
    assert bool(jnp.all(jnp.isfinite(out)))
    print("KERNEL_OK")
</pallas_src>

<mosaic_0001>
module attributes {stable_mosaic.version = 11 : i64} {
  func.func @kernel(%arg0: i32, %arg1: memref<1x196x16xf32, #tpu.memory_space<vmem>>, %arg2: memref<1x28x28xf32, #tpu.memory_space<vmem>>, %arg3: memref<16x64xf32, #tpu.memory_space<vmem>>, %arg4: memref<1x16xf32, #tpu.memory_space<vmem>>, %arg5: memref<144x32xf32, #tpu.memory_space<vmem>>, %arg6: memref<1x32xf32, #tpu.memory_space<vmem>>, %arg7: memref<32x6xf32, #tpu.memory_space<vmem>>, %arg8: memref<1x6xf32, #tpu.memory_space<vmem>>, %arg9: memref<196x1xf32, #tpu.memory_space<vmem>>, %arg10: memref<196x1xf32, #tpu.memory_space<vmem>>, %arg11: memref<6x75xf32, #tpu.memory_space<vmem>>, %arg12: memref<6x75xf32, #tpu.memory_space<vmem>>, %arg13: memref<1x75xf32, #tpu.memory_space<vmem>>, %arg14: memref<1x75xf32, #tpu.memory_space<vmem>>, %arg15: memref<28x1xf32, #tpu.memory_space<vmem>>, %arg16: memref<28x1xf32, #tpu.memory_space<vmem>>, %arg17: memref<75x600xf32, #tpu.memory_space<vmem>>, %arg18: memref<1x600xf32, #tpu.memory_space<vmem>>, %arg19: memref<600x192xf32, #tpu.memory_space<vmem>>, %arg20: memref<1x192xf32, #tpu.memory_space<vmem>>, %arg21: memref<192x10xf32, #tpu.memory_space<vmem>>, %arg22: memref<1x10xf32, #tpu.memory_space<vmem>>, %arg23: memref<1x1x10xf32, #tpu.memory_space<vmem>>, %arg24: memref<228x16xf32, #tpu.memory_space<vmem>>, %arg25: memref<196x144xf32, #tpu.memory_space<vmem>>) attributes {dimension_semantics = [#tpu.dimension_semantics<parallel>], iteration_bounds = array<i64: 2>, scalar_prefetch = 0 : i64, scratch_operands = 2 : i64, tpu.core_type = #tpu.core_type<tc>, window_params = [{transform_indices = @transform_0, window_bounds = array<i64: 1, 196, 16>}, {transform_indices = @transform_1, window_bounds = array<i64: 1, 28, 28>}, {pipeline_mode = #tpu.pipeline_mode<synchronous>, transform_indices = @transform_2, window_bounds = array<i64: 16, 64>}, {pipeline_mode = #tpu.pipeline_mode<synchronous>, transform_indices = @transform_3, window_bounds = array<i64: 1, 16>}, {pipeline_mode = #tpu.pipeline_mode<synchronous>, transform_indices = @transform_4, window_bounds = array<i64: 144, 32>}, {pipeline_mode = #tpu.pipeline_mode<synchronous>, transform_indices = @transform_5, window_bounds = array<i64: 1, 32>}, {pipeline_mode = #tpu.pipeline_mode<synchronous>, transform_indices = @transform_6, window_bounds = array<i64: 32, 6>}, {pipeline_mode = #tpu.pipeline_mode<synchronous>, transform_indices = @transform_7, window_bounds = array<i64: 1, 6>}, {pipeline_mode = #tpu.pipeline_mode<synchronous>, transform_indices = @transform_8, window_bounds = array<i64: 196, 1>}, {pipeline_mode = #tpu.pipeline_mode<synchronous>, transform_indices = @transform_9, window_bounds = array<i64: 196, 1>}, {pipeline_mode = #tpu.pipeline_mode<synchronous>, transform_indices = @transform_10, window_bounds = array<i64: 6, 75>}, {pipeline_mode = #tpu.pipeline_mode<synchronous>, transform_indices = @transform_11, window_bounds = array<i64: 6, 75>}, {pipeline_mode = #tpu.pipeline_mode<synchronous>, transform_indices = @transform_12, window_bounds = array<i64: 1, 75>}, {pipeline_mode = #tpu.pipeline_mode<synchronous>, transform_indices = @transform_13, window_bounds = array<i64: 1, 75>}, {pipeline_mode = #tpu.pipeline_mode<synchronous>, transform_indices = @transform_14, window_bounds = array<i64: 28, 1>}, {pipeline_mode = #tpu.pipeline_mode<synchronous>, transform_indices = @transform_15, window_bounds = array<i64: 28, 1>}, {pipeline_mode = #tpu.pipeline_mode<synchronous>, transform_indices = @transform_16, window_bounds = array<i64: 75, 600>}, {pipeline_mode = #tpu.pipeline_mode<synchronous>, transform_indices = @transform_17, window_bounds = array<i64: 1, 600>}, {pipeline_mode = #tpu.pipeline_mode<synchronous>, transform_indices = @transform_18, window_bounds = array<i64: 600, 192>}, {pipeline_mode = #tpu.pipeline_mode<synchronous>, transform_indices = @transform_19, window_bounds = array<i64: 1, 192>}, {pipeline_mode = #tpu.pipeline_mode<synchronous>, transform_indices = @transform_20, window_bounds = array<i64: 192, 10>}, {pipeline_mode = #tpu.pipeline_mode<synchronous>, transform_indices = @transform_21, window_bounds = array<i64: 1, 10>}, {transform_indices = @transform_22, window_bounds = array<i64: 1, 1, 10>}]} {
    %c0 = arith.constant 0 : index
    %c0_0 = arith.constant 0 : index
    %c0_1 = arith.constant 0 : index
    %0 = vector.load %arg1[%c0, %c0_0, %c0_1] : memref<1x196x16xf32, #tpu.memory_space<vmem>>, vector<1x196x16xf32>
    %1 = vector.shape_cast %0 : vector<1x196x16xf32> to vector<196x16xf32>
    %c0_2 = arith.constant 0 : index
    %c0_3 = arith.constant 0 : index
    %2 = vector.load %arg3[%c0_2, %c0_3] : memref<16x64xf32, #tpu.memory_space<vmem>>, vector<16x64xf32>
    %cst = arith.constant dense<0.000000e+00> : vector<196x64xf32>
    %3 = tpu.matmul %1, %2, %cst {dimension_numbers = #tpu.dot_dimension_numbers<[1], [0], [0], [1], [0, 0, 1, 1], [], []>} : vector<196x16xf32>, vector<16x64xf32>, vector<196x64xf32> -> vector<196x64xf32>
    %4 = vector.extract_strided_slice %3 {offsets = [0, 0], sizes = [196, 16], strides = [1, 1]} : vector<196x64xf32> to vector<196x16xf32>
    %5 = vector.extract_strided_slice %3 {offsets = [0, 16], sizes = [196, 16], strides = [1, 1]} : vector<196x64xf32> to vector<196x16xf32>
    %6 = arith.maximumf %4, %5 : vector<196x16xf32>
    %7 = vector.extract_strided_slice %3 {offsets = [0, 32], sizes = [196, 16], strides = [1, 1]} : vector<196x64xf32> to vector<196x16xf32>
    %8 = vector.extract_strided_slice %3 {offsets = [0, 48], sizes = [196, 16], strides = [1, 1]} : vector<196x64xf32> to vector<196x16xf32>
    %9 = arith.maximumf %7, %8 : vector<196x16xf32>
    %10 = arith.maximumf %6, %9 : vector<196x16xf32>
    %c0_4 = arith.constant 0 : index
    %c0_5 = arith.constant 0 : index
    %11 = vector.load %arg4[%c0_4, %c0_5] : memref<1x16xf32, #tpu.memory_space<vmem>>, vector<1x16xf32>
    %12 = vector.broadcast %11 : vector<1x16xf32> to vector<196x16xf32>
    %13 = arith.addf %10, %12 : vector<196x16xf32>
    %cst_6 = arith.constant 0.000000e+00 : f32
    %14 = vector.broadcast %cst_6 : f32 to vector<196x16xf32>
    %15 = arith.maximumf %13, %14 : vector<196x16xf32>
    %cst_7 = arith.constant 0.000000e+00 : f32
    %16 = vector.broadcast %cst_7 : f32 to vector<228x16xf32>
    %c0_8 = arith.constant 0 : index
    %c0_9 = arith.constant 0 : index
    %17 = vector.load %arg24[%c0_8, %c0_9] : memref<228x16xf32, #tpu.memory_space<vmem>>, vector<228x16xf32>
    tpu.vector_store %arg24[%c0_8, %c0_9], %16 {strides = array<i32>} : memref<228x16xf32, #tpu.memory_space<vmem>>, vector<228x16xf32>,
    %c16 = arith.constant 16 : index
    %c0_10 = arith.constant 0 : index
    %18 = vector.load %arg24[%c16, %c0_10] : memref<228x16xf32, #tpu.memory_space<vmem>>, vector<196x16xf32>
    tpu.vector_store %arg24[%c16, %c0_10], %15 {strides = array<i32>} : memref<228x16xf32, #tpu.memory_space<vmem>>, vector<196x16xf32>,
    %c1 = arith.constant 1 : index
    %c0_11 = arith.constant 0 : index
    %19 = vector.load %arg24[%c1, %c0_11] : memref<228x16xf32, #tpu.memory_space<vmem>>, vector<196x16xf32>
    %c0_12 = arith.constant 0 : index
    %c0_13 = arith.constant 0 : index
    %20 = vector.load %arg9[%c0_12, %c0_13] : memref<196x1xf32, #tpu.memory_space<vmem>>, vector<196x1xf32>
    %21 = vector.broadcast %20 : vector<196x1xf32> to vector<196x16xf32>
    %22 = arith.mulf %19, %21 : vector<196x16xf32>
    %c0_14 = arith.constant 0 : index
    %c0_15 = arith.constant 0 : index
    %23 = vector.load %arg25[%c0_14, %c0_15] : memref<196x144xf32, #tpu.memory_space<vmem>>, vector<196x16xf32>
    tpu.vector_store %arg25[%c0_14, %c0_15], %22 {strides = array<i32>} : memref<196x144xf32, #tpu.memory_space<vmem>>, vector<196x16xf32>,
    %c2 = arith.constant 2 : index
    %c0_16 = arith.constant 0 : index
    %24 = vector.load %arg24[%c2, %c0_16] : memref<228x16xf32, #tpu.memory_space<vmem>>, vector<196x16xf32>
    %c0_17 = arith.constant 0 : index
    %c16_18 = arith.constant 16 : index
    %25 = vector.load %arg25[%c0_17, %c16_18] : memref<196x144xf32, #tpu.memory_space<vmem>>, vector<196x16xf32>
    tpu.vector_store %arg25[%c0_17, %c16_18], %24 {strides = array<i32>} : memref<196x144xf32, #tpu.memory_space<vmem>>, vector<196x16xf32>,
    %c3 = arith.constant 3 : index
    %c0_19 = arith.constant 0 : index
    %26 = vector.load %arg24[%c3, %c0_19] : memref<228x16xf32, #tpu.memory_space<vmem>>, vector<196x16xf32>
    %c0_20 = arith.constant 0 : index
    %c0_21 = arith.constant 0 : index
    %27 = vector.load %arg10[%c0_20, %c0_21] : memref<196x1xf32, #tpu.memory_space<vmem>>, vector<196x1xf32>
    %28 = vector.broadcast %27 : vector<196x1xf32> to vector<196x16xf32>
    %29 = arith.mulf %26, %28 : vector<196x16xf32>
    %c0_22 = arith.constant 0 : index
    %c32 = arith.constant 32 : index
    %30 = vector.load %arg25[%c0_22, %c32] : memref<196x144xf32, #tpu.memory_space<vmem>>, vector<196x16xf32>
    tpu.vector_store %arg25[%c0_22, %c32], %29 {strides = array<i32>} : memref<196x144xf32, #tpu.memory_space<vmem>>, vector<196x16xf32>,
    %c15 = arith.constant 15 : index
    %c0_23 = arith.constant 0 : index
    %31 = vector.load %arg24[%c15, %c0_23] : memref<228x16xf32, #tpu.memory_space<vmem>>, vector<196x16xf32>
    %c0_24 = arith.constant 0 : index
    %c0_25 = arith.constant 0 : index
    %32 = vector.load %arg9[%c0_24, %c0_25] : memref<196x1xf32, #tpu.memory_space<vmem>>, vector<196x1xf32>
    %33 = vector.broadcast %32 : vector<196x1xf32> to vector<196x16xf32>
    %34 = arith.mulf %31, %33 : vector<196x16xf32>
    %c0_26 = arith.constant 0 : index
    %c48 = arith.constant 48 : index
    %35 = vector.load %arg25[%c0_26, %c48] : memref<196x144xf32, #tpu.memory_space<vmem>>, vector<196x16xf32>
    tpu.vector_store %arg25[%c0_26, %c48], %34 {strides = array<i32>} : memref<196x144xf32, #tpu.memory_space<vmem>>, vector<196x16xf32>,
    %c16_27 = arith.constant 16 : index
    %c0_28 = arith.constant 0 : index
    %36 = vector.load %arg24[%c16_27, %c0_28] : memref<228x16xf32, #tpu.memory_space<vmem>>, vector<196x16xf32>
    %c0_29 = arith.constant 0 : index
    %c64 = arith.constant 64 : index
    %37 = vector.load %arg25[%c0_29, %c64] : memref<196x144xf32, #tpu.memory_space<vmem>>, vector<196x16xf32>
    tpu.vector_store %arg25[%c0_29, %c64], %36 {strides = array<i32>} : memref<196x144xf32, #tpu.memory_space<vmem>>, vector<196x16xf32>,
    %c17 = arith.constant 17 : index
    %c0_30 = arith.constant 0 : index
    %38 = vector.load %arg24[%c17, %c0_30] : memref<228x16xf32, #tpu.memory_space<vmem>>, vector<196x16xf32>
    %c0_31 = arith.constant 0 : index
    %c0_32 = arith.constant 0 : index
    %39 = vector.load %arg10[%c0_31, %c0_32] : memref<196x1xf32, #tpu.memory_space<vmem>>, vector<196x1xf32>
    %40 = vector.broadcast %39 : vector<196x1xf32> to vector<196x16xf32>
    %41 = arith.mulf %38, %40 : vector<196x16xf32>
    %c0_33 = arith.constant 0 : index
    %c80 = arith.constant 80 : index
    %42 = vector.load %arg25[%c0_33, %c80] : memref<196x144xf32, #tpu.memory_space<vmem>>, vector<196x16xf32>
    tpu.vector_store %arg25[%c0_33, %c80], %41 {strides = array<i32>} : memref<196x144xf32, #tpu.memory_space<vmem>>, vector<196x16xf32>,
    %c29 = arith.constant 29 : index
    %c0_34 = arith.constant 0 : index
    %43 = vector.load %arg24[%c29, %c0_34] : memref<228x16xf32, #tpu.memory_space<vmem>>, vector<196x16xf32>
    %c0_35 = arith.constant 0 : index
    %c0_36 = arith.constant 0 : index
    %44 = vector.load %arg9[%c0_35, %c0_36] : memref<196x1xf32, #tpu.memory_space<vmem>>, vector<196x1xf32>
    %45 = vector.broadcast %44 : vector<196x1xf32> to vector<196x16xf32>
    %46 = arith.mulf %43, %45 : vector<196x16xf32>
    %c0_37 = arith.constant 0 : index
    %c96 = arith.constant 96 : index
    %47 = vector.load %arg25[%c0_37, %c96] : memref<196x144xf32, #tpu.memory_space<vmem>>, vector<196x16xf32>
    tpu.vector_store %arg25[%c0_37, %c96], %46 {strides = array<i32>} : memref<196x144xf32, #tpu.memory_space<vmem>>, vector<196x16xf32>,
    %c30 = arith.constant 30 : index
    %c0_38 = arith.constant 0 : index
    %48 = vector.load %arg24[%c30, %c0_38] : memref<228x16xf32, #tpu.memory_space<vmem>>, vector<196x16xf32>
    %c0_39 = arith.constant 0 : index
    %c112 = arith.constant 112 : index
    %49 = vector.load %arg25[%c0_39, %c112] : memref<196x144xf32, #tpu.memory_space<vmem>>, vector<196x16xf32>
    tpu.vector_store %arg25[%c0_39, %c112], %48 {strides = array<i32>} : memref<196x144xf32, #tpu.memory_space<vmem>>, vector<196x16xf32>,
    %c31 = arith.constant 31 : index
    %c0_40 = arith.constant 0 : index
    %50 = vector.load %arg24[%c31, %c0_40] : memref<228x16xf32, #tpu.memory_space<vmem>>, vector<196x16xf32>
    %c0_41 = arith.constant 0 : index
    %c0_42 = arith.constant 0 : index
    %51 = vector.load %arg10[%c0_41, %c0_42] : memref<196x1xf32, #tpu.memory_space<vmem>>, vector<196x1xf32>
    %52 = vector.broadcast %51 : vector<196x1xf32> to vector<196x16xf32>
    %53 = arith.mulf %50, %52 : vector<196x16xf32>
    %c0_43 = arith.constant 0 : index
    %c128 = arith.constant 128 : index
    %54 = vector.load %arg25[%c0_43, %c128] : memref<196x144xf32, #tpu.memory_space<vmem>>, vector<196x16xf32>
    tpu.vector_store %arg25[%c0_43, %c128], %53 {strides = array<i32>} : memref<196x144xf32, #tpu.memory_space<vmem>>, vector<196x16xf32>,
    %c0_44 = arith.constant 0 : index
    %c0_45 = arith.constant 0 : index
    %55 = vector.load %arg25[%c0_44, %c0_45] : memref<196x144xf32, #tpu.memory_space<vmem>>, vector<196x144xf32>
    %c0_46 = arith.constant 0 : index
    %c0_47 = arith.constant 0 : index
    %56 = vector.load %arg5[%c0_46, %c0_47] : memref<144x32xf32, #tpu.memory_space<vmem>>, vector<144x32xf32>
    %cst_48 = arith.constant dense<0.000000e+00> : vector<196x32xf32>
    %57 = tpu.matmul %55, %56, %cst_48 {dimension_numbers = #tpu.dot_dimension_numbers<[1], [0], [0], [1], [0, 0, 1, 1], [], []>} : vector<196x144xf32>, vector<144x32xf32>, vector<196x32xf32> -> vector<196x32xf32>
    %c0_49 = arith.constant 0 : index
    %c0_50 = arith.constant 0 : index
    %58 = vector.load %arg6[%c0_49, %c0_50] : memref<1x32xf32, #tpu.memory_space<vmem>>, vector<1x32xf32>
    %59 = vector.broadcast %58 : vector<1x32xf32> to vector<196x32xf32>
    %60 = arith.addf %57, %59 : vector<196x32xf32>
    %cst_51 = arith.constant 0.000000e+00 : f32
    %61 = vector.broadcast %cst_51 : f32 to vector<196x32xf32>
    %62 = arith.maximumf %60, %61 : vector<196x32xf32>
    %cst_52 = arith.constant 0.00510204071 : f32
    %63 = vector.broadcast %cst_52 : f32 to vector<1x196xf32>
    %cst_53 = arith.constant dense<0.000000e+00> : vector<1x32xf32>
    %64 = tpu.matmul %63, %62, %cst_53 {dimension_numbers = #tpu.dot_dimension_numbers<[1], [0], [0], [1], [0, 0, 1, 1], [], []>} : vector<1x196xf32>, vector<196x32xf32>, vector<1x32xf32> -> vector<1x32xf32>
    %c0_54 = arith.constant 0 : index
    %c0_55 = arith.constant 0 : index
    %65 = vector.load %arg7[%c0_54, %c0_55] : memref<32x6xf32, #tpu.memory_space<vmem>>, vector<32x6xf32>
    %cst_56 = arith.constant dense<0.000000e+00> : vector<1x6xf32>
    %66 = tpu.matmul %64, %65, %cst_56 {dimension_numbers = #tpu.dot_dimension_numbers<[1], [0], [0], [1], [0, 0, 1, 1], [], []>} : vector<1x32xf32>, vector<32x6xf32>, vector<1x6xf32> -> vector<1x6xf32>
    %c0_57 = arith.constant 0 : index
    %c0_58 = arith.constant 0 : index
    %67 = vector.load %arg8[%c0_57, %c0_58] : memref<1x6xf32, #tpu.memory_space<vmem>>, vector<1x6xf32>
    %68 = arith.addf %66, %67 : vector<1x6xf32>
    %cst_59 = arith.constant -1.000000e+00 : f32
    %cst_60 = arith.constant 1.000000e+00 : f32
    %69 = vector.broadcast %cst_59 : f32 to vector<1x6xf32>
    %70 = arith.maximumf %69, %68 : vector<1x6xf32>
    %71 = vector.broadcast %cst_60 : f32 to vector<1x6xf32>
    %72 = arith.minimumf %71, %70 : vector<1x6xf32>
    %c0_61 = arith.constant 0 : index
    %c0_62 = arith.constant 0 : index
    %c0_63 = arith.constant 0 : index
    %73 = vector.load %arg2[%c0_61, %c0_62, %c0_63] : memref<1x28x28xf32, #tpu.memory_space<vmem>>, vector<1x28x28xf32>
    %74 = vector.shape_cast %73 : vector<1x28x28xf32> to vector<28x28xf32>
    %c0_64 = arith.constant 0 : index
    %c0_65 = arith.constant 0 : index
    %75 = vector.load %arg11[%c0_64, %c0_65] : memref<6x75xf32, #tpu.memory_space<vmem>>, vector<6x75xf32>
    %cst_66 = arith.constant dense<0.000000e+00> : vector<1x75xf32>
    %76 = tpu.matmul %72, %75, %cst_66 {dimension_numbers = #tpu.dot_dimension_numbers<[1], [0], [0], [1], [0, 0, 1, 1], [], []>} : vector<1x6xf32>, vector<6x75xf32>, vector<1x75xf32> -> vector<1x75xf32>
    %c0_67 = arith.constant 0 : index
    %c0_68 = arith.constant 0 : index
    %77 = vector.load %arg12[%c0_67, %c0_68] : memref<6x75xf32, #tpu.memory_space<vmem>>, vector<6x75xf32>
    %cst_69 = arith.constant dense<0.000000e+00> : vector<1x75xf32>
    %78 = tpu.matmul %72, %77, %cst_69 {dimension_numbers = #tpu.dot_dimension_numbers<[1], [0], [0], [1], [0, 0, 1, 1], [], []>} : vector<1x6xf32>, vector<6x75xf32>, vector<1x75xf32> -> vector<1x75xf32>
    %c0_70 = arith.constant 0 : index
    %c0_71 = arith.constant 0 : index
    %79 = vector.load %arg13[%c0_70, %c0_71] : memref<1x75xf32, #tpu.memory_space<vmem>>, vector<1x75xf32>
    %cst_72 = arith.constant 5.000000e-01 : f32
    %80 = vector.broadcast %cst_72 : f32 to vector<1x75xf32>
    %81 = arith.mulf %80, %79 : vector<1x75xf32>
    %82 = arith.addf %81, %78 : vector<1x75xf32>
    %cst_73 = arith.constant 1.350000e+01 : f32
    %83 = vector.broadcast %cst_73 : f32 to vector<1x75xf32>
    %84 = arith.mulf %82, %83 : vector<1x75xf32>
    %c0_74 = arith.constant 0 : index
    %c0_75 = arith.constant 0 : index
    %85 = vector.load %arg14[%c0_74, %c0_75] : memref<1x75xf32, #tpu.memory_space<vmem>>, vector<1x75xf32>
    %cst_76 = arith.constant 5.000000e-01 : f32
    %86 = vector.broadcast %cst_76 : f32 to vector<1x75xf32>
    %87 = arith.mulf %86, %85 : vector<1x75xf32>
    %88 = arith.addf %87, %76 : vector<1x75xf32>
    %cst_77 = arith.constant 1.350000e+01 : f32
    %89 = vector.broadcast %cst_77 : f32 to vector<1x75xf32>
    %90 = arith.mulf %88, %89 : vector<1x75xf32>
    %91 = math.floor %84 : vector<1x75xf32>
    %92 = arith.subf %84, %91 : vector<1x75xf32>
    %93 = math.floor %90 : vector<1x75xf32>
    %94 = arith.subf %90, %93 : vector<1x75xf32>
    %c0_78 = arith.constant 0 : index
    %c0_79 = arith.constant 0 : index
    %95 = vector.load %arg15[%c0_78, %c0_79] : memref<28x1xf32, #tpu.memory_space<vmem>>, vector<28x1xf32>
    %96 = vector.broadcast %95 : vector<28x1xf32> to vector<28x75xf32>
    %97 = vector.broadcast %91 : vector<1x75xf32> to vector<28x75xf32>
    %98 = arith.cmpf oeq, %96, %97 : vector<28x75xf32>
    %cst_80 = arith.constant 1.000000e+00 : f32
    %99 = vector.broadcast %cst_80 : f32 to vector<1x75xf32>
    %100 = arith.subf %99, %92 : vector<1x75xf32>
    %cst_81 = arith.constant 0.000000e+00 : f32
    %101 = vector.shape_cast %100 : vector<1x75xf32> to vector<1x75xf32>
    %102 = vector.broadcast %101 : vector<1x75xf32> to vector<28x75xf32>
    %103 = vector.broadcast %cst_81 : f32 to vector<28x75xf32>
    %104 = arith.select %98, %102, %103 : vector<28x75xi1>, vector<28x75xf32>
    %c0_82 = arith.constant 0 : index
    %c0_83 = arith.constant 0 : index
    %105 = vector.load %arg15[%c0_82, %c0_83] : memref<28x1xf32, #tpu.memory_space<vmem>>, vector<28x1xf32>
    %cst_84 = arith.constant 1.000000e+00 : f32
    %106 = vector.broadcast %cst_84 : f32 to vector<1x75xf32>
    %107 = arith.addf %91, %106 : vector<1x75xf32>
    %108 = vector.broadcast %105 : vector<28x1xf32> to vector<28x75xf32>
    %109 = vector.broadcast %107 : vector<1x75xf32> to vector<28x75xf32>
    %110 = arith.cmpf oeq, %108, %109 : vector<28x75xf32>
    %cst_85 = arith.constant 0.000000e+00 : f32
    %111 = vector.shape_cast %92 : vector<1x75xf32> to vector<1x75xf32>
    %112 = vector.broadcast %111 : vector<1x75xf32> to vector<28x75xf32>
    %113 = vector.broadcast %cst_85 : f32 to vector<28x75xf32>
    %114 = arith.select %110, %112, %113 : vector<28x75xi1>, vector<28x75xf32>
    %115 = arith.addf %104, %114 : vector<28x75xf32>
    %c0_86 = arith.constant 0 : index
    %c0_87 = arith.constant 0 : index
    %116 = vector.load %arg16[%c0_86, %c0_87] : memref<28x1xf32, #tpu.memory_space<vmem>>, vector<28x1xf32>
    %117 = vector.broadcast %116 : vector<28x1xf32> to vector<28x75xf32>
    %118 = vector.broadcast %93 : vector<1x75xf32> to vector<28x75xf32>
    %119 = arith.cmpf oeq, %117, %118 : vector<28x75xf32>
    %cst_88 = arith.constant 1.000000e+00 : f32
    %120 = vector.broadcast %cst_88 : f32 to vector<1x75xf32>
    %121 = arith.subf %120, %94 : vector<1x75xf32>
    %cst_89 = arith.constant 0.000000e+00 : f32
    %122 = vector.shape_cast %121 : vector<1x75xf32> to vector<1x75xf32>
    %123 = vector.broadcast %122 : vector<1x75xf32> to vector<28x75xf32>
    %124 = vector.broadcast %cst_89 : f32 to vector<28x75xf32>
    %125 = arith.select %119, %123, %124 : vector<28x75xi1>, vector<28x75xf32>
    %c0_90 = arith.constant 0 : index
    %c0_91 = arith.constant 0 : index
    %126 = vector.load %arg16[%c0_90, %c0_91] : memref<28x1xf32, #tpu.memory_space<vmem>>, vector<28x1xf32>
    %cst_92 = arith.constant 1.000000e+00 : f32
    %127 = vector.broadcast %cst_92 : f32 to vector<1x75xf32>
    %128 = arith.addf %93, %127 : vector<1x75xf32>
    %129 = vector.broadcast %126 : vector<28x1xf32> to vector<28x75xf32>
    %130 = vector.broadcast %128 : vector<1x75xf32> to vector<28x75xf32>
    %131 = arith.cmpf oeq, %129, %130 : vector<28x75xf32>
    %cst_93 = arith.constant 0.000000e+00 : f32
    %132 = vector.shape_cast %94 : vector<1x75xf32> to vector<1x75xf32>
    %133 = vector.broadcast %132 : vector<1x75xf32> to vector<28x75xf32>
    %134 = vector.broadcast %cst_93 : f32 to vector<28x75xf32>
    %135 = arith.select %131, %133, %134 : vector<28x75xi1>, vector<28x75xf32>
    %136 = arith.addf %125, %135 : vector<28x75xf32>
    %cst_94 = arith.constant dense<0.000000e+00> : vector<28x75xf32>
    %137 = tpu.matmul %74, %136, %cst_94 {dimension_numbers = #tpu.dot_dimension_numbers<[1], [0], [0], [1], [0, 0, 1, 1], [], []>} : vector<28x28xf32>, vector<28x75xf32>, vector<28x75xf32> -> vector<28x75xf32>
    %cst_95 = arith.constant 1.000000e+00 : f32
    %138 = vector.broadcast %cst_95 : f32 to vector<1x28xf32>
    %139 = arith.mulf %115, %137 : vector<28x75xf32>
    %cst_96 = arith.constant dense<0.000000e+00> : vector<1x75xf32>
    %140 = tpu.matmul %138, %139, %cst_96 {dimension_numbers = #tpu.dot_dimension_numbers<[1], [0], [0], [1], [0, 0, 1, 1], [], []>} : vector<1x28xf32>, vector<28x75xf32>, vector<1x75xf32> -> vector<1x75xf32>
    %c0_97 = arith.constant 0 : index
    %c0_98 = arith.constant 0 : index
    %141 = vector.load %arg17[%c0_97, %c0_98] : memref<75x600xf32, #tpu.memory_space<vmem>>, vector<75x600xf32>
    %cst_99 = arith.constant dense<0.000000e+00> : vector<1x600xf32>
    %142 = tpu.matmul %140, %141, %cst_99 {dimension_numbers = #tpu.dot_dimension_numbers<[1], [0], [0], [1], [0, 0, 1, 1], [], []>} : vector<1x75xf32>, vector<75x600xf32>, vector<1x600xf32> -> vector<1x600xf32>
    %c0_100 = arith.constant 0 : index
    %c0_101 = arith.constant 0 : index
    %143 = vector.load %arg18[%c0_100, %c0_101] : memref<1x600xf32, #tpu.memory_space<vmem>>, vector<1x600xf32>
    %144 = arith.addf %142, %143 : vector<1x600xf32>
    %cst_102 = arith.constant 0.000000e+00 : f32
    %145 = vector.broadcast %cst_102 : f32 to vector<1x600xf32>
    %146 = arith.maximumf %144, %145 : vector<1x600xf32>
    %c0_103 = arith.constant 0 : index
    %c0_104 = arith.constant 0 : index
    %147 = vector.load %arg19[%c0_103, %c0_104] : memref<600x192xf32, #tpu.memory_space<vmem>>, vector<600x192xf32>
    %cst_105 = arith.constant dense<0.000000e+00> : vector<1x192xf32>
    %148 = tpu.matmul %146, %147, %cst_105 {dimension_numbers = #tpu.dot_dimension_numbers<[1], [0], [0], [1], [0, 0, 1, 1], [], []>} : vector<1x600xf32>, vector<600x192xf32>, vector<1x192xf32> -> vector<1x192xf32>
    %c0_106 = arith.constant 0 : index
    %c0_107 = arith.constant 0 : index
    %149 = vector.load %arg20[%c0_106, %c0_107] : memref<1x192xf32, #tpu.memory_space<vmem>>, vector<1x192xf32>
    %150 = arith.addf %148, %149 : vector<1x192xf32>
    %cst_108 = arith.constant 0.000000e+00 : f32
    %151 = vector.broadcast %cst_108 : f32 to vector<1x192xf32>
    %152 = arith.maximumf %150, %151 : vector<1x192xf32>
    %c0_109 = arith.constant 0 : index
    %c0_110 = arith.constant 0 : index
    %153 = vector.load %arg21[%c0_109, %c0_110] : memref<192x10xf32, #tpu.memory_space<vmem>>, vector<192x10xf32>
    %cst_111 = arith.constant dense<0.000000e+00> : vector<1x10xf32>
    %154 = tpu.matmul %152, %153, %cst_111 {dimension_numbers = #tpu.dot_dimension_numbers<[1], [0], [0], [1], [0, 0, 1, 1], [], []>} : vector<1x192xf32>, vector<192x10xf32>, vector<1x10xf32> -> vector<1x10xf32>
    %c0_112 = arith.constant 0 : index
    %c0_113 = arith.constant 0 : index
    %155 = vector.load %arg22[%c0_112, %c0_113] : memref<1x10xf32, #tpu.memory_space<vmem>>, vector<1x10xf32>
    %156 = arith.addf %154, %155 : vector<1x10xf32>
    %c0_114 = arith.constant 0 : index
    %c0_115 = arith.constant 0 : index
    %c0_116 = arith.constant 0 : index
    %157 = vector.load %arg23[%c0_114, %c0_115, %c0_116] : memref<1x1x10xf32, #tpu.memory_space<vmem>>, vector<1x1x10xf32>
    %158 = vector.shape_cast %157 : vector<1x1x10xf32> to vector<1x10xf32>
    %159 = vector.shape_cast %156 : vector<1x10xf32> to vector<1x1x10xf32>
    tpu.vector_store %arg23[%c0_114, %c0_115, %c0_116], %159 {strides = array<i32>} : memref<1x1x10xf32, #tpu.memory_space<vmem>>, vector<1x1x10xf32>,
    return
  }
  func.func @transform_0(%arg0: i32) -> (i32, i32, i32) {
    %c0_i32 = arith.constant 0 : i32
    %c0_i32_0 = arith.constant 0 : i32
    %c0_i32_1 = arith.constant 0 : i32
    return %arg0, %c0_i32, %c0_i32_0 : i32, i32, i32
  }
  func.func @transform_1(%arg0: i32) -> (i32, i32, i32) {
    %c0_i32 = arith.constant 0 : i32
    %c0_i32_0 = arith.constant 0 : i32
    %c0_i32_1 = arith.constant 0 : i32
    return %arg0, %c0_i32, %c0_i32_0 : i32, i32, i32
  }
  func.func @transform_2(%arg0: i32) -> (i32, i32) {
    %c0_i32 = arith.constant 0 : i32
    %c0_i32_0 = arith.constant 0 : i32
    %c0_i32_1 = arith.constant 0 : i32
    return %c0_i32, %c0_i32_0 : i32, i32
  }
  func.func @transform_3(%arg0: i32) -> (i32, i32) {
    %c0_i32 = arith.constant 0 : i32
    %c0_i32_0 = arith.constant 0 : i32
    %c0_i32_1 = arith.constant 0 : i32
    return %c0_i32, %c0_i32_0 : i32, i32
  }
  func.func @transform_4(%arg0: i32) -> (i32, i32) {
    %c0_i32 = arith.constant 0 : i32
    %c0_i32_0 = arith.constant 0 : i32
    %c0_i32_1 = arith.constant 0 : i32
    return %c0_i32, %c0_i32_0 : i32, i32
  }
  func.func @transform_5(%arg0: i32) -> (i32, i32) {
    %c0_i32 = arith.constant 0 : i32
    %c0_i32_0 = arith.constant 0 : i32
    %c0_i32_1 = arith.constant 0 : i32
    return %c0_i32, %c0_i32_0 : i32, i32
  }
  func.func @transform_6(%arg0: i32) -> (i32, i32) {
    %c0_i32 = arith.constant 0 : i32
    %c0_i32_0 = arith.constant 0 : i32
    %c0_i32_1 = arith.constant 0 : i32
    return %c0_i32, %c0_i32_0 : i32, i32
  }
  func.func @transform_7(%arg0: i32) -> (i32, i32) {
    %c0_i32 = arith.constant 0 : i32
    %c0_i32_0 = arith.constant 0 : i32
    %c0_i32_1 = arith.constant 0 : i32
    return %c0_i32, %c0_i32_0 : i32, i32
  }
  func.func @transform_8(%arg0: i32) -> (i32, i32) {
    %c0_i32 = arith.constant 0 : i32
    %c0_i32_0 = arith.constant 0 : i32
    %c0_i32_1 = arith.constant 0 : i32
    return %c0_i32, %c0_i32_0 : i32, i32
  }
  func.func @transform_9(%arg0: i32) -> (i32, i32) {
    %c0_i32 = arith.constant 0 : i32
    %c0_i32_0 = arith.constant 0 : i32
    %c0_i32_1 = arith.constant 0 : i32
    return %c0_i32, %c0_i32_0 : i32, i32
  }
  func.func @transform_10(%arg0: i32) -> (i32, i32) {
    %c0_i32 = arith.constant 0 : i32
    %c0_i32_0 = arith.constant 0 : i32
    %c0_i32_1 = arith.constant 0 : i32
    return %c0_i32, %c0_i32_0 : i32, i32
  }
  func.func @transform_11(%arg0: i32) -> (i32, i32) {
    %c0_i32 = arith.constant 0 : i32
    %c0_i32_0 = arith.constant 0 : i32
    %c0_i32_1 = arith.constant 0 : i32
    return %c0_i32, %c0_i32_0 : i32, i32
  }
  func.func @transform_12(%arg0: i32) -> (i32, i32) {
    %c0_i32 = arith.constant 0 : i32
    %c0_i32_0 = arith.constant 0 : i32
    %c0_i32_1 = arith.constant 0 : i32
    return %c0_i32, %c0_i32_0 : i32, i32
  }
  func.func @transform_13(%arg0: i32) -> (i32, i32) {
    %c0_i32 = arith.constant 0 : i32
    %c0_i32_0 = arith.constant 0 : i32
    %c0_i32_1 = arith.constant 0 : i32
    return %c0_i32, %c0_i32_0 : i32, i32
  }
  func.func @transform_14(%arg0: i32) -> (i32, i32) {
    %c0_i32 = arith.constant 0 : i32
    %c0_i32_0 = arith.constant 0 : i32
    %c0_i32_1 = arith.constant 0 : i32
    return %c0_i32, %c0_i32_0 : i32, i32
  }
  func.func @transform_15(%arg0: i32) -> (i32, i32) {
    %c0_i32 = arith.constant 0 : i32
    %c0_i32_0 = arith.constant 0 : i32
    %c0_i32_1 = arith.constant 0 : i32
    return %c0_i32, %c0_i32_0 : i32, i32
  }
  func.func @transform_16(%arg0: i32) -> (i32, i32) {
    %c0_i32 = arith.constant 0 : i32
    %c0_i32_0 = arith.constant 0 : i32
    %c0_i32_1 = arith.constant 0 : i32
    return %c0_i32, %c0_i32_0 : i32, i32
  }
  func.func @transform_17(%arg0: i32) -> (i32, i32) {
    %c0_i32 = arith.constant 0 : i32
    %c0_i32_0 = arith.constant 0 : i32
    %c0_i32_1 = arith.constant 0 : i32
    return %c0_i32, %c0_i32_0 : i32, i32
  }
  func.func @transform_18(%arg0: i32) -> (i32, i32) {
    %c0_i32 = arith.constant 0 : i32
    %c0_i32_0 = arith.constant 0 : i32
    %c0_i32_1 = arith.constant 0 : i32
    return %c0_i32, %c0_i32_0 : i32, i32
  }
  func.func @transform_19(%arg0: i32) -> (i32, i32) {
    %c0_i32 = arith.constant 0 : i32
    %c0_i32_0 = arith.constant 0 : i32
    %c0_i32_1 = arith.constant 0 : i32
    return %c0_i32, %c0_i32_0 : i32, i32
  }
  func.func @transform_20(%arg0: i32) -> (i32, i32) {
    %c0_i32 = arith.constant 0 : i32
    %c0_i32_0 = arith.constant 0 : i32
    %c0_i32_1 = arith.constant 0 : i32
    return %c0_i32, %c0_i32_0 : i32, i32
  }
  func.func @transform_21(%arg0: i32) -> (i32, i32) {
    %c0_i32 = arith.constant 0 : i32
    %c0_i32_0 = arith.constant 0 : i32
    %c0_i32_1 = arith.constant 0 : i32
    return %c0_i32, %c0_i32_0 : i32, i32
  }
  func.func @transform_22(%arg0: i32) -> (i32, i32, i32) {
    %c0_i32 = arith.constant 0 : i32
    %c0_i32_0 = arith.constant 0 : i32
    %c0_i32_1 = arith.constant 0 : i32
    return %arg0, %c0_i32, %c0_i32_0 : i32, i32, i32
  }
}

</mosaic_0001>

<bundles_post_ra>
// kernel: mul.4
= control target key start
LH: loop header
LB: loop body
LE: loop exit
PB: predicated region body
PF: predicated region fallthrough
CT: control target
= control target key end

     0   :  { %vm43_vm0 = vcmask 23552   ;;  %vm4_vm1 = vcmask 1047556   ;;  %s444_s14 = smov 125   ;;  %s446_s29 = smov 75   ;;  %vm6_vm2 = vcmask 203776   ;;  %vm47_vm3 = vcmask 179200   ;;  %s793_s0 = inlined_call_operand.vmem [shape: f32[25,8,25], index: 0, kind: input, shape index: {}]   ;;  %s794_s1 = inlined_call_operand.vmem [shape: f32[25,200], index: 1, kind: output, shape index: {}]  }
   0x1   :  { %v371_v0 = vld [vmem:[%s793_s0 + $0xc5] sm:$0x1]   ;;  %v377_v23 = vld [vmem:[%s793_s0 + $0x84] ss:$8 sm:$0xf]   ;;  %s447_s21 = smov 50  }
   0x2   :  { %v372_v1 = vld [vmem:[%s793_s0 + $0xc5] sm:$0x1]   ;;  %v378_v24 = vld [vmem:[%s793_s0 + $0x84] ss:$8 sm:$0xf0]   ;;  %s449_s9 = smov 25  }
   0x3   :  { %v101_v2 = vsel %vm43_vm0, %v372_v1, %v371_v0  ;;  %v354_v3 = vld [vmem:[%s793_s0 + $0x5] ss:$8 sm:$0xf]   ;;  %v125_v26 = vsel %vm4_vm1, %v378_v24, %v377_v23  ;;  %v375_v27 = vld [vmem:[%s793_s0 + $0x4] ss:$8 sm:$0xf]  }
   0x4   :  { %v355_v4 = vld [vmem:[%s793_s0 + $0x5] ss:$8 sm:$0xf0]   ;;  %102 = vrot.lane.b32.xlu1 %v101_v2, %s444_s14  ;;  %v376_v28 = vld [vmem:[%s793_s0 + $0x4] ss:$8 sm:$0xf0]  }
   0x5   :  { %v36_v5 = vsel %vm4_vm1, %v355_v4, %v354_v3  ;;  %v356_v6 = vld [vmem:[%s793_s0 + $0x5] ss:$8 sm:$0xf]   ;;  %v115_v29 = vsel %vm4_vm1, %v376_v28, %v375_v27  ;;  %v380_v30 = vld [vmem:[%s793_s0 + $0x44] ss:$8 sm:$0xf]  }
   0x6   :  { %v357_v7 = vld [vmem:[%s793_s0 + $0x5] ss:$8 sm:$0xf0]   ;;  %v381_v31 = vld [vmem:[%s793_s0 + $0x44] ss:$8 sm:$0xf0]  }
   0x7   :  { %v42_v8 = vsel %vm4_vm1, %v357_v7, %v356_v6  ;;  %v365_v9 = vld [vmem:[%s793_s0 + $0x45] ss:$8 sm:$0xf]   ;;  %v383_v32 = vld [vmem:[%s793_s0 + $0xc4] sm:$0x1]   ;;  %v136_v35 = vsel %vm4_vm1, %v381_v31, %v380_v30  ;;  %s450_s24 = smov 22  }
   0x8   :  { %v366_v10 = vld [vmem:[%s793_s0 + $0x45] ss:$8 sm:$0xf0]   ;;  %v44_v11 = vsel %vm43_vm0, %v42_v8, %v36_v5  ;;  %v387_v33 = vld [vmem:[%s793_s0 + $0x83] ss:$8 sm:$0xf]  }
   0x9   :  { %v79_v12 = vsel %vm4_vm1, %v366_v10, %v365_v9  ;;  %v367_v13 = vld [vmem:[%s793_s0 + $0x45] ss:$8 sm:$0xf]   ;;  %45 = vrot.lane.b32.xlu0 %v44_v11, %s444_s14  ;;  %v388_v34 = vld [vmem:[%s793_s0 + $0x83] ss:$8 sm:$0xf0]  }
   0xa   :  { %v368_v14 = vld [vmem:[%s793_s0 + $0x45] ss:$8 sm:$0xf0]   ;;  %v385_v36 = vld [vmem:[%s793_s0 + $0x3] ss:$8 sm:$0xf]   ;;  %v164_v38 = vsel %vm4_vm1, %v388_v34, %v387_v33 }
   0xb   :  { %v85_v15 = vsel %vm4_vm1, %v368_v14, %v367_v13  ;;  %v359_v16 = vld [vmem:[%s793_s0 + $0x85] ss:$8 sm:$0xf]   ;;  %v386_v37 = vld [vmem:[%s793_s0 + $0x3] ss:$8 sm:$0xf0]  }
   0xc   :  { %v360_v17 = vld [vmem:[%s793_s0 + $0x85] ss:$8 sm:$0xf0]   ;;  %v87_v18 = vsel %vm43_vm0, %v85_v15, %v79_v12  ;;  %v154_v39 = vsel %vm4_vm1, %v386_v37, %v385_v36  ;;  %v390_v40 = vld [vmem:[%s793_s0 + $0x43] ss:$8 sm:$0xf]  }
   0xd   :  { %v57_v19 = vsel %vm4_vm1, %v360_v17, %v359_v16  ;;  %v361_v20 = vld [vmem:[%s793_s0 + $0x85] ss:$8 sm:$0xf]   ;;  %88 = vrot.lane.b32.xlu1 %v87_v18, %s444_s14  ;;  %v391_v41 = vld [vmem:[%s793_s0 + $0x43] ss:$8 sm:$0xf0]  }
   0xe   :  { %v362_v21 = vld [vmem:[%s793_s0 + $0x85] ss:$8 sm:$0xf0]   ;;  %v393_v42 = vld [vmem:[%s793_s0 + $0xc3] sm:$0x1]   ;;  %v175_v45 = vsel %vm4_vm1, %v391_v41, %v390_v40  ;;  %vm50_vm4 = vcmask 1048552  }
   0xf   :  { %v63_v22 = vsel %vm4_vm1, %v362_v21, %v361_v20  ;;  %v397_v43 = vld [vmem:[%s793_s0 + $0x82] ss:$8 sm:$0xf]   ;;  %v408_v53 = vld [vmem:[%s793_s0 + $0x87] ss:$8 sm:$0xf]  }
  0x10   :  { %v65_v25 = vsel %vm43_vm0, %v63_v22, %v57_v19  ;;  %v398_v44 = vld [vmem:[%s793_s0 + $0x82] ss:$8 sm:$0xf0]   ;;  %v409_v54 = vld [vmem:[%s793_s0 + $0x87] ss:$8 sm:$0xf0]  }
  0x11   :  { %66 = vrot.lane.b32.xlu0 %v65_v25, %s444_s14  ;;  %s445_s14 = smov 100   ;;  %v395_v46 = vld [vmem:[%s793_s0 + $0x2] ss:$8 sm:$0xf]   ;;  %v203_v48 = vsel %vm4_vm1, %v398_v44, %v397_v43  ;;  %v352_v55 = vld [vmem:[%s793_s0 + $0xc0] sm:$0x1]   ;;  %v243_v4 = vsel %vm4_vm1, %v409_v54, %v408_v53 }
  0x12   :  { %126 = vrot.lane.b32.xlu1 %v125_v26, %s445_s14  ;;  %v396_v47 = vld [vmem:[%s793_s0 + $0x2] ss:$8 sm:$0xf0]   ;;  %353 = vst.msk [vmem:[%s794_s1 + $0x30] sm:$0x1] %vm6_vm2, %v352_v55   ;;  %vm118_vm5 = vcmask 1023776  }
  0x13   :  { %v193_v49 = vsel %vm4_vm1, %v396_v47, %v395_v46  ;;  %v403_v50 = vld [vmem:[%s793_s0 + $0xc2] sm:$0x1]   ;;  %v2_v56 = vld [vmem:[%s793_s0] ss:$8 sm:$0xf]   ;;  %vm157_vm6 = vcmask 818776  }
  0x14   :  { %v400_v51 = vld [vmem:[%s793_s0 + $0x42] ss:$8 sm:$0xf]   ;;  %v3_v57 = vld [vmem:[%s793_s0] ss:$8 sm:$0xf0]  }
  0x15   :  { %116 = vrot.lane.b32.xlu0 %v115_v29, %s445_s14  ;;  %v401_v52 = vld [vmem:[%s793_s0 + $0x42] ss:$8 sm:$0xf0]   ;;  %v5_v58 = vsel %vm4_vm1, %v3_v57, %v2_v56  ;;  %v346_v59 = vld [vmem:[%s793_s0 + $0x40] ss:$8 sm:$0xf]  }
  0x16   :  { %144 = vrot.lane.b32.xlu1 %v383_v32, %s445_s14  ;;  %v347_v60 = vld [vmem:[%s793_s0 + $0x40] ss:$8 sm:$0xf0]   ;;  %v214_v61 = vsel %vm4_vm1, %v401_v52, %v400_v51  ;;  %7 = vst.msk [vmem:[%s794_s1] sm:$0xff] %vm6_vm2, %v5_v58   ;;  %v414_v8 = vld [vmem:[%s793_s0 + $0xc7] sm:$0x1]  }
  0x17   :  { %v13_v62 = vsel %vm4_vm1, %v347_v60, %v346_v59  ;;  %v349_v63 = vld [vmem:[%s793_s0 + $0x80] ss:$8 sm:$0xf]   ;;  %v405_v1 = vld [vmem:[%s793_s0 + $0x7] ss:$8 sm:$0xf]  }
  0x18   :  { %v350_v0 = vld [vmem:[%s793_s0 + $0x80] ss:$8 sm:$0xf0]   ;;  %v406_v2 = vld [vmem:[%s793_s0 + $0x7] ss:$8 sm:$0xf0]  }
  0x19   :  { %137 = vrot.lane.b32.xlu0 %v136_v35, %s445_s14  ;;  %348 = vst.msk [vmem:[%s794_s1 + $0x10] sm:$0xff] %vm6_vm2, %v13_v62   ;;  %v22_v3 = vsel %vm4_vm1, %v350_v0, %v349_v63  ;;  %v232_v5 = vsel %vm4_vm1, %v406_v2, %v405_v1  ;;  %v411_v6 = vld [vmem:[%s793_s0 + $0x47] ss:$8 sm:$0xf]   ;;  %v424_v18 = vld [vmem:[%s793_s0 + $0xc1] sm:$0x1]  }
  0x1a   :  { %165 = vrot.lane.b32.xlu1 %v164_v38, %s446_s29  ;;  %351 = vst.msk [vmem:[%s794_s1 + $0x20] sm:$0xff] %vm6_vm2, %v22_v3   ;;  %v412_v7 = vld [vmem:[%s793_s0 + $0x47] ss:$8 sm:$0xf0]   ;;  %v435_v28 = vld [vmem:[%s793_s0 + $0xc6] sm:$0x1]  }
  0x1b   :  { %v418_v9 = vld [vmem:[%s793_s0 + $0x81] ss:$8 sm:$0xf]   ;;  %v254_v11 = vsel %vm4_vm1, %v412_v7, %v411_v6  ;;  %v429_v19 = vld [vmem:[%s793_s0 + $0x86] ss:$8 sm:$0xf]  }
  0x1c   :  { %v419_v10 = vld [vmem:[%s793_s0 + $0x81] ss:$8 sm:$0xf0]   ;;  %v430_v20 = vld [vmem:[%s793_s0 + $0x86] ss:$8 sm:$0xf0]  }
  0x1d   :  { %155 = vrot.lane.b32.xlu0 %v154_v39, %s446_s29  ;;  %v416_v12 = vld [vmem:[%s793_s0 + $0x1] ss:$8 sm:$0xf]   ;;  %v282_v14 = vsel %vm4_vm1, %v419_v10, %v418_v9  ;;  %v426_v22 = vld [vmem:[%s793_s0 + $0x6] ss:$8 sm:$0xf]   ;;  %v322_v24 = vsel %vm4_vm1, %v430_v20, %v429_v19 }
  0x1e   :  { %183 = vrot.lane.b32.xlu1 %v393_v42, %s446_s29  ;;  %v417_v13 = vld [vmem:[%s793_s0 + $0x1] ss:$8 sm:$0xf0]   ;;  %v427_v23 = vld [vmem:[%s793_s0 + $0x6] ss:$8 sm:$0xf0]  }
  0x1f   :  { %v272_v15 = vsel %vm4_vm1, %v417_v13, %v416_v12  ;;  %v421_v16 = vld [vmem:[%s793_s0 + $0x41] ss:$8 sm:$0xf]   ;;  %v311_v25 = vsel %vm4_vm1, %v427_v23, %v426_v22  ;;  %v432_v26 = vld [vmem:[%s793_s0 + $0x46] ss:$8 sm:$0xf]  }
  0x20   :  { %v422_v17 = vld [vmem:[%s793_s0 + $0x41] ss:$8 sm:$0xf0]   ;;  %v433_v27 = vld [vmem:[%s793_s0 + $0x46] ss:$8 sm:$0xf0]  }
  0x21   :  { %176 = vrot.lane.b32.xlu0 %v175_v45, %s446_s29  ;;  %v293_v21 = vsel %vm4_vm1, %v422_v17, %v421_v16  ;;  %v333_v29 = vsel %vm4_vm1, %v433_v27, %v432_v26  ;;  %vm196_vm7 = vcmask 613776   ;;  %vm235_vm8 = vcmask 589176  }
  0x22   :  { %204 = vrot.lane.b32.xlu1 %v203_v48, %s447_s21  ;;  %vm275_vm9 = vcmask 408776   ;;  %vm314_vm10 = vcmask 384176  }
  0x25   :  { %194 = vrot.lane.b32.xlu0 %v193_v49, %s447_s21 }
  0x26   :  { %222 = vrot.lane.b32.xlu1 %v403_v50, %s447_s21 }
  0x29   :  { %215 = vrot.lane.b32.xlu0 %v214_v61, %s447_s21  ;;  %s448_s21 = smov 47  }
  0x2a   :  { %244 = vrot.lane.b32.xlu1 %v243_v4, %s448_s21 }
  0x2d   :  { %233 = vrot.lane.b32.xlu0 %v232_v5, %s448_s21 }
  0x2e   :  { %262 = vrot.lane.b32.xlu1 %v414_v8, %s448_s21 }
  0x31   :  { %255 = vrot.lane.b32.xlu0 %v254_v11, %s448_s21 }
  0x32   :  { %283 = vrot.lane.b32.xlu1 %v282_v14, %s449_s9 }
  0x35   :  { %273 = vrot.lane.b32.xlu0 %v272_v15, %s449_s9 }
  0x36   :  { %301 = vrot.lane.b32.xlu1 %v424_v18, %s449_s9 }
  0x39   :  { %294 = vrot.lane.b32.xlu0 %v293_v21, %s449_s9 }
  0x3a   :  { %323 = vrot.lane.b32.xlu1 %v322_v24, %s450_s24 }
  0x3d   :  { %312 = vrot.lane.b32.xlu0 %v311_v25, %s450_s24 }
  0x3e   :  { %341 = vrot.lane.b32.xlu1 %v435_v28, %s450_s24 }
  0x41   :  { %334 = vrot.lane.b32.xlu0 %v333_v29, %s450_s24 }
  0x76   :  { %v103_v30 = vpop.permute.xlu1 %102  }
  0x77   :  { %373 = vst.msk [vmem:[%s794_s1 + $0x38] sm:$0x1] %vm47_vm3, %v103_v30  }
  0x78   :  { %374 = vst.msk [vmem:[%s794_s1 + $0x30] sm:$0x1] %vm50_vm4, %v103_v30  }
  0x7b   :  { %v46_v31 = vpop.permute.xlu0 %45  }
  0x7c   :  { %358 = vst.msk [vmem:[%s794_s1 + $0x8] sm:$0xff] %vm47_vm3, %v46_v31  }
  0x7d   :  { %51 = vst.msk [vmem:[%s794_s1] sm:$0xff] %vm50_vm4, %v46_v31  }
  0x7f   :  { %v89_v32 = vpop.permute.xlu1 %88  }
  0x80   :  { %369 = vst.msk [vmem:[%s794_s1 + $0x18] sm:$0xff] %vm47_vm3, %v89_v32  }
  0x81   :  { %370 = vst.msk [vmem:[%s794_s1 + $0x10] sm:$0xff] %vm50_vm4, %v89_v32  }
  0x83   :  { %v67_v33 = vpop.permute.xlu0 %66  }
  0x84   :  { %363 = vst.msk [vmem:[%s794_s1 + $0x28] sm:$0xff] %vm47_vm3, %v67_v33   ;;  %v127_v34 = vpop.permute.xlu1 %126  }
  0x85   :  { %364 = vst.msk [vmem:[%s794_s1 + $0x20] sm:$0xff] %vm50_vm4, %v67_v33  }
  0x86   :  { %379 = vst.msk [vmem:[%s794_s1 + $0x20] sm:$0xff] %vm118_vm5, %v127_v34  }
  0x87   :  { %v117_v35 = vpop.permute.xlu0 %116  }
  0x88   :  { %119 = vst.msk [vmem:[%s794_s1] sm:$0xff] %vm118_vm5, %v117_v35   ;;  %v145_v36 = vpop.permute.xlu1 %144  }
  0x89   :  { %384 = vst.msk [vmem:[%s794_s1 + $0x30] sm:$0x1] %vm118_vm5, %v145_v36  }
  0x8b   :  { %v138_v37 = vpop.permute.xlu0 %137  }
  0x8c   :  { %382 = vst.msk [vmem:[%s794_s1 + $0x10] sm:$0xff] %vm118_vm5, %v138_v37   ;;  %v166_v38 = vpop.permute.xlu1 %165  }
  0x8d   :  { %389 = vst.msk [vmem:[%s794_s1 + $0x20] sm:$0xff] %vm157_vm6, %v166_v38  }
  0x8f   :  { %v156_v39 = vpop.permute.xlu0 %155  }
  0x90   :  { %158 = vst.msk [vmem:[%s794_s1] sm:$0xff] %vm157_vm6, %v156_v39   ;;  %v184_v40 = vpop.permute.xlu1 %183  }
  0x91   :  { %394 = vst.msk [vmem:[%s794_s1 + $0x30] sm:$0x1] %vm157_vm6, %v184_v40  }
  0x93   :  { %v177_v41 = vpop.permute.xlu0 %176  }
  0x94   :  { %392 = vst.msk [vmem:[%s794_s1 + $0x10] sm:$0xff] %vm157_vm6, %v177_v41   ;;  %v205_v42 = vpop.permute.xlu1 %204  }
  0x95   :  { %399 = vst.msk [vmem:[%s794_s1 + $0x20] sm:$0xff] %vm196_vm7, %v205_v42  }
  0x97   :  { %v195_v43 = vpop.permute.xlu0 %194  }
  0x98   :  { %197 = vst.msk [vmem:[%s794_s1] sm:$0xff] %vm196_vm7, %v195_v43   ;;  %v223_v44 = vpop.permute.xlu1 %222  }
  0x99   :  { %404 = vst.msk [vmem:[%s794_s1 + $0x30] sm:$0x1] %vm196_vm7, %v223_v44  }
  0x9b   :  { %v216_v45 = vpop.permute.xlu0 %215  }
  0x9c   :  { %402 = vst.msk [vmem:[%s794_s1 + $0x10] sm:$0xff] %vm196_vm7, %v216_v45   ;;  %v245_v46 = vpop.permute.xlu1 %244  }
  0x9d   :  { %410 = vst.msk [vmem:[%s794_s1 + $0x28] sm:$0xff] %vm235_vm8, %v245_v46  }
  0x9f   :  { %v234_v47 = vpop.permute.xlu0 %233  }
  0xa0   :  { %407 = vst.msk [vmem:[%s794_s1 + $0x8] sm:$0xff] %vm235_vm8, %v234_v47   ;;  %v263_v48 = vpop.permute.xlu1 %262  }
  0xa1   :  { %415 = vst.msk [vmem:[%s794_s1 + $0x38] sm:$0x1] %vm235_vm8, %v263_v48  }
  0xa3   :  { %v256_v49 = vpop.permute.xlu0 %255  }
  0xa4   :  { %413 = vst.msk [vmem:[%s794_s1 + $0x18] sm:$0xff] %vm235_vm8, %v256_v49   ;;  %v284_v50 = vpop.permute.xlu1 %283  }
  0xa5   :  { %420 = vst.msk [vmem:[%s794_s1 + $0x20] sm:$0xff] %vm275_vm9, %v284_v50  }
  0xa7   :  { %v274_v51 = vpop.permute.xlu0 %273  }
  0xa8   :  { %276 = vst.msk [vmem:[%s794_s1] sm:$0xff] %vm275_vm9, %v274_v51   ;;  %v302_v52 = vpop.permute.xlu1 %301  }
  0xa9   :  { %425 = vst.msk [vmem:[%s794_s1 + $0x30] sm:$0x1] %vm275_vm9, %v302_v52  }
  0xab   :  { %v295_v53 = vpop.permute.xlu0 %294  }
  0xac   :  { %423 = vst.msk [vmem:[%s794_s1 + $0x10] sm:$0xff] %vm275_vm9, %v295_v53   ;;  %v324_v54 = vpop.permute.xlu1 %323  }
  0xad   :  { %431 = vst.msk [vmem:[%s794_s1 + $0x28] sm:$0xff] %vm314_vm10, %v324_v54  }
  0xaf   :  { %v313_v55 = vpop.permute.xlu0 %312  }
  0xb0   :  { %428 = vst.msk [vmem:[%s794_s1 + $0x8] sm:$0xff] %vm314_vm10, %v313_v55   ;;  %v342_v56 = vpop.permute.xlu1 %341  }
  0xb1   :  { %436 = vst.msk [vmem:[%s794_s1 + $0x38] sm:$0x1] %vm314_vm10, %v342_v56  }
  0xb3   :  { %v335_v57 = vpop.permute.xlu0 %334  }
  0xb4   :  { %434 = vst.msk [vmem:[%s794_s1 + $0x18] sm:$0xff] %vm314_vm10, %v335_v57  }

// kernel: tile.10
= control target key start
LH: loop header
LB: loop body
LE: loop exit
PB: predicated region body
PF: predicated region fallthrough
CT: control target
= control target key end

     0   :  { %vm9_vm0 = vcmask 23552   ;;  %s77_s12 = smov 125   ;;  %s78_s13 = smov 75   ;;  %vm3_vm1 = vcmask 203776   ;;  %vm13_vm2 = vcmask 179200   ;;  %vm16_vm3 = vcmask 1048552   ;;  %s124_s0 = inlined_call_operand.vmem [shape: f32[8,25], index: 0, kind: input, shape index: {}]   ;;  %s125_s1 = inlined_call_operand.vmem [shape: f32[200], index: 1, kind: output, shape index: {}]  }
   0x1   :  { %v62_v0 = vld [vmem:[%s124_s0 + $0x5] sm:$0x1]   ;;  %v65_v3 = vld [vmem:[%s124_s0 + $0x3] sm:$0x1]   ;;  %v64_v4 = vld [vmem:[%s124_s0 + $0x4] sm:$0x1]  }
   0x2   :  { %v63_v1 = vld [vmem:[%s124_s0 + $0x5] sm:$0x1]   ;;  %26 = vrot.lane.b32.xlu1 %v65_v3, %s78_s13  ;;  %v66_v5 = vld [vmem:[%s124_s0 + $0x2] sm:$0x1]   ;;  %v2_v6 = vld [vmem:[%s124_s0] sm:$0x1]  }
   0x3   :  { %v10_v2 = vsel %vm9_vm0, %v63_v1, %v62_v0  ;;  %4 = vst.msk [vmem:[#allocation0] sm:$0x1] %vm3_vm1, %v2_v6   ;;  %s79_s20 = smov 100   ;;  %s80_s21 = smov 50   ;;  %v67_v7 = vld [vmem:[%s124_s0 + $0x7] sm:$0x1]  }
   0x4   :  { %11 = vrot.lane.b32.xlu0 %v10_v2, %s77_s12  ;;  %v68_v8 = vld [vmem:[%s124_s0 + $0x1] sm:$0x1]   ;;  %s81_s26 = smov 47   ;;  %s82_s27 = smov 25   ;;  %v69_v9 = vld [vmem:[%s124_s0 + $0x6] sm:$0x1]  }
   0x5   :  { %s83_s0 = smov 22   ;;  %vm22_vm4 = vcmask 1023776   ;;  %vm28_vm5 = vcmask 818776   ;;  %vm34_vm6 = vcmask 613776   ;;  %vm40_vm7 = vcmask 589176  }
   0x6   :  { %32 = vrot.lane.b32.xlu1 %v66_v5, %s80_s21  ;;  %vm47_vm8 = vcmask 408776   ;;  %vm53_vm9 = vcmask 384176  }
   0x8   :  { %20 = vrot.lane.b32.xlu0 %v64_v4, %s79_s20 }
   0xa   :  { %45 = vrot.lane.b32.xlu1 %v68_v8, %s82_s27 }
   0xc   :  { %38 = vrot.lane.b32.xlu0 %v67_v7, %s81_s26 }
  0x10   :  { %51 = vrot.lane.b32.xlu0 %v69_v9, %s83_s0 }
  0x74   :  { %v27_v11 = vpop.permute.xlu1 %26  }
  0x76   :  { %v12_v10 = vpop.permute.xlu0 %11  }
  0x77   :  { %15 = vst.msk [vmem:[#allocation0 + $0x1] sm:$0x1] %vm13_vm2, %v12_v10  }
  0x78   :  { %17 = vst.msk [vmem:[#allocation0] sm:$0x1] %vm16_vm3, %v12_v10   ;;  %v33_v13 = vpop.permute.xlu1 %32  }
  0x7a   :  { %v21_v12 = vpop.permute.xlu0 %20  }
  0x7b   :  { %23 = vst.msk [vmem:[#allocation0] sm:$0x1] %vm22_vm4, %v21_v12  }
  0x7c   :  { %29 = vst.msk [vmem:[#allocation0] sm:$0x1] %vm28_vm5, %v27_v11   ;;  %v46_v15 = vpop.permute.xlu1 %45  }
  0x7d   :  { %35 = vst.msk [vmem:[#allocation0] sm:$0x1] %vm34_vm6, %v33_v13  }
  0x7e   :  { %v39_v14 = vpop.permute.xlu0 %38   ;;  %48 = vst.msk [vmem:[#allocation0] sm:$0x1] %vm47_vm8, %v46_v15  }
  0x7f   :  { %42 = vst.msk [vmem:[#allocation0 + $0x1] sm:$0x1] %vm40_vm7, %v39_v14  }
  0x82   :  { %v52_v16 = vpop.permute.xlu0 %51  }
  0x83   :  { %55 = vst.msk [vmem:[#allocation0 + $0x1] sm:$0x1] %vm53_vm9, %v52_v16  }
  0x8a   :  { %v59_v17 = vld [vmem:[#allocation0] sm:$0x3] }
  0x8b   :  { %61 = vst [vmem:[%s125_s1] sm:$0x3] %v59_v17 }

// kernel: tile.11
= control target key start
LH: loop header
LB: loop body
LE: loop exit
PB: predicated region body
PF: predicated region fallthrough
CT: control target
= control target key end

     0   :  { %s34_s0 = inlined_call_operand.vmem [shape: f32[200], index: 0, kind: input, shape index: {}]   ;;  %s35_s1 = inlined_call_operand.vmem [shape: f32[3,200], index: 1, kind: output, shape index: {}]  }
   0x1   :  { %v4_v0 = vld [vmem:[%s34_s0] ss:$0 sm:$0xff]  ;;  %v10_v1 = vld [vmem:[%s34_s0 + $0x1] ss:$0 sm:$0xff] }
   0x2   :  { %5 = vst [vmem:[%s35_s1] sm:$0xf] %v4_v0  ;;  %11 = vst [vmem:[%s35_s1 + $0x4] sm:$0xf] %v10_v1 }

// kernel: tile.12
= control target key start
LH: loop header
LB: loop body
LE: loop exit
PB: predicated region body
PF: predicated region fallthrough
CT: control target
= control target key end

     0   :  { %vm22_vm0 = vcmask 457728   ;;  %vm43_vm1 = vcmask 916480   ;;  %vm12_vm2 = vcmask 588800   ;;  %s99_s10 = smov 72   ;;  %s100_s11 = smov 16   ;;  %vm26_vm3 = vcmask 130048   ;;  %s134_s0 = inlined_call_operand.vmem [shape: f32[3,200], index: 0, kind: input, shape index: {}]   ;;  %s135_s1 = inlined_call_operand.vmem [shape: f32[1,600], index: 1, kind: output, shape index: {}]  }
   0x1   :  { %v92_v0 = vld [vmem:[%s134_s0 + $0x4] sm:$0xf]  ;;  %v8_v1 = vld [vmem:[%s134_s0] sm:$0xf]  ;;  %s20_s0 = smov 3  ;;  %vm29_vm4 = vcmask 1048128  }
   0x2   :  { %7 = vst [vmem:[#allocation1 + $0x8] sm:$0xf] %v92_v0  ;;  %9 = vst [vmem:[#allocation1] sm:$0xf] %v8_v1  ;;  %vm57_vm5 = vcmask 1047680   ;;  %vm50_vm6 = vcmask 720000  }
   0x9   :  { %v18_v2 = vld [vmem:[#allocation1 + $0x9] sm:$0x1]   ;;  %v33_v4 = vld [vmem:[#allocation1 + $0x1] sm:$0x1]   ;;  %v15_v6 = vld [vmem:[#allocation1] sm:$0x1]  }
   0xa   :  { %v21_v3 = vld [vmem:[#allocation1 + $0x1] ss:$8 sm:%s20_s0]   ;;  %34 = vrot.lane.b32.xlu1 %v33_v4, %s99_s10  ;;  %v40_v7 = vld [vmem:[#allocation1 + $0x2] sm:$0x1]   ;;  %v42_v8 = vld [vmem:[#allocation1 + $0xa] sm:$0x1]  }
   0xb   :  { %v23_v5 = vsel %vm22_vm0, %v21_v3, %v18_v2  ;;  %16 = vst [vmem:[#allocation0] sm:$0x1] %v15_v6   ;;  %v54_v9 = vld [vmem:[#allocation1 + $0x2] sm:$0x1]   ;;  %v11_v10 = vld [vmem:[#allocation1 + $0x8] sm:$0x1]   ;;  %v44_v11 = vsel %vm43_vm1, %v42_v8, %v40_v7 }
   0xc   :  { %24 = vrot.lane.b32.xlu0 %v23_v5, %s99_s10  ;;  %14 = vst.msk [vmem:[#allocation0 + $0x8] sm:$0x1] %vm12_vm2, %v11_v10  }
   0xe   :  { %55 = vrot.lane.b32.xlu1 %v54_v9, %s100_s11 }
  0x10   :  { %45 = vrot.lane.b32.xlu0 %v44_v11, %s100_s11 }
  0x12   :  { %v63_v12 = vld [vmem:[#allocation0] sm:$0x1] }
  0x13   :  { %65 = vst [vmem:[%s135_s1] sm:$0x1] %v63_v12 }
  0x7c   :  { %v35_v13 = vpop.permute.xlu1 %34  }
  0x7e   :  { %v25_v14 = vpop.permute.xlu0 %24  }
  0x7f   :  { %28 = vst.msk [vmem:[#allocation0 + $0x18] sm:$0x1] %vm26_vm3, %v25_v14  }
  0x80   :  { %31 = vst.msk [vmem:[#allocation0 + $0x8] ss:$8 sm:$0x3] %vm29_vm4, %v25_v14   ;;  %v56_v15 = vpop.permute.xlu1 %55  }
  0x81   :  { %38 = vst.msk [vmem:[#allocation0 + $0x10] sm:$0x1] %vm12_vm2, %v35_v13  }
  0x82   :  { %v46_v16 = vpop.permute.xlu0 %45   ;;  %59 = vst.msk [vmem:[#allocation0 + $0x18] sm:$0x1] %vm57_vm5, %v56_v15  }
  0x83   :  { %49 = vst.msk [vmem:[#allocation0 + $0x20] sm:$0x1] %vm26_vm3, %v46_v16  }
  0x84   :  { %52 = vst.msk [vmem:[#allocation0 + $0x20] sm:$0x1] %vm50_vm6, %v46_v16  }
  0x87   :  { %v67_v17 = vld [vmem:[#allocation0 + $0x8] sm:$0x1] }
  0x88   :  { %93 = vst [vmem:[%s135_s1 + $0x1] sm:$0x1] %v67_v17  ;;  %v72_v18 = vld [vmem:[#allocation0 + $0x10] sm:$0x1] }
  0x89   :  { %94 = vst [vmem:[%s135_s1 + $0x2] sm:$0x1] %v72_v18  ;;  %v78_v19 = vld [vmem:[#allocation0 + $0x18] sm:$0x1] }
  0x8a   :  { %95 = vst [vmem:[%s135_s1 + $0x3] sm:$0x1] %v78_v19 }
  0x8b   :  { %v84_v20 = vld [vmem:[#allocation0 + $0x20] sm:$0x1] }
  0x8c   :  { %96 = vst [vmem:[%s135_s1 + $0x4] sm:$0x1] %v84_v20 }

// kernel: tile.16
= control target key start
LH: loop header
LB: loop body
LE: loop exit
PB: predicated region body
PF: predicated region fallthrough
CT: control target
= control target key end

     0   :  { %s22_s0 = inlined_call_operand.vmem [shape: f32[64], index: 0, kind: input, shape index: {}]   ;;  %s23_s1 = inlined_call_operand.vmem [shape: f32[3,64], index: 1, kind: output, shape index: {}]  }
   0x1   :  { %v4_v0 = vld [vmem:[%s22_s0] ss:$0 sm:$0xff] }
   0x2   :  { %5 = vst [vmem:[%s23_s1] sm:$0xf] %v4_v0 }

// kernel: tile.17
= control target key start
LH: loop header
LB: loop body
LE: loop exit
PB: predicated region body
PF: predicated region fallthrough
CT: control target
= control target key end

     0   :  { %vm8_vm0 = vcmask 523264   ;;  %s29_s8 = smov 64   ;;  %vm14_vm1 = vcmask 1048064   ;;  %s49_s0 = inlined_call_operand.vmem [shape: f32[3,64], index: 0, kind: input, shape index: {}]   ;;  %s50_s1 = inlined_call_operand.vmem [shape: f32[1,192], index: 1, kind: output, shape index: {}]  }
   0x1   :  { %v4_v0 = vld [vmem:[%s49_s0] sm:$0xf]  ;;  %s6_s0 = smov 3 }
   0x2   :  { %5 = vst [vmem:[#allocation1] sm:$0xf] %v4_v0 }
   0x9   :  { %v11_v1 = vld [vmem:[#allocation1 + $0x1] sm:$0x1]   ;;  %v7_v2 = vld [vmem:[#allocation1] ss:$2 sm:%s6_s0]  }
   0xa   :  { %12 = vrot.lane.b32.xlu0 %v11_v1, %s29_s8  ;;  %9 = vst.msk [vmem:[#allocation0] ss:$8 sm:$0x3] %vm8_vm0, %v7_v2  }
  0x11   :  { %v23_v3 = vld [vmem:[#allocation0 + $0x8] sm:$0x1] }
  0x12   :  { %27 = vst [vmem:[%s50_s1 + $0x1] sm:$0x1] %v23_v3 }
  0x7c   :  { %v13_v4 = vpop.permute.xlu0 %12  }
  0x7d   :  { %15 = vst.msk [vmem:[#allocation0] sm:$0x1] %vm14_vm1, %v13_v4  }
  0x84   :  { %v19_v5 = vld [vmem:[#allocation0] sm:$0x1] }
  0x85   :  { %21 = vst [vmem:[%s50_s1] sm:$0x1] %v19_v5 }

// kernel: keypoint_patch_forward.1
= control target key start
LH: loop header
LB: loop body
LE: loop exit
PB: predicated region body
PF: predicated region fallthrough
CT: control target
= control target key end

     0   :  { %s9339_s0 = inlined_call_operand.vmem [shape: f32[2,196,16], index: 0, kind: input, shape index: {}]   ;;  %s9340_s1 = inlined_call_operand.vmem [shape: f32[2,28,28], index: 1, kind: input, shape index: {}]   ;;  %s9341_s2 = inlined_call_operand.vmem [shape: f32[16,64], index: 2, kind: input, shape index: {}]   ;;  %s9342_s3 = inlined_call_operand.vmem [shape: f32[1,16], index: 3, kind: input, shape index: {}]   ;;  %s9343_s4 = inlined_call_operand.vmem [shape: f32[144,32], index: 4, kind: input, shape index: {}]   ;;  %s9344_s5 = inlined_call_operand.vmem [shape: f32[1,32], index: 5, kind: input, shape index: {}]   ;;  %s9345_s6 = inlined_call_operand.vmem [shape: f32[32,6], index: 6, kind: input, shape index: {}]   ;;  %s9346_s7 = inlined_call_operand.vmem [shape: f32[1,6], index: 7, kind: input, shape index: {}]   ;;  %s9347_s8 = inlined_call_operand.vmem [shape: f32[196,1], index: 8, kind: input, shape index: {}]   ;;  %s9348_s9 = inlined_call_operand.vmem [shape: f32[196,1], index: 9, kind: input, shape index: {}]   ;;  %s9349_s10 = inlined_call_operand.vmem [shape: f32[6,75], index: 10, kind: input, shape index: {}]   ;;  %s9350_s11 = inlined_call_operand.vmem [shape: f32[6,75], index: 11, kind: input, shape index: {}]   ;;  %s9351_s12 = inlined_call_operand.vmem [shape: f32[1,75], index: 12, kind: input, shape index: {}]   ;;  %s9352_s13 = inlined_call_operand.vmem [shape: f32[1,75], index: 13, kind: input, shape index: {}]   ;;  %s9353_s14 = inlined_call_operand.vmem [shape: f32[28,1], index: 14, kind: input, shape index: {}, may-alias: {14,15}]   ;;  %s9354_s15 = inlined_call_operand.vmem [shape: f32[28,1], index: 15, kind: input, shape index: {}, may-alias: {14,15}]   ;;  %s9355_s16 = inlined_call_operand.vmem [shape: f32[75,600], index: 16, kind: input, shape index: {}]   ;;  %s9356_s17 = inlined_call_operand.vmem [shape: f32[1,600], index: 17, kind: input, shape index: {}]   ;;  %s9357_s18 = inlined_call_operand.vmem [shape: f32[600,192], index: 18, kind: input, shape index: {}]   ;;  %s9358_s19 = inlined_call_operand.vmem [shape: f32[1,192], index: 19, kind: input, shape index: {}]   ;;  %s9359_s20 = inlined_call_operand.vmem [shape: f32[192,10], index: 20, kind: input, shape index: {}]   ;;  %s9360_s21 = inlined_call_operand.vmem [shape: f32[1,10], index: 21, kind: input, shape index: {}]   ;;  %s9361_s22 = inlined_call_operand.hbm [shape: f32[2,1,10], index: 22, kind: output, shape index: {}]  }
   0x1   :  { %9392 = sst [smem:[#allocation99_spill]] %s9339_s0 }
   0x2   :  { %9393 = sst [smem:[#allocation100_spill]] %s9340_s1 }
   0x3   :  { %9394 = sst [smem:[#allocation101_spill]] %s9341_s2 }
   0x4   :  { %9395 = sst [smem:[#allocation102_spill]] %s9342_s3 }
   0x5   :  { %9396 = sst [smem:[#allocation103_spill]] %s9343_s4 }
   0x6   :  { %9397 = sst [smem:[#allocation104_spill]] %s9344_s5 }
   0x7   :  { %9398 = sst [smem:[#allocation105_spill]] %s9345_s6 }
   0x8   :  { %9399 = sst [smem:[#allocation106_spill]] %s9347_s8 }
   0x9   :  { %27 = vsyncpa [#allocation5], 0 }
   0xa   :  { %29 = vsyncpa [#allocation5 + $0x1], 0  ;;  %s6347_s3 = smov 0   ;;  %s6349_s28 = smov 0  }
   0xb   :  { %s6351_s29 = smov 0   ;;  %s6353_s30 = smov 0  }
   0xc LB: > { %9400 = sst [smem:[#allocation7_spill]] %s6203_s3  ;;  %s6368_s4 = sadd.s32 4294967295, %s6215_s30   ;;  %s6215_s30 = sphi %s6353_s30, %s9605_s30   ;;  %s6211_s29 = sphi %s6351_s29, %s9607_s29   ;;  %s6207_s28 = sphi %s6349_s28, %s9609_s28   ;;  %s6203_s3 = sphi %s6347_s3, %s9608_s3  }
   0xd   : > { %9401 = sst [smem:[#allocation8_spill]] %s6211_s29  ;;  %s5460_s0 = sadd.s32 4294967294, %s6215_s30  }
   0xe   : > { %9402 = sst [smem:[#allocation9_spill]] %s6215_s30  ;;  %s6372_s23 = sadd.s32 1, %s6215_s30  }
   0xf   : > { %9403 = sst [smem:[#allocation10_spill]] %s6372_s23  ;;  %s514_s1 = sadd.s32 1, %s6211_s29 }
  0x10   : > { %s511_s5 = ssub.s32 %s6215_s30, %s6372_s23  ;;  %p524_p0 = scmp.ne.s32.totalorder %s6211_s29, %s6207_s28 }
  0x11   : > { %p512_p1 = scmp.eq.s32.totalorder %s511_s5, 0  ;;  %p525_p2 = scmp.eq.s32.totalorder %s6368_s4, 1 }
  0x12   : > { %p530_p3 = scmp.ne.s32.totalorder %s6207_s28, %s6203_s3  ;;  %p531_p4 = scmp.eq.s32.totalorder %s5460_s0, 1 }
  0x13   : > { %s6383_s24 = scalar_select %p512_p1, %s6211_s29, %s514_s1  }
  0x14   : > { %p6385_p5 = por %p525_p2, %p524_p0  ;;  %p6389_p6 = por %p531_p4, %p530_p3 }
  0x15   : > { %9404 = sst [smem:[#allocation11_spill]] %s6383_s24  ;;  %p5463_p7 = scmp.ge.s32.totalorder %s6215_s30, 1 }
  0x16   : > { %s9406_s25 = scalar_select %p6389_p6, 1, 0 }
  0x17   : > { %p625_p8 = scmp.lt.s32.totalorder %s6215_s30, 3 }
  0x18   : > { %9407 = sst [smem:[#allocation12_spill]] %s9406_s25 }
  0x19   : > { %p626_p9 = pnand %p5463_p7, %p625_p8 }
  0x1b   : > { %629 = sbr.rel (%p626_p9) target bundleno = 3150 (0xc4e), region = 108 }
  0x22   : > { %s9408_s8 = sld [smem:[#allocation106_spill]]  ;;  %v6403_v1 = vld [vmem:[%s9348_s9] sm:$0xff]  ;;  %s9409_s24 = sld [smem:[#allocation101_spill]]  ;;  %v6217_v3 = vmov 0   ;;  %vm728_vm0 = vcmask 130048   ;;  %v9372_v6 = vmov 0.0  }
  0x23   : > { %6152 = vset.pattern.permute.xlu0 %v6217_v3  ;;  %6151 = vset.pattern.permute.xlu1 %v6217_v3  ;;  %p691_p10 = scmp.lt.s32.totalorder %s6368_s4, 1  ;;  %1301 = vst.msk [vmem:[#allocation2] sm:$0xff] %vm728_vm0, %v9372_v6  ;;  %1302 = vst.msk [vmem:[#allocation2 + $0x8] sm:$0xff] %vm728_vm0, %v9372_v6  ;;  %v9370_v7 = vmov 0.0|0.0   ;;  %vm6220_vm1 = vmmov 0   ;;  %s9410_s27 = sld [smem:[#allocation99_spill]] }
  0x24   : > { %1785 = vperm.xlu1 %6151, %v6403_v1   ;;  %1303 = vst.msk [vmem:[#allocation2 + $0x10] sm:$0xff] %vm728_vm0, %v9372_v6  ;;  %1304 = vst.msk [vmem:[#allocation2 + $0x18] sm:$0xff] %vm728_vm0, %v9372_v6  ;;  %5756 = vmatprep.subr.bf16.mxu0 %v9370_v7  ;;  %v6492_v8 = vld [vmem:[%s9348_s9 + $0x8] sm:$0xff]  ;;  %v6526_v16 = vld [vmem:[%s9348_s9 + $0x10] sm:$0xff]  ;;  %s9383_s2 = smov 16   ;;  %vm1706_vm2 = vcmask 261248  }
  0x25   : > { %1305 = vst.msk [vmem:[#allocation2 + $0x20] sm:$0xff] %vm728_vm0, %v9372_v6  ;;  %1306 = vst.msk [vmem:[#allocation2 + $0x28] sm:$0xff] %vm728_vm0, %v9372_v6  ;;  %6089 = vmatprep.subr.bf16.mxu1 %v9370_v7  ;;  %s6475_s29 = scalar_select %p691_p10, %s6368_s4, 1  ;;  %5612 = vmatprep.mubr.msk.f32.mxu0 %vm6220_vm1, %v9372_v6  ;;  %v6556_v22 = vld [vmem:[%s9348_s9 + $0x18] sm:$0xff]  ;;  %v6584_v28 = vld [vmem:[%s9348_s9 + $0x20] sm:$0xff]  ;;  %vm2033_vm3 = vcmask 392448  }
  0x26   : > { %1307 = vst.msk [vmem:[#allocation2 + $0x30] sm:$0xff] %vm728_vm0, %v9372_v6  ;;  %1308 = vst.msk [vmem:[#allocation2 + $0x38] sm:$0xff] %vm728_vm0, %v9372_v6  ;;  %5651 = vmatprep.mubr.msk.f32.mxu1 %vm6220_vm1, %v9372_v6  ;;  %v6614_v34 = vld [vmem:[%s9348_s9 + $0x28] sm:$0xff]  ;;  %v6644_v40 = vld [vmem:[%s9348_s9 + $0x30] sm:$0xff]  ;;  %s9375_s26 = smov 96   ;;  %vm1329_vm4 = vcmask 125952  }
  0x27   : > { %1309 = vst.msk [vmem:[#allocation2 + $0x40] sm:$0xff] %vm728_vm0, %v9372_v6  ;;  %1310 = vst.msk [vmem:[#allocation2 + $0x48] sm:$0xff] %vm728_vm0, %v9372_v6  ;;  %s6097_s23 = smul.u32 200, %s6475_s29  ;;  %v6676_v46 = vld [vmem:[%s9348_s9 + $0x38] sm:$0xff]  ;;  %v6686_v47 = vld [vmem:[%s9348_s9 + $0x40] sm:$0xff]  ;;  %s9388_s3 = smov 80  }
  0x28   : > { %v6398_v0 = vld [vmem:[%s9408_s8] sm:$0xff]  ;;  %v727_v4 = vld [vmem:[%s9409_s24 + $0x8] sm:$0xff]  ;;  %1311 = vst.msk [vmem:[#allocation2 + $0x50] sm:$0xff] %vm728_vm0, %v9372_v6  ;;  %1312 = vst.msk [vmem:[#allocation2 + $0x58] sm:$0xff] %vm728_vm0, %v9372_v6  ;;  %2591 = vperm.xlu1 %6151, %v6403_v1   ;;  %s9504_s25 = smov 16   ;;  %s9505_s1 = smov 48  }
  0x29   : > { %v726_v2 = vld [vmem:[%s9409_s24] sm:$0xff]  ;;  %2112 = vperm.xlu0 %6152, %v6398_v0   ;;  %1313 = vst.msk [vmem:[#allocation2 + $0x60] sm:$0xff] %vm728_vm0, %v9372_v6  ;;  %1314 = vst.msk [vmem:[#allocation2 + $0x68] sm:$0xff] %vm728_vm0, %v9372_v6  ;;  %s6487_s0 = scalar_lea.vmem %s9410_s27, %s6097_s23  ;;  %v6511_v13 = vld [vmem:[%s9408_s8 + $0x8] sm:$0xff]  ;;  %s9368_s27 = smov 32   ;;  %vm2360_vm5 = vcmask 523648  }
  0x2a   : > { %v5757_v5 = vpack.c.bf16 %v727_v4, %v726_v2  ;;  %1315 = vst.msk [vmem:[#allocation2 + $0x70] sm:$0xff] %vm728_vm0, %v9372_v6  ;;  %1316 = vst.msk [vmem:[#allocation2 + $0x78] sm:$0xff] %vm728_vm0, %v9372_v6  ;;  %v701_v9 = vld [vmem:[%s6487_s0] sm:$0xff]  ;;  %v714_v10 = vld [vmem:[%s6487_s0 + $0x68] sm:$0xff]  ;;  %s9499_s23 = sld [smem:[#allocation103_spill]]  ;;  %s9503_s24 = smov 112  }
  0x2b   : > { %1317 = vst.msk [vmem:[#allocation2 + $0x80] sm:$0xff] %vm728_vm0, %v9372_v6  ;;  %1318 = vst.msk [vmem:[#allocation2 + $0x88] sm:$0xff] %vm728_vm0, %v9372_v6  ;;  %v702_v11 = vld [vmem:[%s6487_s0 + $0x8] sm:$0xff]  ;;  %v715_v12 = vld [vmem:[%s6487_s0 + $0x70] sm:$0xff]  ;;  %s9507_s5 = smov 80   ;;  %vm2512_vm6 = vcmask 654848  }
  0x2c   : > { %1319 = vst.msk [vmem:[#allocation2 + $0x90] sm:$0xff] %vm728_vm0, %v9372_v6  ;;  %1320 = vst.msk [vmem:[#allocation2 + $0x98] sm:$0xff] %vm728_vm0, %v9372_v6  ;;  %5758 = vmatpush3.bf16.msra.mxu0 %v5757_v5  ;;  %6090 = vmatpush3.bf16.msra.mxu1 %v5757_v5  ;;  %v703_v14 = vld [vmem:[%s6487_s0 + $0x10] sm:$0xff]  ;;  %v716_v15 = vld [vmem:[%s6487_s0 + $0x78] sm:$0xff]  ;;  %vm2839_vm7 = vcmask 786048   ;;  %vm3166_vm8 = vcmask 917248  }
  0x2d   : > { %1321 = vst.msk [vmem:[#allocation2 + $0xa0] sm:$0xff] %vm728_vm0, %v9372_v6  ;;  %1322 = vst.msk [vmem:[#allocation2 + $0xa8] sm:$0xff] %vm728_vm0, %v9372_v6  ;;  %2918 = vperm.xlu0 %6152, %v6398_v0   ;;  %5759 = vmatprep.subr.bf16.mxu1 %v9370_v7  ;;  %v704_v17 = vld [vmem:[%s6487_s0 + $0x18] sm:$0xff]  ;;  %v717_v18 = vld [vmem:[%s6487_s0 + $0x80] sm:$0xff]  ;;  %vm3318_vm9 = vcmask 1048448   ;;  %s9592_s30 = sld [smem:[#allocation104_spill]] }
  0x2e   : > { %1323 = vst.msk [vmem:[#allocation2 + $0xb0] sm:$0xff] %vm728_vm0, %v9372_v6  ;;  %1324 = vst.msk [vmem:[#allocation2 + $0xb8] sm:$0xff] %vm728_vm0, %v9372_v6  ;;  %5786 = vmatprep.subr.bf16.mxu0 %v9370_v7  ;;  %1790 = vperm.xlu1 %6151, %v6492_v8   ;;  %v6541_v19 = vld [vmem:[%s9408_s8 + $0x10] sm:$0xff]  ;;  %v705_v20 = vld [vmem:[%s6487_s0 + $0x20] sm:$0xff]  ;;  %vm1731_vm10 = vcmask 257152   ;;  %vm2058_vm11 = vcmask 388352  }
  0x2f   : > { %1325 = vst.msk [vmem:[#allocation2 + $0xc0] sm:$0xff] %vm728_vm0, %v9372_v6  ;;  %1326 = vst.msk [vmem:[#allocation2 + $0xc8] sm:$0xff] %vm728_vm0, %v9372_v6  ;;  %5613 = vmatmul.mubr.msk.f32.vlgmr.msra.gmra.mrb[0].mxu0 %vm728_vm0, %v701_v9  ;;  %5652 = vmatmul.mubr.msk.f32.vlgmr.msra.gmra.mrb[0].mxu1 %vm728_vm0, %v714_v10  ;;  %v718_v21 = vld [vmem:[%s6487_s0 + $0x88] sm:$0xff]  ;;  %v719_v24 = vld [vmem:[%s6487_s0 + $0x90] sm:$0xff]  ;;  %vm2385_vm12 = vcmask 519552   ;;  %vm2537_vm13 = vcmask 650752  }
  0x30   : > { %1327 = vst.msk [vmem:[#allocation2 + $0xd0] sm:$0xff] %vm728_vm0, %v9372_v6  ;;  %1328 = vst.msk [vmem:[#allocation2 + $0xd8] sm:$0xff] %vm728_vm0, %v9372_v6  ;;  %5615 = vmatprep.mubr.msk.f32.mxu0 %vm6220_vm1, %v9372_v6  ;;  %5654 = vmatprep.mubr.msk.f32.mxu1 %vm6220_vm1, %v9372_v6  ;;  %v706_v23 = vld [vmem:[%s6487_s0 + $0x28] sm:$0xff]  ;;  %v6571_v25 = vld [vmem:[%s9408_s8 + $0x18] sm:$0xff]  ;;  %vm2864_vm14 = vcmask 781952   ;;  %vm3191_vm15 = vcmask 913152  }
  0x31   : > { %2596 = vperm.xlu0 %6152, %v6492_v8   ;;  %v707_v26 = vld [vmem:[%s6487_s0 + $0x30] sm:$0xff]  ;;  %v720_v27 = vld [vmem:[%s6487_s0 + $0x98] sm:$0xff]  ;;  %v721_v30 = vld [vmem:[%s6487_s0 + $0xa0] sm:$0xff] }
  0x32   : > { %2117 = vperm.xlu1 %6151, %v6511_v13   ;;  %v708_v29 = vld [vmem:[%s6487_s0 + $0x38] sm:$0xff]  ;;  %v6599_v31 = vld [vmem:[%s9408_s8 + $0x20] sm:$0xff]  ;;  %v722_v33 = vld [vmem:[%s6487_s0 + $0xa8] sm:$0xff] }
  0x33   : > { %5616 = vmatmul.mubr.msk.f32.gmra.mrb[2].mxu0 %vm728_vm0, %v702_v11  ;;  %5655 = vmatmul.mubr.msk.f32.gmra.mrb[2].mxu1 %vm728_vm0, %v715_v12  ;;  %v709_v32 = vld [vmem:[%s6487_s0 + $0x40] sm:$0xff]  ;;  %v710_v35 = vld [vmem:[%s6487_s0 + $0x48] sm:$0xff]  ;;  %v723_v36 = vld [vmem:[%s6487_s0 + $0xb0] sm:$0xff] }
  0x34   : > { %5618 = vmatprep.mubr.msk.f32.mxu0 %vm6220_vm1, %v9372_v6  ;;  %5657 = vmatprep.mubr.msk.f32.mxu1 %vm6220_vm1, %v9372_v6  ;;  %v6629_v37 = vld [vmem:[%s9408_s8 + $0x28] sm:$0xff]  ;;  %v711_v38 = vld [vmem:[%s6487_s0 + $0x50] sm:$0xff]  ;;  %v724_v39 = vld [vmem:[%s6487_s0 + $0xb8] sm:$0xff] }
  0x35   : > { %2923 = vperm.xlu0 %6152, %v6511_v13   ;;  %v712_v41 = vld [vmem:[%s6487_s0 + $0x58] sm:$0xff]  ;;  %v725_v42 = vld [vmem:[%s6487_s0 + $0xc0] sm:$0xf]  ;;  %v6657_v43 = vld [vmem:[%s9408_s8 + $0x30] sm:$0xff] }
  0x36   : > { %1795 = vperm.xlu1 %6151, %v6526_v16   ;;  %v713_v44 = vld [vmem:[%s6487_s0 + $0x60] sm:$0xff]  ;;  %v6671_v45 = vld [vmem:[%s9408_s8 + $0x38] sm:$0xff]  ;;  %v6702_v49 = vld [vmem:[%s9408_s8 + $0x48] sm:$0xff]  ;;  %s9377_s0 = smov 112  }
  0x37   : > { %5619 = vmatmul.mubr.msk.f32.gmra.mrb[4].mxu0 %vm728_vm0, %v703_v14  ;;  %5658 = vmatmul.mubr.msk.f32.gmra.mrb[4].mxu1 %vm728_vm0, %v716_v15  ;;  %v6695_v48 = vld [vmem:[%s9408_s8 + $0x40] sm:$0xff]  ;;  %v6707_v50 = vld [vmem:[%s9348_s9 + $0x48] sm:$0xff]  ;;  %v6714_v51 = vld [vmem:[%s9348_s9 + $0x50] sm:$0xff] }
  0x38   : > { %5621 = vmatprep.mubr.msk.f32.mxu0 %vm6220_vm1, %v9372_v6  ;;  %5660 = vmatprep.mubr.msk.f32.mxu1 %vm6220_vm1, %v9372_v6  ;;  %v6723_v52 = vld [vmem:[%s9408_s8 + $0x50] sm:$0xff]  ;;  %v6730_v53 = vld [vmem:[%s9408_s8 + $0x58] sm:$0xff]  ;;  %v6742_v55 = vld [vmem:[%s9348_s9 + $0x60] sm:$0xff] }
  0x39   : > { %2601 = vperm.xlu0 %6152, %v6526_v16   ;;  %v6735_v54 = vld [vmem:[%s9348_s9 + $0x58] sm:$0xff]  ;;  %v6751_v56 = vld [vmem:[%s9408_s8 + $0x60] sm:$0xff]  ;;  %v6758_v57 = vld [vmem:[%s9408_s8 + $0x68] sm:$0xff] }
  0x3a   : > { %2122 = vperm.xlu1 %6151, %v6541_v19   ;;  %v1771_v58 = vld [vmem:[%s9348_s9 + $0x68] sm:$0xff]  ;;  %v1772_v59 = vld [vmem:[%s9348_s9 + $0x70] sm:$0xff]  ;;  %v1773_v61 = vld [vmem:[%s9348_s9 + $0x78] sm:$0xff] }
  0x3b   : > { %5622 = vmatmul.mubr.msk.f32.gmra.mrb[6].mxu0 %vm728_vm0, %v704_v17  ;;  %5661 = vmatmul.mubr.msk.f32.gmra.mrb[6].mxu1 %vm728_vm0, %v717_v18  ;;  %v6772_v60 = vld [vmem:[%s9408_s8 + $0x70] sm:$0xff]  ;;  %v2100_v62 = vld [vmem:[%s9408_s8 + $0x78] sm:$0xff]  ;;  %v1774_v4 = vld [vmem:[%s9348_s9 + $0x80] sm:$0xff] }
  0x3c   : > { %5624 = vmatprep.mubr.msk.f32.mxu0 %vm6220_vm1, %v9372_v6  ;;  %5663 = vmatprep.mubr.msk.f32.mxu1 %vm6220_vm1, %v9372_v6  ;;  %v1733_v10 = vld [vmem:[#allocation2 + $0x3] sm:$0xff] }
  0x3d   : > { %2928 = vperm.xlu0 %6152, %v6541_v19   ;;  %v1581_v11 = vld [vmem:[#allocation2 + $0x2] sm:$0xff] }
  0x3e   : > { %1800 = vperm.xlu1 %6151, %v6556_v22   ;;  %v1775_v18 = vld [vmem:[%s9348_s9 + $0x88] sm:$0xff] }
  0x3f   : > { %5625 = vmatmul.mubr.msk.f32.gmra.mrb[8].mxu0 %vm728_vm0, %v705_v20  ;;  %5664 = vmatmul.mubr.msk.f32.gmra.mrb[8].mxu1 %vm728_vm0, %v718_v21 }
  0x40   : > { %5627 = vmatprep.mubr.msk.f32.mxu0 %vm6220_vm1, %v9372_v6  ;;  %5666 = vmatprep.mubr.msk.f32.mxu1 %vm6220_vm1, %v9372_v6 }
  0x41   : > { %2606 = vperm.xlu0 %6152, %v6556_v22  }
  0x42   : > { %2127 = vperm.xlu1 %6151, %v6571_v25  }
  0x43   : > { %5628 = vmatmul.mubr.msk.f32.gmra.mrb[10].mxu0 %vm728_vm0, %v706_v23  ;;  %5667 = vmatmul.mubr.msk.f32.gmra.mrb[10].mxu1 %vm728_vm0, %v719_v24  ;;  %v2102_v24 = vld [vmem:[%s9408_s8 + $0x88] sm:$0xff] }
  0x44   : > { %5630 = vmatprep.mubr.msk.f32.mxu0 %vm6220_vm1, %v9372_v6  ;;  %5669 = vmatprep.mubr.msk.f32.mxu1 %vm6220_vm1, %v9372_v6 }
  0x45   : > { %2933 = vperm.xlu0 %6152, %v6571_v25  }
  0x46   : > { %1805 = vperm.xlu1 %6151, %v6584_v28  }
  0x47   : > { %5631 = vmatmul.mubr.msk.f32.gmra.mrb[12].mxu0 %vm728_vm0, %v707_v26  ;;  %5670 = vmatmul.mubr.msk.f32.gmra.mrb[12].mxu1 %vm728_vm0, %v720_v27 }
  0x48   : > { %5633 = vmatprep.mubr.msk.f32.mxu0 %vm6220_vm1, %v9372_v6  ;;  %5672 = vmatprep.mubr.msk.f32.mxu1 %vm6220_vm1, %v9372_v6 }
  0x49   : > { %2611 = vperm.xlu0 %6152, %v6584_v28  }
  0x4a   : > { %2132 = vperm.xlu1 %6151, %v6599_v31  }
  0x4b   : > { %5634 = vmatmul.mubr.msk.f32.gmra.mrb[14].mxu0 %vm728_vm0, %v708_v29  ;;  %5673 = vmatmul.mubr.msk.f32.gmra.mrb[14].mxu1 %vm728_vm0, %v721_v30 }
  0x4c   : > { %5636 = vmatprep.mubr.msk.f32.mxu0 %vm6220_vm1, %v9372_v6  ;;  %5675 = vmatprep.mubr.msk.f32.mxu1 %vm6220_vm1, %v9372_v6 }
  0x4d   : > { %2938 = vperm.xlu0 %6152, %v6599_v31  }
  0x4e   : > { %1810 = vperm.xlu1 %6151, %v6614_v34  }
  0x4f   : > { %5637 = vmatmul.mubr.msk.f32.gmra.mrb[16].mxu0 %vm728_vm0, %v709_v32  ;;  %5676 = vmatmul.mubr.msk.f32.gmra.mrb[16].mxu1 %vm728_vm0, %v722_v33  ;;  %v2909_v32 = vld [vmem:[%s9408_s8 + $0x90] sm:$0xff] }
  0x50   : > { %5639 = vmatprep.mubr.msk.f32.mxu0 %vm6220_vm1, %v9372_v6  ;;  %5678 = vmatprep.mubr.msk.f32.mxu1 %vm6220_vm1, %v9372_v6 }
  0x51   : > { %2616 = vperm.xlu0 %6152, %v6614_v34  }
  0x52   : > { %2137 = vperm.xlu1 %6151, %v6629_v37  }
  0x53   : > { %5640 = vmatmul.mubr.msk.f32.gmra.mrb[18].mxu0 %vm728_vm0, %v710_v35  ;;  %5679 = vmatmul.mubr.msk.f32.gmra.mrb[18].mxu1 %vm728_vm0, %v723_v36  ;;  %v6852_v36 = vld [vmem:[%s9348_s9 + $0xa0] sm:$0xff] }
  0x54   : > { %5642 = vmatprep.mubr.msk.f32.mxu0 %vm6220_vm1, %v9372_v6  ;;  %5681 = vmatprep.mubr.msk.f32.mxu1 %vm6220_vm1, %v9372_v6 }
  0x55   : > { %2943 = vperm.xlu0 %6152, %v6629_v37  }
  0x56   : > { %1815 = vperm.xlu1 %6151, %v6644_v40  }
  0x57   : > { %5643 = vmatmul.mubr.msk.f32.gmra.mrb[20].mxu0 %vm728_vm0, %v711_v38  ;;  %5682 = vmatmul.mubr.msk.f32.gmra.mrb[20].mxu1 %vm728_vm0, %v724_v39 }
  0x58   : > { %5645 = vmatprep.mubr.msk.f32.mxu0 %vm6220_vm1, %v9372_v6  ;;  %5684 = vmatprep.mubr.msk.f32.mxu1 %vm6220_vm1, %v9372_v6 }
  0x59   : > { %2621 = vperm.xlu0 %6152, %v6644_v40  }
  0x5a   : > { %2142 = vperm.xlu1 %6151, %v6657_v43  }
  0x5b   : > { %5646 = vmatmul.mubr.msk.f32.gmra.mrb[22].mxu0 %vm728_vm0, %v712_v41  ;;  %5685 = vmatmul.mubr.msk.f32.gmra.mrb[22].mxu1 %vm728_vm0, %v725_v42 }
  0x5c   : > { %5648 = vmatprep.mubr.msk.f32.mxu0 %vm6220_vm1, %v9372_v6 }
  0x5d   : > { %2948 = vperm.xlu0 %6152, %v6657_v43  }
  0x5e   : > { %1820 = vperm.xlu1 %6151, %v6676_v46  }
  0x5f   : > { %5649 = vmatmul.mubr.msk.f32.gmra.mrb[24].mxu0 %vm728_vm0, %v713_v44 }
  0x61   : > { %2147 = vperm.xlu0 %6152, %v6671_v45  }
  0x62   : > { %2626 = vperm.xlu1 %6151, %v6676_v46  }
  0x65   : > { %1825 = vperm.xlu0 %6152, %v6686_v47  }
  0x66   : > { %2953 = vperm.xlu1 %6151, %v6671_v45  }
  0x69   : > { %2631 = vperm.xlu0 %6152, %v6686_v47  }
  0x6a   : > { %2152 = vperm.xlu1 %6151, %v6695_v48  }
  0x6d   : > { %2958 = vperm.xlu0 %6152, %v6695_v48  }
  0x6e   : > { %1830 = vperm.xlu1 %6151, %v6707_v50  }
  0x71   : > { %2157 = vperm.xlu0 %6152, %v6702_v49  }
  0x72   : > { %2636 = vperm.xlu1 %6151, %v6707_v50  }
  0x75   : > { %1835 = vperm.xlu0 %6152, %v6714_v51  }
  0x76   : > { %2963 = vperm.xlu1 %6151, %v6702_v49  }
  0x79   : > { %2641 = vperm.xlu0 %6152, %v6714_v51  }
  0x7a   : > { %2162 = vperm.xlu1 %6151, %v6723_v52  }
  0x7d   : > { %2968 = vperm.xlu0 %6152, %v6723_v52  }
  0x7e   : > { %1840 = vperm.xlu1 %6151, %v6735_v54  }
  0x81   : > { %2167 = vperm.xlu0 %6152, %v6730_v53  }
  0x82   : > { %2646 = vperm.xlu1 %6151, %v6735_v54  }
  0x85   : > { %1845 = vperm.xlu0 %6152, %v6742_v55  }
  0x86   : > { %2973 = vperm.xlu1 %6151, %v6730_v53  }
  0x89   : > { %2651 = vperm.xlu0 %6152, %v6742_v55  }
  0x8a   : > { %2172 = vperm.xlu1 %6151, %v6751_v56  }
  0x8d   : > { %2978 = vperm.xlu0 %6152, %v6751_v56  }
  0x8e   : > { %1850 = vperm.xlu1 %6151, %v1771_v58  }
  0x91   : > { %2177 = vperm.xlu0 %6152, %v6758_v57  }
  0x92   : > { %2656 = vperm.xlu1 %6151, %v1771_v58  }
  0x95   : > { %1408 = vperm.xlu0 %6152, %v6398_v0  }
  0x96   : > { %1855 = vperm.xlu1 %6151, %v1772_v59  }
  0x99   : > { %2983 = vperm.xlu0 %6152, %v6758_v57  }
  0x9a   : > { %2661 = vperm.xlu1 %6151, %v1772_v59  }
  0x9d   : > { %2182 = vperm.xlu0 %6152, %v6772_v60  }
  0x9e   : > { %1860 = vperm.xlu1 %6151, %v1773_v61  }
  0xa1   : > { %1413 = vperm.xlu0 %6152, %v6511_v13  }
  0xa2   : > { %3397 = vperm.xlu1 %6151, %v6403_v1   ;;  %v2101_v1 = vld [vmem:[%s9408_s8 + $0x80] sm:$0xff] }
  0xa3   : > { %v1786_v0 = vpop.permute.xlu1 %1785 }
  0xa4   : > { %v1908_v14 = vmul.f32 %v1786_v0, %v1733_v10 }
  0xa5   : > { %2988 = vperm.xlu0 %6152, %v6772_v60  }
  0xa6   : > { %1418 = vperm.xlu1 %6151, %v6541_v19  }
  0xa7   : > { %v6789_v3 = vpop.permute.xlu1 %2591 }
  0xa8   : > { %v6784_v63 = vpop.permute.xlu0 %2112 }
  0xa9   : > { %2187 = vperm.xlu0 %6152, %v2100_v62  }
  0xaa   : > { %2993 = vperm.xlu1 %6151, %v2100_v62  }
  0xac   : > { %v6787_v2 = vpop.permute.xlu0 %2918 }
  0xad   : > { %2666 = vperm.xlu0 %6152, %v1773_v61   ;;  %v6799_v9 = vpop.permute.xlu1 %1790 }
  0xae   : > { %2192 = vperm.xlu1 %6151, %v2101_v1  }
  0xb0   : > { %v6797_v5 = vpop.permute.xlu0 %2596 }
  0xb1   : > { %1865 = vperm.xlu0 %6152, %v1774_v4   ;;  %v6803_v13 = vpop.permute.xlu1 %2117 }
  0xb2   : > { %3402 = vperm.xlu1 %6151, %v6492_v8   ;;  %v1776_v8 = vld [vmem:[%s9348_s9 + $0x90] sm:$0xff] }
  0xb4   : > { %v6801_v12 = vpop.permute.xlu0 %2923 }
  0xb5   : > { %9411 = vst [vmem:[#allocation13_spill] sm:$0xff] %v6801_v12  ;;  %1631 = vrot.lane.b32.xlu0 %v1581_v11, %s9383_s2  ;;  %v6809_v17 = vpop.permute.xlu1 %1795 }
  0xb6   : > { %2671 = vperm.xlu1 %6151, %v1774_v4  }
  0xb8   : > { %v6807_v15 = vpop.permute.xlu0 %2601 }
  0xb9   : > { %9412 = vst [vmem:[#allocation14_spill] sm:$0xff] %v6807_v15  ;;  %1958 = vrot.lane.b32.xlu0 %v1908_v14, %s9368_s27  ;;  %v6817_v20 = vpop.permute.xlu1 %2122  ;;  %s9498_s27 = sld [smem:[#allocation102_spill]] }
  0xba   : > { %1870 = vperm.xlu1 %6151, %v1775_v18  }
  0xbc   : > { %v6815_v19 = vpop.permute.xlu0 %2928 }
  0xbd   : > { %9413 = vst [vmem:[#allocation15_spill] sm:$0xff] %v6815_v19  ;;  %1423 = vperm.xlu0 %6152, %v6571_v25   ;;  %v6825_v23 = vpop.permute.xlu1 %1800  ;;  %v1777_v25 = vld [vmem:[%s9348_s9 + $0x98] sm:$0xff] }
  0xbe   : > { %9415 = vst [vmem:[#allocation17_spill] sm:$0xff] %v6825_v23  ;;  %2998 = vperm.xlu1 %6151, %v2101_v1  }
  0xc0   : > { %v6823_v21 = vpop.permute.xlu0 %2606 }
  0xc1   : > { %9414 = vst [vmem:[#allocation16_spill] sm:$0xff] %v6823_v21  ;;  %1875 = vperm.xlu0 %6152, %v1776_v8   ;;  %v6832_v27 = vpop.permute.xlu1 %2127 }
  0xc2   : > { %2197 = vperm.xlu1 %6151, %v2102_v24  }
  0xc4   : > { %v6830_v26 = vpop.permute.xlu0 %2933 }
  0xc5   : > { %9416 = vst [vmem:[#allocation18_spill] sm:$0xff] %v6830_v26  ;;  %3003 = vperm.xlu0 %6152, %v2102_v24   ;;  %v6839_v30 = vpop.permute.xlu1 %1805 }
  0xc6   : > { %9418 = vst [vmem:[#allocation20_spill] sm:$0xff] %v6839_v30  ;;  %3407 = vperm.xlu1 %6151, %v6526_v16   ;;  %v2910_v16 = vld [vmem:[%s9408_s8 + $0x98] sm:$0xff] }
  0xc8   : > { %v6837_v29 = vpop.permute.xlu0 %2611 }
  0xc9   : > { %9417 = vst [vmem:[#allocation19_spill] sm:$0xff] %v6837_v29  ;;  %1880 = vperm.xlu0 %6152, %v1777_v25   ;;  %v6847_v35 = vpop.permute.xlu1 %2132 }
  0xca   : > { %9420 = vst [vmem:[#allocation22_spill] sm:$0xff] %v6847_v35  ;;  %2676 = vperm.xlu1 %6151, %v1775_v18  }
  0xcc   : > { %v6845_v33 = vpop.permute.xlu0 %2938 }
  0xcd   : > { %9419 = vst [vmem:[#allocation21_spill] sm:$0xff] %v6845_v33  ;;  %3008 = vperm.xlu0 %6152, %v2909_v32   ;;  %v6856_v39 = vpop.permute.xlu1 %1810 }
  0xce   : > { %9422 = vst [vmem:[#allocation24_spill] sm:$0xff] %v6856_v39  ;;  %1428 = vperm.xlu1 %6151, %v6599_v31  }
  0xd0   : > { %v6854_v38 = vpop.permute.xlu0 %2616 }
  0xd1   : > { %9421 = vst [vmem:[#allocation23_spill] sm:$0xff] %v6854_v38  ;;  %1885 = vperm.xlu0 %6152, %v6852_v36   ;;  %v6865_v42 = vpop.permute.xlu1 %2137 }
  0xd2   : > { %9424 = vst [vmem:[#allocation26_spill] sm:$0xff] %v6865_v42  ;;  %2202 = vperm.xlu1 %6151, %v2909_v32  }
  0xd4   : > { %v6863_v41 = vpop.permute.xlu0 %2943 }
  0xd5   : > { %9423 = vst [vmem:[#allocation25_spill] sm:$0xff] %v6863_v41  ;;  %3013 = vperm.xlu0 %6152, %v2910_v16   ;;  %v6869_v58 = vpop.permute.xlu1 %1815 }
  0xd6   : > { %9426 = vst [vmem:[#allocation28_spill] sm:$0xff] %v6869_v58  ;;  %3412 = vperm.xlu1 %6151, %v6556_v22  }
  0xd8   : > { %v6867_v44 = vpop.permute.xlu0 %2621 }
  0xd9   : > { %9425 = vst [vmem:[#allocation27_spill] sm:$0xff] %v6867_v44  ;;  %v6874_v31 = vpop.permute.xlu1 %2142 }
  0xda   : > { %9428 = vst [vmem:[#allocation30_spill] sm:$0xff] %v6874_v31  ;;  %2681 = vperm.xlu1 %6151, %v1776_v8  }
  0xdc   : > { %v6872_v59 = vpop.permute.xlu0 %2948 }
  0xdd   : > { %9427 = vst [vmem:[#allocation29_spill] sm:$0xff] %v6872_v59  ;;  %v6878_v62 = vpop.permute.xlu1 %1820 }
  0xde   : > { %9430 = vst [vmem:[#allocation32_spill] sm:$0xff] %v6878_v62  ;;  %1433 = vperm.xlu1 %6151, %v6629_v37   ;;  %v6902_v37 = vld [vmem:[%s9408_s8 + $0xa0] sm:$0xff] }
  0xe0   : > { %v6876_v61 = vpop.permute.xlu0 %2147 }
  0xe1   : > { %9429 = vst [vmem:[#allocation31_spill] sm:$0xff] %v6876_v61  ;;  %v6883_v1 = vpop.permute.xlu1 %2626 }
  0xe2   : > { %9432 = vst [vmem:[#allocation34_spill] sm:$0xff] %v6883_v1  ;;  %2207 = vperm.xlu1 %6151, %v2910_v16  }
  0xe4   : > { %v6881_v0 = vpop.permute.xlu0 %1825 }
  0xe5   : > { %9431 = vst [vmem:[#allocation33_spill] sm:$0xff] %v6881_v0  ;;  %v6887_v10 = vpop.permute.xlu1 %2953 }
  0xe6   : > { %9434 = vst [vmem:[#allocation36_spill] sm:$0xff] %v6887_v10  ;;  %3417 = vperm.xlu1 %6151, %v6584_v28  }
  0xe8   : > { %v6885_v4 = vpop.permute.xlu0 %2631 }
  0xe9   : > { %9433 = vst [vmem:[#allocation35_spill] sm:$0xff] %v6885_v4  ;;  %v6892_v11 = vpop.permute.xlu1 %2152 }
  0xea   : > { %9436 = vst [vmem:[#allocation38_spill] sm:$0xff] %v6892_v11  ;;  %2686 = vperm.xlu1 %6151, %v1777_v25  }
  0xec   : > { %v6890_v22 = vpop.permute.xlu0 %2958 }
  0xed   : > { %9435 = vst [vmem:[#allocation37_spill] sm:$0xff] %v6890_v22  ;;  %v6896_v18 = vpop.permute.xlu1 %1830 }
  0xee   : > { %9438 = vst [vmem:[#allocation40_spill] sm:$0xff] %v6896_v18  ;;  %1438 = vperm.xlu1 %6151, %v6657_v43  }
  0xf0   : > { %v6894_v14 = vpop.permute.xlu0 %2157 }
  0xf1   : > { %9437 = vst [vmem:[#allocation39_spill] sm:$0xff] %v6894_v14  ;;  %v6906_v24 = vpop.permute.xlu1 %2636 }
  0xf2   : > { %9440 = vst [vmem:[#allocation42_spill] sm:$0xff] %v6906_v24  ;;  %2212 = vperm.xlu1 %6151, %v6902_v37  }
  0xf4   : > { %v6904_v8 = vpop.permute.xlu0 %1835 }
  0xf5   : > { %9439 = vst [vmem:[#allocation41_spill] sm:$0xff] %v6904_v8  ;;  %v6911_v25 = vpop.permute.xlu1 %2963 }
  0xf6   : > { %9442 = vst [vmem:[#allocation44_spill] sm:$0xff] %v6911_v25 }
  0xf8   : > { %v6909_v28 = vpop.permute.xlu0 %2641 }
  0xf9   : > { %9441 = vst [vmem:[#allocation43_spill] sm:$0xff] %v6909_v28  ;;  %v6915_v16 = vpop.permute.xlu1 %2162 }
  0xfa   : > { %9444 = vst [vmem:[#allocation46_spill] sm:$0xff] %v6915_v16 }
  0xfc   : > { %v6913_v32 = vpop.permute.xlu0 %2968 }
  0xfd   : > { %9443 = vst [vmem:[#allocation45_spill] sm:$0xff] %v6913_v32  ;;  %v6919_v7 = vpop.permute.xlu1 %1840 }
  0xfe   : > { %9446 = vst [vmem:[#allocation48_spill] sm:$0xff] %v6919_v7 }
 0x100   : > { %v6917_v43 = vpop.permute.xlu0 %2167 }
 0x101   : > { %9445 = vst [vmem:[#allocation47_spill] sm:$0xff] %v6917_v43  ;;  %v6931_v25 = vpop.permute.xlu1 %2646 }
 0x102   : > { %v6921_v6 = vpop.f32.mrb[0].mxu0  ;;  %v6923_v10 = vpop.f32.mrb[0].mxu1  ;;  %9448 = vst [vmem:[#allocation50_spill] sm:$0xff] %v6931_v25 }
 0x103   : > { %1019 = vrot.lane.b32.xlu0 %v6921_v6, %s9377_s0  ;;  %v5614_v18 = vpop.f32.mrb[1].mxu0  ;;  %1045 = vrot.lane.b32.xlu1 %v6923_v10, %s9377_s0  ;;  %v5653_v16 = vpop.f32.mrb[1].mxu1 }
 0x104   : > { %v6927_v28 = vpop.permute.xlu0 %1845 }
 0x105   : > { %9447 = vst [vmem:[#allocation49_spill] sm:$0xff] %v6927_v28  ;;  %v6941_v32 = vpop.permute.xlu1 %2973 }
 0x106   : > { %v6933_v11 = vpop.f32.mrb[2].mxu0  ;;  %v6935_v7 = vpop.f32.mrb[2].mxu1  ;;  %9450 = vst [vmem:[#allocation52_spill] sm:$0xff] %v6941_v32 }
 0x107   : > { %1021 = vrot.lane.b32.xlu0 %v6933_v11, %s9377_s0  ;;  %v5617_v1 = vpop.f32.mrb[3].mxu0  ;;  %v5656_v18 = vpop.f32.mrb[3].mxu1 }
 0x108   : > { %v6939_v59 = vpop.permute.xlu0 %2651 }
 0x109   : > { %9449 = vst [vmem:[#allocation51_spill] sm:$0xff] %v6939_v59  ;;  %v6953_v0 = vpop.permute.xlu1 %2172 }
 0x10a   : > { %v6943_v28 = vpop.f32.mrb[4].mxu0  ;;  %v6945_v43 = vpop.f32.mrb[4].mxu1  ;;  %9452 = vst [vmem:[#allocation54_spill] sm:$0xff] %v6953_v0 }
 0x10b   : > { %1047 = vrot.lane.b32.xlu0 %v6935_v7, %s9377_s0  ;;  %1023 = vrot.lane.b32.xlu1 %v6943_v28, %s9377_s0  ;;  %v5620_v16 = vpop.f32.mrb[5].mxu0  ;;  %v5659_v1 = vpop.f32.mrb[5].mxu1 }
 0x10c   : > { %v6951_v25 = vpop.permute.xlu0 %2978 }
 0x10d   : > { %9451 = vst [vmem:[#allocation53_spill] sm:$0xff] %v6951_v25  ;;  %v6965_v61 = vpop.permute.xlu1 %1850  ;;  %v1356_v25 = vld [vmem:[#allocation2 + $0x1] sm:$0xff] }
 0x10e   : > { %v6955_v59 = vpop.f32.mrb[6].mxu1  ;;  %v6957_v32 = vpop.f32.mrb[6].mxu0  ;;  %9454 = vst [vmem:[#allocation56_spill] sm:$0xff] %v6965_v61 }
 0x10f   : > { %1051 = vrot.lane.b32.xlu0 %v6955_v59, %s9377_s0  ;;  %1049 = vrot.lane.b32.xlu1 %v6945_v43, %s9377_s0  ;;  %v5623_v24 = vpop.f32.mrb[7].mxu0  ;;  %v5662_v16 = vpop.f32.mrb[7].mxu1 }
 0x110   : > { %v6963_v18 = vpop.permute.xlu0 %2177 }
 0x111   : > { %9453 = vst [vmem:[#allocation55_spill] sm:$0xff] %v6963_v18  ;;  %v6975_v8 = vpop.permute.xlu1 %2656 }
 0x112   : > { %v6967_v22 = vpop.f32.mrb[8].mxu0  ;;  %v6969_v1 = vpop.f32.mrb[8].mxu1  ;;  %9455 = vst [vmem:[#allocation57_spill] sm:$0xff] %v6975_v8 }
 0x113   : > { %1025 = vrot.lane.b32.xlu1 %v6957_v32, %s9377_s0  ;;  %1027 = vrot.lane.b32.xlu0 %v6967_v22, %s9377_s0  ;;  %v5665_v44 = vpop.f32.mrb[9].mxu1  ;;  %v5626_v24 = vpop.f32.mrb[9].mxu0 }
 0x114   : > { %v1409_v0 = vpop.permute.xlu0 %1408 }
 0x115   : > { %v1531_v18 = vmul.f32 %v1409_v0, %v1356_v25  ;;  %v6988_v44 = vpop.permute.xlu1 %1855 }
 0x116   : > { %v6978_v16 = vpop.f32.mrb[10].mxu1  ;;  %v6980_v61 = vpop.f32.mrb[10].mxu0  ;;  %9457 = vst [vmem:[#allocation59_spill] sm:$0xff] %v6988_v44 }
 0x117   : > { %1556 = vst.msk [vmem:[#allocation3] sm:$0xff] %vm728_vm0, %v1531_v18  ;;  %1053 = vrot.lane.b32.xlu1 %v6969_v1, %s9377_s0  ;;  %1055 = vrot.lane.b32.xlu0 %v6978_v16, %s9377_s0  ;;  %v5629_v62 = vpop.f32.mrb[11].mxu0  ;;  %v5668_v8 = vpop.f32.mrb[11].mxu1 }
 0x118   : > { %v6986_v14 = vpop.permute.xlu0 %2983 }
 0x119   : > { %9456 = vst [vmem:[#allocation58_spill] sm:$0xff] %v6986_v14  ;;  %v7000_v4 = vpop.permute.xlu1 %2661 }
 0x11a   : > { %v6990_v0 = vpop.f32.mrb[12].mxu0  ;;  %v6992_v25 = vpop.f32.mrb[12].mxu1  ;;  %9459 = vst [vmem:[#allocation61_spill] sm:$0xff] %v7000_v4 }
 0x11b   : > { %1029 = vrot.lane.b32.xlu1 %v6980_v61, %s9377_s0  ;;  %1031 = vrot.lane.b32.xlu0 %v6990_v0, %s9377_s0  ;;  %v5632_v24 = vpop.f32.mrb[13].mxu0  ;;  %v5671_v14 = vpop.f32.mrb[13].mxu1 }
 0x11c   : > { %v6998_v18 = vpop.permute.xlu0 %2182 }
 0x11d   : > { %9458 = vst [vmem:[#allocation60_spill] sm:$0xff] %v6998_v18  ;;  %v7010_v33 = vpop.permute.xlu1 %1860 }
 0x11e   : > { %v7002_v62 = vpop.f32.mrb[14].mxu0  ;;  %v7004_v44 = vpop.f32.mrb[14].mxu1  ;;  %9460 = vst [vmem:[#allocation62_spill] sm:$0xff] %v7010_v33 }
 0x11f   : > { %1057 = vrot.lane.b32.xlu1 %v6992_v25, %s9377_s0  ;;  %v5635_v31 = vpop.f32.mrb[15].mxu0  ;;  %v5674_v41 = vpop.f32.mrb[15].mxu1 }
 0x120   : > { %v7008_v8 = vpop.permute.xlu0 %1413 }
 0x121   : > { %v7022_v4 = vpop.permute.xlu1 %3397 }
 0x122   : > { %v7012_v29 = vpop.f32.mrb[16].mxu0  ;;  %v7014_v18 = vpop.f32.mrb[16].mxu1 }
 0x123   : > { %1033 = vrot.lane.b32.xlu1 %v7002_v62, %s9377_s0  ;;  %1035 = vrot.lane.b32.xlu0 %v7012_v29, %s9377_s0  ;;  %v5638_v24 = vpop.f32.mrb[17].mxu0  ;;  %v5677_v26 = vpop.f32.mrb[17].mxu1 }
 0x124   : > { %v7020_v14 = vpop.permute.xlu0 %2988 }
 0x125   : > { %9461 = vst [vmem:[#allocation63_spill] sm:$0xff] %v7020_v14  ;;  %v7032_v39 = vpop.permute.xlu1 %1418 }
 0x126   : > { %v7024_v31 = vpop.f32.mrb[18].mxu0  ;;  %v7026_v33 = vpop.f32.mrb[18].mxu1 }
 0x127   : > { %1059 = vrot.lane.b32.xlu1 %v7004_v44, %s9377_s0  ;;  %v5641_v38 = vpop.f32.mrb[19].mxu0  ;;  %v5680_v21 = vpop.f32.mrb[19].mxu1 }
 0x128   : > { %v7030_v41 = vpop.permute.xlu0 %2187  ;;  %v1779_v38 = vld [vmem:[%s9348_s9 + $0xa8] sm:$0xff] }
 0x129   : > { %9462 = vst [vmem:[#allocation64_spill] sm:$0xff] %v7030_v41  ;;  %v7044_v19 = vpop.permute.xlu1 %2993 }
 0x12a   : > { %v7034_v58 = vpop.f32.mrb[20].mxu0  ;;  %v7036_v14 = vpop.f32.mrb[20].mxu1  ;;  %9464 = vst [vmem:[#allocation66_spill] sm:$0xff] %v7044_v19 }
 0x12b   : > { %1061 = vrot.lane.b32.xlu1 %v7014_v18, %s9377_s0  ;;  %1039 = vrot.lane.b32.xlu0 %v7034_v58, %s9377_s0  ;;  %v5644_v24 = vpop.f32.mrb[21].mxu0  ;;  %v5683_v21 = vpop.f32.mrb[21].mxu1 }
 0x12c   : > { %v7042_v26 = vpop.permute.xlu0 %2666 }
 0x12d   : > { %9463 = vst [vmem:[#allocation65_spill] sm:$0xff] %v7042_v26  ;;  %v7057_v26 = vpop.permute.xlu1 %2192 }
 0x12e   : > { %v7049_v41 = vpop.f32.mrb[22].mxu0  ;;  %v7051_v42 = vpop.f32.mrb[22].mxu1  ;;  %9466 = vst [vmem:[#allocation68_spill] sm:$0xff] %v7057_v26 }
 0x12f   : > { %1037 = vrot.lane.b32.xlu1 %v7024_v31, %s9377_s0  ;;  %1890 = vperm.xlu0 %6152, %v1779_v38   ;;  %v5647_v15 = vpop.f32.mrb[23].mxu0  ;;  %v5686_v24 = vpop.f32.mrb[23].mxu1 }
 0x130   : > { %v7055_v30 = vpop.permute.xlu0 %1865  ;;  %v1780_v15 = vld [vmem:[%s9348_s9 + $0xb0] sm:$0xff] }
 0x131   : > { %9465 = vst [vmem:[#allocation67_spill] sm:$0xff] %v7055_v30  ;;  %v7064_v12 = vpop.permute.xlu1 %3402 }
 0x132   : > { %v7059_v19 = vpop.f32.mrb[24].mxu0 }
 0x133   : > { %1063 = vrot.lane.b32.xlu1 %v7026_v33, %s9377_s0  ;;  %3018 = vperm.xlu0 %6152, %v6902_v37   ;;  %v5650_v35 = vpop.f32.mrb[25].mxu0 }
 0x134   : > { %v1632_v21 = vpop.permute.xlu0 %1631  ;;  %v2912_v35 = vld [vmem:[%s9408_s8 + $0xa8] sm:$0xff] }
 0x135   : > { %1707 = vst.msk [vmem:[#allocation3] sm:$0xff] %vm1706_vm2, %v1632_v21  ;;  %v7072_v26 = vpop.permute.xlu1 %2671  ;;  %v2107_v21 = vld [vmem:[%s9408_s8 + $0xb0] sm:$0xff] }
 0x136   : > { %9467 = vst [vmem:[#allocation69_spill] sm:$0xff] %v7072_v26 }
 0x137   : > { %1065 = vrot.lane.b32.xlu1 %v7036_v14, %s9377_s0  ;;  %1895 = vperm.xlu0 %6152, %v1780_v15  }
 0x138   : > { %v1959_v24 = vpop.permute.xlu0 %1958 }
 0x139   : > { %2034 = vst.msk [vmem:[#allocation3] sm:$0xff] %vm2033_vm3, %v1959_v24  ;;  %v7080_v37 = vpop.permute.xlu1 %1870 }
 0x13a   : > { %9468 = vst [vmem:[#allocation70_spill] sm:$0xff] %v7080_v37 }
 0x13b   : > { %3023 = vperm.xlu0 %6152, %v2912_v35   ;;  %1041 = vrot.lane.b32.xlu1 %v7049_v41, %s9377_s0 }
 0x13c   : > { %v7100_v23 = vpop.permute.xlu0 %1423 }
 0x13d   : > { %v7087_v26 = vpop.permute.xlu1 %2998 }
 0x13e   : > { %9469 = vst [vmem:[#allocation71_spill] sm:$0xff] %v7087_v26 }
 0x13f   : > { %2222 = vperm.xlu0 %6152, %v2107_v21   ;;  %1067 = vrot.lane.b32.xlu1 %v7051_v42, %s9377_s0 }
 0x141   : > { %v7091_v24 = vpop.permute.xlu1 %2197 }
 0x142   : > { %9470 = vst [vmem:[#allocation72_spill] sm:$0xff] %v7091_v24 }
 0x143   : > { %3432 = vperm.xlu0 %6152, %v6676_v46   ;;  %3422 = vperm.xlu1 %6151, %v6614_v34   ;;  %v7106_v46 = vpop.permute.xlu0 %1875 }
 0x144   : > { %9472 = vst [vmem:[#allocation74_spill] sm:$0xff] %v7106_v46 }
 0x145   : > { %v7094_v37 = vpop.permute.xlu1 %3407 }
 0x147   : > { %2701 = vperm.xlu0 %6152, %v1780_v15   ;;  %2691 = vperm.xlu1 %6151, %v6852_v36  }
 0x149   : > { %v7098_v30 = vpop.permute.xlu1 %2676 }
 0x14a   : > { %9471 = vst [vmem:[#allocation73_spill] sm:$0xff] %v7098_v30 }
 0x14b   : > { %1453 = vperm.xlu0 %6152, %v6702_v49   ;;  %1443 = vperm.xlu1 %6151, %v6671_v45   ;;  %v7113_v45 = vpop.permute.xlu0 %3003 }
 0x14c   : > { %9474 = vst [vmem:[#allocation76_spill] sm:$0xff] %v7113_v45 }
 0x14d   : > { %v7104_v34 = vpop.permute.xlu1 %1428 }
 0x14f   : > { %2217 = vperm.xlu1 %6151, %v2912_v35   ;;  %1043 = vrot.lane.b32.xlu0 %v7059_v19, %s9377_s0  ;;  %v1781_v35 = vld [vmem:[%s9348_s9 + $0xb8] sm:$0xff]  ;;  %v7121_v30 = vpop.permute.xlu0 %1880  ;;  %s9501_s0 = smov 32  }
 0x150   : > { %9476 = vst [vmem:[#allocation78_spill] sm:$0xff] %v7121_v30 }
 0x151   : > { %v7109_v36 = vpop.permute.xlu1 %2202 }
 0x152   : > { %9473 = vst [vmem:[#allocation75_spill] sm:$0xff] %v7109_v36 }
 0x153   : > { %3427 = vperm.xlu1 %6151, %v6644_v40   ;;  %v7130_v36 = vpop.permute.xlu0 %3008 }
 0x154   : > { %9478 = vst [vmem:[#allocation80_spill] sm:$0xff] %v7130_v36 }
 0x155   : > { %v7111_v49 = vpop.permute.xlu1 %3412 }
 0x157   : > { %2696 = vperm.xlu1 %6151, %v1779_v38   ;;  %v2108_v38 = vld [vmem:[%s9408_s8 + $0xb8] sm:$0xff] }
 0x159   : > { %v7116_v15 = vpop.permute.xlu1 %2681 }
 0x15a   : > { %9475 = vst [vmem:[#allocation77_spill] sm:$0xff] %v7116_v15  ;;  %v7134_v15 = vpop.permute.xlu0 %1885 }
 0x15b   : > { %1448 = vperm.xlu1 %6151, %v6695_v48   ;;  %9479 = vst [vmem:[#allocation81_spill] sm:$0xff] %v7134_v15  ;;  %v1782_v15 = vld [vmem:[%s9348_s9 + $0xc0] sm:$0xf] }
 0x15d   : > { %v7123_v46 = vpop.permute.xlu1 %1433 }
 0x15f   : > { %1900 = vperm.xlu1 %6151, %v1781_v35  }
 0x161   : > { %v7125_v40 = vpop.permute.xlu1 %2207 }
 0x162   : > { %9477 = vst [vmem:[#allocation79_spill] sm:$0xff] %v7125_v40 }
 0x163   : > { %3028 = vperm.xlu1 %6151, %v2107_v21   ;;  %v7141_v21 = vpop.permute.xlu0 %3013 }
 0x164   : > { %9481 = vst [vmem:[#allocation83_spill] sm:$0xff] %v7141_v21 }
 0x165   : > { %v7132_v48 = vpop.permute.xlu1 %3417 }
 0x167   : > { %2227 = vperm.xlu1 %6151, %v2108_v38  }
 0x169   : > { %v7137_v30 = vpop.permute.xlu1 %2686 }
 0x16a   : > { %9480 = vst [vmem:[#allocation82_spill] sm:$0xff] %v7137_v30 }
 0x16b   : > { %3437 = vperm.xlu1 %6151, %v6686_v47  }
 0x16d   : > { %v7139_v45 = vpop.permute.xlu1 %1438 }
 0x16f   : > { %2706 = vperm.xlu1 %6151, %v1781_v35  }
 0x171   : > { %v7144_v40 = vpop.permute.xlu1 %2212 }
 0x172   : > { %9482 = vst [vmem:[#allocation84_spill] sm:$0xff] %v7144_v40 }
 0x173   : > { %1458 = vperm.xlu1 %6151, %v6723_v52  }
 0x175   : > { %v1020_v24 = vpop.permute.xlu0 %1019  ;;  %v1046_v36 = vpop.permute.xlu1 %1045 }
 0x176   : > { %v7150_v47 = vmax.f32 %v6923_v10, %v1046_v36  ;;  %v2109_v10 = vld [vmem:[%s9408_s8 + $0xc0] sm:$0xf] }
 0x177   : > { %3033 = vperm.xlu1 %6151, %v2108_v38  }
 0x178   : > { %1170 = vrot.lane.b32.xlu0 %v7150_v47, %s9375_s26 }
 0x179   : > { %v1022_v30 = vpop.permute.xlu0 %1021 }
 0x17a   : > { %v7155_v52 = vmax.f32 %v6933_v11, %v1022_v30  ;;  %v7169_v30 = vmax.f32 %v6921_v6, %v1020_v24  ;;  %v9483_v6 = vmov 0.0  }
 0x17b   : > { %1905 = vperm.xlu1 %6151, %v1782_v15   ;;  %1330 = vst.msk [vmem:[#allocation2 + $0xe0] sm:$0xf] %vm1329_vm4, %v9483_v6 }
 0x17c   : > { %1146 = vrot.lane.b32.xlu0 %v7155_v52, %s9375_s26 }
 0x17d   : > { %v1048_v35 = vpop.permute.xlu0 %1047  ;;  %v1024_v40 = vpop.permute.xlu1 %1023 }
 0x17e   : > { %v7164_v36 = vmax.f32 %v6943_v28, %v1024_v40  ;;  %v7179_v28 = vmax.f32 %v6935_v7, %v1048_v35  ;;  %v2915_v35 = vld [vmem:[%s9408_s8 + $0xc0] sm:$0xf] }
 0x17f   : > { %3442 = vperm.xlu1 %6151, %v6707_v50  }
 0x180   : > { %1148 = vrot.lane.b32.xlu0 %v7164_v36, %s9375_s26 }
 0x181   : > { %v1052_v15 = vpop.permute.xlu0 %1051  ;;  %v1050_v38 = vpop.permute.xlu1 %1049 }
 0x182   : > { %v7172_v50 = vmax.f32 %v6945_v43, %v1050_v38 }
 0x183   : > { %2232 = vperm.xlu1 %6151, %v2109_v10  }
 0x184   : > { %1174 = vrot.lane.b32.xlu0 %v7172_v50, %s9375_s26 }
 0x185   : > { %v1026_v11 = vpop.permute.xlu1 %1025  ;;  %v1028_v21 = vpop.permute.xlu0 %1027 }
 0x186   : > { %v7182_v40 = vmax.f32 %v6967_v22, %v1028_v21  ;;  %v7191_v43 = vmax.f32 %v6957_v32, %v1026_v11  ;;  %v7201_v22 = vmax.f32 %v6955_v59, %v1052_v15 }
 0x187   : > { %1144 = vrot.lane.b32.xlu1 %v7169_v30, %s9375_s26 }
 0x188   : > { %1152 = vrot.lane.b32.xlu0 %v7182_v40, %s9375_s26 }
 0x189   : > { %v1054_v10 = vpop.permute.xlu1 %1053  ;;  %v1056_v32 = vpop.permute.xlu0 %1055 }
 0x18a   : > { %v7215_v59 = vmax.f32 %v6978_v16, %v1056_v32 }
 0x18b   : > { %1172 = vrot.lane.b32.xlu1 %v7179_v28, %s9375_s26 }
 0x18d   : > { %v1030_v24 = vpop.permute.xlu1 %1029  ;;  %v1032_v11 = vpop.permute.xlu0 %1031 }
 0x18e   : > { %v7194_v7 = vmax.f32 %v6980_v61, %v1030_v24  ;;  %v7209_v61 = vmax.f32 %v6969_v1, %v1054_v10  ;;  %v7221_v1 = vmax.f32 %v6990_v0, %v1032_v11 }
 0x18f   : > { %1150 = vrot.lane.b32.xlu1 %v7191_v43, %s9375_s26 }
 0x190   : > { %1154 = vrot.lane.b32.xlu0 %v7194_v7, %s9375_s26 }
 0x191   : > { %v1058_v21 = vpop.permute.xlu1 %1057 }
 0x192   : > { %v7230_v16 = vmax.f32 %v6992_v25, %v1058_v21 }
 0x193   : > { %1176 = vrot.lane.b32.xlu1 %v7201_v22, %s9375_s26 }
 0x194   : > { %3038 = vperm.xlu0 %6152, %v2915_v35  }
 0x195   : > { %v1034_v38 = vpop.permute.xlu1 %1033  ;;  %v1036_v0 = vpop.permute.xlu0 %1035 }
 0x196   : > { %v7250_v21 = vmax.f32 %v7012_v29, %v1036_v0 }
 0x197   : > { %1178 = vrot.lane.b32.xlu1 %v7209_v61, %s9375_s26 }
 0x198   : > { %1468 = vperm.xlu0 %6152, %v6751_v56   ;;  %v2588_v56 = vld [vmem:[%s9348_s9 + $0xc0] sm:$0xf] }
 0x199   : > { %v1060_v15 = vpop.permute.xlu1 %1059 }
 0x19a   : > { %v7241_v24 = vmax.f32 %v7004_v44, %v1060_v15 }
 0x19b   : > { %1180 = vrot.lane.b32.xlu1 %v7215_v59, %s9375_s26 }
 0x19c   : > { %3452 = vperm.xlu0 %6152, %v6735_v54   ;;  %v7235_v54 = vmax.f32 %v7002_v62, %v1034_v38 }
 0x19d   : > { %v1062_v10 = vpop.permute.xlu1 %1061  ;;  %v1040_v35 = vpop.permute.xlu0 %1039 }
 0x19e   : > { %v7247_v62 = vmax.f32 %v7034_v58, %v1040_v35 }
 0x19f   : > { %1463 = vperm.xlu1 %6151, %v6730_v53  }
 0x1a0   : > { %1156 = vrot.lane.b32.xlu0 %v7221_v1, %s9375_s26 }
 0x1a1   : > { %v1038_v53 = vpop.permute.xlu1 %1037 }
 0x1a2   : > { %v7267_v29 = vmax.f32 %v7024_v31, %v1038_v53 }
 0x1a3   : > { %2711 = vperm.xlu1 %6151, %v2588_v56  }
 0x1a4   : > { %1182 = vrot.lane.b32.xlu0 %v7230_v16, %s9375_s26 }
 0x1a5   : > { %v1064_v25 = vpop.permute.xlu1 %1063 }
 0x1a7   : > { %3447 = vperm.xlu1 %6151, %v6714_v51  }
 0x1a8   : > { %1158 = vrot.lane.b32.xlu0 %v7235_v54, %s9375_s26 }
 0x1a9   : > { %v1066_v44 = vpop.permute.xlu1 %1065 }
 0x1aa   : > { %v7284_v31 = vmax.f32 %v7036_v14, %v1066_v44 }
 0x1ab   : > { %1473 = vperm.xlu1 %6151, %v6758_v57   ;;  %v7259_v57 = vmax.f32 %v7014_v18, %v1062_v10  ;;  %v7274_v18 = vmax.f32 %v7026_v33, %v1064_v25 }
 0x1ac   : > { %1184 = vrot.lane.b32.xlu0 %v7241_v24, %s9375_s26 }
 0x1ad   : > { %v1042_v38 = vpop.permute.xlu1 %1041 }
 0x1ae   : > { %v7252_v51 = vpop.permute.xlu0 %1890  ;;  %v7293_v33 = vmax.f32 %v7049_v41, %v1042_v38 }
 0x1af   : > { %9484 = vst [vmem:[#allocation85_spill] sm:$0xff] %v7252_v51  ;;  %1164 = vrot.lane.b32.xlu1 %v7247_v62, %s9375_s26 }
 0x1b0   : > { %1160 = vrot.lane.b32.xlu0 %v7250_v21, %s9375_s26 }
 0x1b2   : > { %v7261_v32 = vpop.permute.xlu0 %3018 }
 0x1b3   : > { %9485 = vst [vmem:[#allocation86_spill] sm:$0xff] %v7261_v32  ;;  %3457 = vperm.xlu1 %6151, %v6742_v55   ;;  %v1068_v55 = vpop.permute.xlu1 %1067 }
 0x1b4   : > { %1186 = vrot.lane.b32.xlu0 %v7259_v57, %s9375_s26 }
 0x1b6   : > { %v7269_v58 = vpop.permute.xlu0 %1895 }
 0x1b7   : > { %9486 = vst [vmem:[#allocation87_spill] sm:$0xff] %v7269_v58 }
 0x1b8   : > { %1162 = vrot.lane.b32.xlu0 %v7267_v29, %s9375_s26 }
 0x1ba   : > { %v7276_v15 = vpop.permute.xlu0 %3023 }
 0x1bb   : > { %9487 = vst [vmem:[#allocation88_spill] sm:$0xff] %v7276_v15 }
 0x1bc   : > { %1188 = vrot.lane.b32.xlu0 %v7274_v18, %s9375_s26 }
 0x1be   : > { %v7280_v11 = vpop.permute.xlu0 %2222 }
 0x1bf   : > { %9488 = vst [vmem:[#allocation89_spill] sm:$0xff] %v7280_v11 }
 0x1c0   : > { %1478 = vperm.xlu0 %6152, %v6772_v60   ;;  %v7302_v60 = vmax.f32 %v7051_v42, %v1068_v55 }
 0x1c2   : > { %v7286_v10 = vpop.permute.xlu0 %3432  ;;  %v7288_v56 = vpop.permute.xlu1 %3422  ;;  %9491 = vst [vmem:[#allocation92_spill] sm:$0xff] %v7302_v60 }
 0x1c4   : > { %1190 = vrot.lane.b32.xlu0 %v7284_v31, %s9375_s26 }
 0x1c6   : > { %v7295_v0 = vpop.permute.xlu0 %2701  ;;  %v7297_v53 = vpop.permute.xlu1 %2691 }
 0x1c7   : > { %9489 = vst [vmem:[#allocation90_spill] sm:$0xff] %v7295_v0  ;;  %9490 = vst [vmem:[#allocation91_spill] sm:$0xff] %v7297_v53 }
 0x1c8   : > { %1166 = vrot.lane.b32.xlu0 %v7293_v33, %s9375_s26 }
 0x1ca   : > { %v7304_v14 = vpop.permute.xlu0 %1453  ;;  %v7306_v35 = vpop.permute.xlu1 %1443 }
 0x1cc   : > { %1192 = vrot.lane.b32.xlu0 %v7302_v60, %s9375_s26 }
 0x1ce   : > { %v7310_v25 = vpop.permute.xlu1 %2217  ;;  %v1044_v41 = vpop.permute.xlu0 %1043 }
 0x1cf   : > { %9492 = vst [vmem:[#allocation93_spill] sm:$0xff] %v7310_v25  ;;  %v7313_v44 = vmax.f32 %v7059_v19, %v1044_v41  ;;  %v7334_v19 = vld [vmem:[%s9498_s27] ss:$0 sm:$0xff] }
 0x1d1   : > { %1168 = vrot.lane.b32.xlu1 %v7313_v44, %s9375_s26  ;;  %s9379_s26 = smov 64  }
 0x1d2   : > { %v7317_v38 = vpop.permute.xlu1 %3427 }
 0x1d6   : > { %v7319_v42 = vpop.permute.xlu1 %2696 }
 0x1d7   : > { %9493 = vst [vmem:[#allocation94_spill] sm:$0xff] %v7319_v42 }
 0x1da   : > { %v7321_v55 = vpop.permute.xlu1 %1448 }
 0x1de   : > { %v7323_v6 = vpop.permute.xlu1 %1900 }
 0x1df   : > { %9494 = vst [vmem:[#allocation95_spill] sm:$0xff] %v7323_v6 }
 0x1e2   : > { %v7325_v15 = vpop.permute.xlu1 %3028 }
 0x1e3   : > { %9495 = vst [vmem:[#allocation96_spill] sm:$0xff] %v7325_v15 }
 0x1e6   : > { %v7327_v51 = vpop.permute.xlu1 %2227 }
 0x1e7   : > { %9496 = vst [vmem:[#allocation97_spill] sm:$0xff] %v7327_v51 }
 0x1ea   : > { %v7329_v25 = vpop.permute.xlu1 %3437  ;;  %v1171_v41 = vpop.permute.xlu0 %1170 }
 0x1eb   : > { %9497 = vst [vmem:[#allocation98_spill] sm:$0xff] %v7329_v25  ;;  %v1232_v53 = vmax.f32 %v7150_v47, %v1171_v41 }
 0x1ed   : > { %v1264_v11 = vadd.f32 %v7334_v19, %v1232_v53 }
 0x1ee   : > { %v7337_v0 = vpop.permute.xlu1 %2706  ;;  %v1147_v58 = vpop.permute.xlu0 %1146 }
 0x1ef   : > { %v1289_v6 = vmax.f32 %v1264_v11, 0.0  ;;  %v1220_v15 = vmax.f32 %v7155_v52, %v1147_v58 }
 0x1f1   : > { %1344 = vst.msk [vmem:[#allocation2 + $0x78] sm:$0xff] %vm728_vm0, %v1289_v6  ;;  %v1252_v51 = vadd.f32 %v7334_v19, %v1220_v15 }
 0x1f2   : > { %v7341_v42 = vpop.permute.xlu1 %1458  ;;  %v1149_v32 = vpop.permute.xlu0 %1148 }
 0x1f3   : > { %v1277_v26 = vmax.f32 %v1252_v51, 0.0  ;;  %v1221_v60 = vmax.f32 %v7164_v36, %v1149_v32 }
 0x1f5   : > { %1332 = vst.msk [vmem:[#allocation2 + $0x18] sm:$0xff] %vm728_vm0, %v1277_v26  ;;  %v1253_v47 = vadd.f32 %v7334_v19, %v1221_v60 }
 0x1f6   : > { %v7346_v25 = vpop.permute.xlu1 %3033  ;;  %v1175_v53 = vpop.permute.xlu0 %1174 }
 0x1f7   : > { %v1278_v11 = vmax.f32 %v1253_v47, 0.0  ;;  %v1234_v52 = vmax.f32 %v7172_v50, %v1175_v53 }
 0x1f9   : > { %1333 = vst.msk [vmem:[#allocation2 + $0x20] sm:$0xff] %vm728_vm0, %v1278_v11  ;;  %v1266_v6 = vadd.f32 %v7334_v19, %v1234_v52 }
 0x1fa   : > { %v7351_v58 = vpop.permute.xlu1 %1905  ;;  %v1153_v15 = vpop.permute.xlu0 %1152 }
 0x1fb   : > { %v1291_v51 = vmax.f32 %v1266_v6, 0.0  ;;  %v1223_v36 = vmax.f32 %v7182_v40, %v1153_v15 }
 0x1fd   : > { %1346 = vst.msk [vmem:[#allocation2 + $0x88] sm:$0xff] %vm728_vm0, %v1291_v51  ;;  %v1255_v26 = vadd.f32 %v7334_v19, %v1223_v36 }
 0x1fe   : > { %v7356_v32 = vpop.permute.xlu1 %3442 }
 0x1ff   : > { %v1280_v60 = vmax.f32 %v1255_v26, 0.0 }
 0x200   : > { %v7363_v53 = vld [vmem:[#allocation2 + $0x1f] sm:$0xff] }
 0x201   : > { %1335 = vst.msk [vmem:[#allocation2 + $0x30] sm:$0xff] %vm728_vm0, %v1280_v60  ;;  %v3520_v11 = vmul.f32 %v7022_v4, %v7363_v53  ;;  %v7368_v40 = vld [vmem:[#allocation2 + $0x19] sm:$0xff] }
 0x202   : > { %v7360_v41 = vpop.permute.xlu1 %2232  ;;  %v1155_v50 = vpop.permute.xlu0 %1154  ;;  %v1534_v6 = vmul.f32 %v7368_v40, %v7100_v23  ;;  %v3620_v4 = vld [vmem:[%s9499_s23] sm:$0xff]  ;;  %v3621_v23 = vld [vmem:[%s9499_s23 + $0x8] sm:$0xff] }
 0x203   : > { %v1224_v47 = vmax.f32 %v7194_v7, %v1155_v50  ;;  %3545 = vst.msk [vmem:[#allocation3 + $0x8] sm:$0xff] %vm728_vm0, %v3520_v11  ;;  %v5760_v60 = vpack.c.bf16 %v3621_v23, %v3620_v4 }
 0x204   : > { %1559 = vst.msk [vmem:[#allocation3 + $0x30] sm:$0xff] %vm728_vm0, %v1534_v6  ;;  %v3622_v6 = vld [vmem:[%s9499_s23 + $0x10] sm:$0xff] }
 0x205   : > { %v1256_v52 = vadd.f32 %v7334_v19, %v1224_v47  ;;  %5761 = vmatpush1.bf16.msra.mxu1 %v5760_v60 }
 0x206   : > { %v1145_v15 = vpop.permute.xlu1 %1144 }
 0x207   : > { %v1281_v51 = vmax.f32 %v1256_v52, 0.0  ;;  %v1219_v7 = vmax.f32 %v7169_v30, %v1145_v15  ;;  %v9500_v52 = vmov 0.0|0.0   ;;  %v3623_v15 = vld [vmem:[%s9499_s23 + $0x18] sm:$0xff] }
 0x208   : > { %5762 = vmatprep.subr.bf16.mxu1 %v9500_v52 }
 0x209   : > { %1336 = vst.msk [vmem:[#allocation2 + $0x38] sm:$0xff] %vm728_vm0, %v1281_v51  ;;  %v1251_v36 = vadd.f32 %v7334_v19, %v1219_v7 }
 0x20a   : > { %v1173_v26 = vpop.permute.xlu1 %1172  ;;  %v3571_v11 = vld [vmem:[#allocation3 + $0x8] sm:$0xff] }
 0x20b   : > { %v1276_v50 = vmax.f32 %v1251_v36, 0.0  ;;  %v1233_v47 = vmax.f32 %v7179_v28, %v1173_v26  ;;  %5494 = vmatprep.mubr.msk.f32.mxu1 %vm728_vm0, %v3571_v11  ;;  %v5763_v28 = vpack.c.bf16 %v3623_v15, %v3622_v6 }
 0x20d   : > { %1331 = vst.msk [vmem:[#allocation2 + $0x10] sm:$0xff] %vm728_vm0, %v1276_v50  ;;  %v1265_v30 = vadd.f32 %v7334_v19, %v1233_v47  ;;  %5764 = vmatpush1.bf16.msra.mxu1 %v5763_v28  ;;  %v3624_v47 = vld [vmem:[%s9499_s23 + $0x20] sm:$0xff] }
 0x20e   : > { %v1151_v51 = vpop.permute.xlu1 %1150  ;;  %5765 = vmatprep.subr.bf16.mxu1 %v9500_v52 }
 0x20f   : > { %v1290_v7 = vmax.f32 %v1265_v30, 0.0  ;;  %v1222_v36 = vmax.f32 %v7191_v43, %v1151_v51  ;;  %v3625_v43 = vld [vmem:[%s9499_s23 + $0x28] sm:$0xff] }
 0x210   : > { %v7396_v4 = vld [vmem:[#allocation2 + $0x37] sm:$0xff]  ;;  %v5766_v15 = vpack.c.bf16 %v3625_v43, %v3624_v47 }
 0x211   : > { %1345 = vst.msk [vmem:[#allocation2 + $0x80] sm:$0xff] %vm728_vm0, %v1290_v7  ;;  %v1254_v23 = vadd.f32 %v7334_v19, %v1222_v36  ;;  %v3523_v26 = vmul.f32 %v7111_v49, %v7396_v4  ;;  %v7403_v50 = vld [vmem:[#allocation2 + $0x31] sm:$0xff] }
 0x212   : > { %v1177_v60 = vpop.permute.xlu1 %1176  ;;  %v1537_v7 = vmul.f32 %v7403_v50, %v7139_v45  ;;  %5767 = vmatpush1.bf16.msra.mxu1 %v5766_v15 }
 0x213   : > { %v1279_v30 = vmax.f32 %v1254_v23, 0.0  ;;  %v1235_v11 = vmax.f32 %v7201_v22, %v1177_v60  ;;  %v7412_v6 = vpop.permute.xlu0 %3038  ;;  %3548 = vst.msk [vmem:[#allocation3 + $0x38] sm:$0xff] %vm728_vm0, %v3523_v26  ;;  %5768 = vmatprep.subr.bf16.mxu1 %v9500_v52 }
 0x214   : > { %v2387_v49 = vld [vmem:[#allocation2 + $0x10] sm:$0xff]  ;;  %1562 = vst.msk [vmem:[#allocation3 + $0x60] sm:$0xff] %vm728_vm0, %v1537_v7 }
 0x215   : > { %v1582_v51 = vld [vmem:[#allocation2 + $0xa] sm:$0xff]  ;;  %1334 = vst.msk [vmem:[#allocation2 + $0x28] sm:$0xff] %vm728_vm0, %v1279_v30  ;;  %v1267_v36 = vadd.f32 %v7334_v19, %v1235_v11  ;;  %2437 = vrot.lane.b32.xlu0 %v2387_v49, %s9379_s26  ;;  %v3627_v11 = vld [vmem:[%s9499_s23 + $0x38] sm:$0xff]  ;;  %s9381_s26 = smov 48  }
 0x216   : > { %v2060_v28 = vld [vmem:[#allocation2 + $0xf] sm:$0xff]  ;;  %1633 = vrot.lane.b32.xlu1 %v1582_v51, %s9383_s2  ;;  %v1179_v22 = vpop.permute.xlu1 %1178  ;;  %v2061_v51 = vld [vmem:[#allocation2 + $0x17] sm:$0xff] }
 0x217   : > { %v7421_v23 = vld [vmem:[#allocation2 + $0x11] sm:$0xff]  ;;  %v1357_v60 = vld [vmem:[#allocation2 + $0x9] sm:$0xff]  ;;  %v1292_v26 = vmax.f32 %v1267_v36, 0.0  ;;  %v1236_v47 = vmax.f32 %v7209_v61, %v1179_v22  ;;  %v7425_v45 = vpop.permute.xlu0 %1468  ;;  %v2235_v43 = vmul.f32 %v6784_v63, %v2060_v28  ;;  %v3628_v28 = vld [vmem:[%s9499_s23 + $0x40] sm:$0xff] }
 0x218   : > { %v3626_v30 = vld [vmem:[%s9499_s23 + $0x30] sm:$0xff]  ;;  %v1532_v7 = vmul.f32 %v7008_v8, %v1357_v60  ;;  %v1533_v61 = vmul.f32 %v7421_v23, %v7032_v39  ;;  %v3629_v8 = vld [vmem:[%s9499_s23 + $0x48] sm:$0xff] }
 0x219   : > { %v1583_v15 = vld [vmem:[#allocation2 + $0x12] sm:$0xff]  ;;  %v5769_v36 = vpack.c.bf16 %v3627_v11, %v3626_v30  ;;  %1347 = vst.msk [vmem:[#allocation2 + $0x90] sm:$0xff] %vm728_vm0, %v1292_v26  ;;  %v1268_v63 = vadd.f32 %v7334_v19, %v1236_v47  ;;  %2285 = vrot.lane.b32.xlu0 %v2235_v43, %s9381_s26  ;;  %v5772_v39 = vpack.c.bf16 %v3629_v8, %v3628_v28  ;;  %v3193_v28 = vld [vmem:[#allocation2 + $0x1e] sm:$0xff] }
 0x21a   : > { %v1734_v49 = vld [vmem:[#allocation2 + $0xb] sm:$0xff]  ;;  %1635 = vrot.lane.b32.xlu1 %v1583_v15, %s9383_s2  ;;  %v1181_v22 = vpop.permute.xlu1 %1180  ;;  %1557 = vst.msk [vmem:[#allocation3 + $0x10] sm:$0xff] %vm728_vm0, %v1532_v7  ;;  %1558 = vst.msk [vmem:[#allocation3 + $0x20] sm:$0xff] %vm728_vm0, %v1533_v61  ;;  %v2236_v30 = vmul.f32 %v6803_v13, %v2061_v51  ;;  %v2388_v51 = vld [vmem:[#allocation2 + $0x18] sm:$0xff]  ;;  %s9502_s2 = smov 64  }
 0x21b   : > { %5770 = vmatpush1.bf16.msra.mxu1 %v5769_v36  ;;  %v1293_v60 = vmax.f32 %v1268_v63, 0.0  ;;  %v1237_v26 = vmax.f32 %v7215_v59, %v1181_v22  ;;  %v7451_v47 = vpop.permute.xlu0 %3452  ;;  %v1909_v43 = vmul.f32 %v6799_v9, %v1734_v49  ;;  %v3631_v8 = vld [vmem:[%s9499_s23 + $0x58] sm:$0xff] }
 0x21c   : > { %5771 = vmatprep.subr.bf16.mxu1 %v9500_v52  ;;  %v7456_v11 = vld [vmem:[#allocation2 + $0x27] sm:$0xff]  ;;  %v7468_v61 = vld [vmem:[#allocation2 + $0x2f] sm:$0xff] }
 0x21d   : > { %1348 = vst.msk [vmem:[#allocation2 + $0x98] sm:$0xff] %vm728_vm0, %v1293_v60  ;;  %v1269_v15 = vadd.f32 %v7334_v19, %v1237_v26  ;;  %1960 = vrot.lane.b32.xlu0 %v1909_v43, %s9501_s0  ;;  %v3521_v59 = vmul.f32 %v7064_v12, %v7456_v11  ;;  %v7466_v9 = vld [vmem:[#allocation2 + $0x21] sm:$0xff]  ;;  %v7470_v36 = vld [vmem:[#allocation2 + $0x29] sm:$0xff] }
 0x21e   : > { %2287 = vrot.lane.b32.xlu1 %v2236_v30, %s9381_s26  ;;  %v7464_v7 = vpop.permute.xlu1 %1463  ;;  %v3630_v12 = vld [vmem:[%s9499_s23 + $0x50] sm:$0xff]  ;;  %v3633_v43 = vld [vmem:[%s9499_s23 + $0x68] sm:$0xff]  ;;  %v1536_v30 = vmul.f32 %v7470_v36, %v7123_v46 }
 0x21f   : > { %5773 = vmatpush1.bf16.msra.mxu1 %v5772_v39  ;;  %v1294_v13 = vmax.f32 %v1269_v15, 0.0  ;;  %v1157_v49 = vpop.permute.xlu0 %1156  ;;  %3546 = vst.msk [vmem:[#allocation3 + $0x18] sm:$0xff] %vm728_vm0, %v3521_v59  ;;  %v5775_v22 = vpack.c.bf16 %v3631_v8, %v3630_v12  ;;  %v1535_v39 = vmul.f32 %v7466_v9, %v7104_v34  ;;  %v3522_v15 = vmul.f32 %v7094_v37, %v7468_v61  ;;  %v3635_v37 = vld [vmem:[%s9499_s23 + $0x78] sm:$0xff] }
 0x220   : > { %5774 = vmatprep.subr.bf16.mxu1 %v9500_v52  ;;  %v1225_v63 = vmax.f32 %v7221_v1, %v1157_v49  ;;  %v3632_v1 = vld [vmem:[%s9499_s23 + $0x60] sm:$0xff]  ;;  %1561 = vst.msk [vmem:[#allocation3 + $0x50] sm:$0xff] %vm728_vm0, %v1536_v30  ;;  %v2237_v8 = vmul.f32 %v7363_v53, %v6817_v20 }
 0x221   : > { %1349 = vst.msk [vmem:[#allocation2 + $0xa0] sm:$0xff] %vm728_vm0, %v1294_v13  ;;  %2439 = vrot.lane.b32.xlu0 %v2388_v51, %s9502_s2  ;;  %v2714_v13 = vmul.f32 %v6789_v3, %v7421_v23  ;;  %v5778_v34 = vpack.c.bf16 %v3633_v43, %v3632_v1  ;;  %1560 = vst.msk [vmem:[#allocation3 + $0x40] sm:$0xff] %vm728_vm0, %v1535_v39  ;;  %v3634_v3 = vld [vmem:[%s9499_s23 + $0x70] sm:$0xff] }
 0x222   : > { %3243 = vrot.lane.b32.xlu1 %v3193_v28, %s9503_s24  ;;  %v1257_v60 = vadd.f32 %v7334_v19, %v1225_v63  ;;  %v7490_v26 = vpop.permute.xlu1 %2711  ;;  %v1584_v63 = vld [vmem:[#allocation2 + $0x1a] sm:$0xff]  ;;  %3547 = vst.msk [vmem:[#allocation3 + $0x28] sm:$0xff] %vm728_vm0, %v3522_v15 }
 0x223   : > { %v1183_v59 = vpop.permute.xlu0 %1182  ;;  %5776 = vmatpush1.bf16.msra.mxu1 %v5775_v22  ;;  %v1735_v28 = vld [vmem:[#allocation2 + $0x13] sm:$0xff]  ;;  %v5781_v22 = vpack.c.bf16 %v3635_v37, %v3634_v3 }
 0x224   : > { %v1282_v49 = vmax.f32 %v1257_v60, 0.0  ;;  %v1238_v51 = vmax.f32 %v7230_v16, %v1183_v59  ;;  %5777 = vmatprep.subr.bf16.mxu1 %v9500_v52  ;;  %v1910_v12 = vmul.f32 %v6809_v17, %v1735_v28  ;;  %v3636_v60 = vld [vmem:[%s9499_s23 + $0x80] sm:$0xff]  ;;  %v3637_v17 = vld [vmem:[%s9499_s23 + $0x88] sm:$0xff] }
 0x225   : > { %2764 = vrot.lane.b32.xlu0 %v2714_v13, %s9388_s3  ;;  %v5784_v43 = vpack.c.bf16 %v3637_v17, %v3636_v60  ;;  %v2389_v59 = vld [vmem:[#allocation2 + $0x20] sm:$0xff]  ;;  %s9506_s3 = smov 96   ;;  %v2715_v60 = vmul.f32 %v6797_v5, %v7368_v40  ;;  %v2238_v17 = vmul.f32 %v6832_v27, %v7456_v11 }
 0x226   : > { %1637 = vrot.lane.b32.xlu1 %v1584_v63, %s9504_s25  ;;  %1337 = vst.msk [vmem:[#allocation2 + $0x40] sm:$0xff] %vm728_vm0, %v1282_v49  ;;  %v1270_v46 = vadd.f32 %v7334_v19, %v1238_v51  ;;  %v7516_v16 = vpop.permute.xlu1 %3447  ;;  %v3194_v13 = vld [vmem:[#allocation2 + $0x26] sm:$0xff]  ;;  %v9508_v11 = vld [vmem:[#allocation17_spill] sm:$0xff] }
 0x227   : > { %v1159_v23 = vpop.permute.xlu0 %1158  ;;  %5779 = vmatpush1.bf16.msra.mxu1 %v5778_v34  ;;  %v2866_v34 = vld [vmem:[#allocation2 + $0x1d] sm:$0xff] }
 0x228   : > { %v1295_v1 = vmax.f32 %v1270_v46, 0.0  ;;  %v1226_v39 = vmax.f32 %v7235_v54, %v1159_v23  ;;  %5780 = vmatprep.subr.bf16.mxu1 %v9500_v52  ;;  %v3041_v46 = vmul.f32 %v6787_v2, %v2866_v34 }
 0x229   : > { %1962 = vrot.lane.b32.xlu0 %v1910_v12, %s9501_s0 }
 0x22a   : > { %2289 = vrot.lane.b32.xlu1 %v2237_v8, %s9505_s1  ;;  %1350 = vst.msk [vmem:[#allocation2 + $0xa8] sm:$0xff] %vm728_vm0, %v1295_v1  ;;  %v1258_v20 = vadd.f32 %v7334_v19, %v1226_v39  ;;  %v7533_v53 = vpop.permute.xlu1 %1473 }
 0x22b   : > { %v1185_v54 = vpop.permute.xlu0 %1184  ;;  %5782 = vmatpush1.bf16.msra.mxu1 %v5781_v22  ;;  %v1585_v22 = vld [vmem:[#allocation2 + $0x22] sm:$0xff] }
 0x22c   : > { %v1283_v30 = vmax.f32 %v1258_v20, 0.0  ;;  %v1239_v15 = vmax.f32 %v7241_v24, %v1185_v54  ;;  %5783 = vmatprep.subr.bf16.mxu1 %v9500_v52 }
 0x22d   : > { %2441 = vrot.lane.b32.xlu0 %v2389_v59, %s9502_s2  ;;  %v7539_v49 = vld [vmem:[#allocation2 + $0x39] sm:$0xff] }
 0x22e   : > { %3245 = vrot.lane.b32.xlu1 %v3194_v13, %s9503_s24  ;;  %1338 = vst.msk [vmem:[#allocation2 + $0x48] sm:$0xff] %vm728_vm0, %v1283_v30  ;;  %v1271_v51 = vadd.f32 %v7334_v19, %v1239_v15  ;;  %v1165_v63 = vpop.permute.xlu1 %1164  ;;  %v7543_v28 = vld [vmem:[#allocation2 + $0x3f] sm:$0xff]  ;;  %v1538_v24 = vmul.f32 %v7539_v49, %v7306_v35 }
 0x22f   : > { %v1229_v3 = vmax.f32 %v7247_v62, %v1165_v63  ;;  %v1161_v37 = vpop.permute.xlu0 %1160  ;;  %5785 = vmatpush1.bf16.msra.mxu1 %v5784_v43  ;;  %v3524_v23 = vmul.f32 %v7132_v48, %v7543_v28  ;;  %v3357_v48 = vld [vmem:[#allocation2 + $0x7f] sm:$0xff] }
 0x230   : > { %v1296_v12 = vmax.f32 %v1271_v51, 0.0  ;;  %v1227_v8 = vmax.f32 %v7250_v21, %v1161_v37  ;;  %1563 = vst.msk [vmem:[#allocation3 + $0x70] sm:$0xff] %vm728_vm0, %v1538_v24  ;;  %v1736_v43 = vld [vmem:[#allocation2 + $0x1b] sm:$0xff]  ;;  %v3195_v51 = vld [vmem:[#allocation2 + $0x2e] sm:$0xff] }
 0x231   : > { %v1261_v1 = vadd.f32 %v7334_v19, %v1229_v3  ;;  %3091 = vrot.lane.b32.xlu0 %v3041_v46, %s9506_s3  ;;  %3549 = vst.msk [vmem:[#allocation3 + $0x48] sm:$0xff] %vm728_vm0, %v3524_v23  ;;  %v2390_v3 = vld [vmem:[#allocation2 + $0x28] sm:$0xff] }
 0x232   : > { %1639 = vrot.lane.b32.xlu1 %v1585_v22, %s9504_s25  ;;  %1351 = vst.msk [vmem:[#allocation2 + $0xb0] sm:$0xff] %vm728_vm0, %v1296_v12  ;;  %v1259_v2 = vadd.f32 %v7334_v19, %v1227_v8  ;;  %v3458_v62 = vpop.permute.xlu1 %3457  ;;  %v1586_v37 = vld [vmem:[#allocation2 + $0x2a] sm:$0xff]  ;;  %v9509_v22 = vld [vmem:[#allocation13_spill] sm:$0xff] }
 0x233   : > { %v1286_v35 = vmax.f32 %v1261_v1, 0.0  ;;  %v3532_v39 = vmul.f32 %v3458_v62, %v3357_v48  ;;  %v1187_v21 = vpop.permute.xlu0 %1186 }
 0x234   : > { %v1284_v20 = vmax.f32 %v1259_v2, 0.0  ;;  %v1240_v54 = vmax.f32 %v7259_v57, %v1187_v21  ;;  %v1911_v57 = vmul.f32 %v9508_v11, %v1736_v43  ;;  %v9512_v11 = vld [vmem:[#allocation20_spill] sm:$0xff] }
 0x235   : > { %1341 = vst.msk [vmem:[#allocation2 + $0x60] sm:$0xff] %vm728_vm0, %v1286_v35  ;;  %3557 = vst.msk [vmem:[#allocation3 + $0xc8] sm:$0xff] %vm728_vm0, %v3532_v39  ;;  %2766 = vrot.lane.b32.xlu0 %v2715_v60, %s9507_s5  ;;  %v7570_v5 = vld [vmem:[#allocation2 + $0x41] sm:$0xff] }
 0x236   : > { %2291 = vrot.lane.b32.xlu1 %v2238_v17, %s9505_s1  ;;  %1339 = vst.msk [vmem:[#allocation2 + $0x50] sm:$0xff] %vm728_vm0, %v1284_v20  ;;  %v1272_v30 = vadd.f32 %v7334_v19, %v1240_v54  ;;  %v7572_v40 = vld [vmem:[#allocation2 + $0x47] sm:$0xff]  ;;  %v1539_v59 = vmul.f32 %v7570_v5, %v7321_v55 }
 0x237   : > { %v1163_v27 = vpop.permute.xlu0 %1162  ;;  %v3525_v15 = vmul.f32 %v7288_v56, %v7572_v40  ;;  %v1737_v20 = vld [vmem:[#allocation2 + $0x23] sm:$0xff] }
 0x238   : > { %v1297_v13 = vmax.f32 %v1272_v30, 0.0  ;;  %v1228_v34 = vmax.f32 %v7267_v29, %v1163_v27  ;;  %1564 = vst.msk [vmem:[#allocation3 + $0x80] sm:$0xff] %vm728_vm0, %v1539_v59  ;;  %v2867_v29 = vld [vmem:[#allocation2 + $0x25] sm:$0xff] }
 0x239   : > { %1964 = vrot.lane.b32.xlu0 %v1911_v57, %s9501_s0  ;;  %3550 = vst.msk [vmem:[#allocation3 + $0x58] sm:$0xff] %vm728_vm0, %v3525_v15  ;;  %v3042_v1 = vmul.f32 %v9509_v22, %v2867_v29  ;;  %v9515_v29 = vld [vmem:[#allocation92_spill] sm:$0xff] }
 0x23a   : > { %3247 = vrot.lane.b32.xlu1 %v3195_v51, %s9503_s24  ;;  %1352 = vst.msk [vmem:[#allocation2 + $0xb8] sm:$0xff] %vm728_vm0, %v1297_v13  ;;  %v1260_v63 = vadd.f32 %v7334_v19, %v1228_v34  ;;  %v2392_v51 = vld [vmem:[#allocation2 + $0x38] sm:$0xff]  ;;  %v2391_v22 = vld [vmem:[#allocation2 + $0x30] sm:$0xff] }
 0x23b   : > { %v1189_v56 = vpop.permute.xlu0 %1188 }
 0x23c   : > { %v1285_v24 = vmax.f32 %v1260_v63, 0.0  ;;  %v1241_v55 = vmax.f32 %v7274_v18, %v1189_v56  ;;  %v9510_v18 = vld [vmem:[#allocation22_spill] sm:$0xff] }
 0x23d   : > { %2443 = vrot.lane.b32.xlu0 %v2390_v3, %s9502_s2  ;;  %v7591_v23 = vld [vmem:[#allocation2 + $0x49] sm:$0xff]  ;;  %v2239_v2 = vmul.f32 %v9510_v18, %v7468_v61  ;;  %v1739_v18 = vld [vmem:[#allocation2 + $0x33] sm:$0xff] }
 0x23e   : > { %1641 = vrot.lane.b32.xlu1 %v1586_v37, %s9504_s25  ;;  %1340 = vst.msk [vmem:[#allocation2 + $0x58] sm:$0xff] %vm728_vm0, %v1285_v24  ;;  %v1273_v46 = vadd.f32 %v7334_v19, %v1241_v55  ;;  %v7593_v12 = vld [vmem:[#allocation2 + $0x4f] sm:$0xff]  ;;  %v1540_v35 = vmul.f32 %v7591_v23, %v7304_v14  ;;  %v9511_v61 = vld [vmem:[#allocation14_spill] sm:$0xff] }
 0x23f   : > { %v7595_v8 = vpop.permute.xlu0 %1478  ;;  %v3526_v62 = vmul.f32 %v7317_v38, %v7593_v12  ;;  %v2716_v60 = vmul.f32 %v9511_v61, %v7466_v9  ;;  %v3196_v14 = vld [vmem:[#allocation2 + $0x36] sm:$0xff]  ;;  %v9514_v55 = vld [vmem:[#allocation26_spill] sm:$0xff] }
 0x240   : > { %v1298_v48 = vmax.f32 %v1273_v46, 0.0  ;;  %1565 = vst.msk [vmem:[#allocation3 + $0x90] sm:$0xff] %vm728_vm0, %v1540_v35  ;;  %v2240_v3 = vmul.f32 %v9514_v55, %v7396_v4  ;;  %v9518_v61 = vld [vmem:[#allocation16_spill] sm:$0xff]  ;;  %v2870_v55 = vld [vmem:[#allocation2 + $0x3d] sm:$0xff] }
 0x241   : > { %3093 = vrot.lane.b32.xlu0 %v3042_v1, %s9506_s3  ;;  %3551 = vst.msk [vmem:[#allocation3 + $0x68] sm:$0xff] %vm728_vm0, %v3526_v62  ;;  %v2868_v1 = vld [vmem:[#allocation2 + $0x2d] sm:$0xff] }
 0x242   : > { %2293 = vrot.lane.b32.xlu1 %v2239_v2, %s9505_s1  ;;  %1353 = vst.msk [vmem:[#allocation2 + $0xc0] sm:$0xff] %vm728_vm0, %v1298_v48  ;;  %v9516_v2 = vld [vmem:[#allocation15_spill] sm:$0xff]  ;;  %v9517_v62 = vld [vmem:[#allocation28_spill] sm:$0xff] }
 0x243   : > { %v1169_v39 = vpop.permute.xlu1 %1168  ;;  %v1191_v21 = vpop.permute.xlu0 %1190  ;;  %v3043_v4 = vmul.f32 %v9516_v2, %v2868_v1  ;;  %v1914_v48 = vmul.f32 %v9517_v62, %v1739_v18  ;;  %v1740_v18 = vld [vmem:[#allocation2 + $0x3b] sm:$0xff] }
 0x244   : > { %v1231_v38 = vmax.f32 %v7313_v44, %v1169_v39  ;;  %v1242_v17 = vmax.f32 %v7284_v31, %v1191_v21  ;;  %v1912_v31 = vmul.f32 %v9512_v11, %v1737_v20 }
 0x245   : > { %2768 = vrot.lane.b32.xlu0 %v2716_v60, %s9507_s5  ;;  %v7615_v54 = vld [vmem:[#allocation2 + $0x51] sm:$0xff]  ;;  %v7624_v57 = vld [vmem:[#allocation2 + $0x59] sm:$0xff]  ;;  %v2717_v60 = vmul.f32 %v9518_v61, %v7470_v36 }
 0x246   : > { %3249 = vrot.lane.b32.xlu1 %v3196_v14, %s9503_s24  ;;  %v1263_v43 = vadd.f32 %v7334_v19, %v1231_v38  ;;  %v1274_v30 = vadd.f32 %v7334_v19, %v1242_v17  ;;  %v7619_v27 = vld [vmem:[#allocation2 + $0x57] sm:$0xff]  ;;  %v1541_v9 = vmul.f32 %v7615_v54, %v7341_v42  ;;  %v7629_v63 = vld [vmem:[#allocation2 + $0x5f] sm:$0xff]  ;;  %v1738_v17 = vld [vmem:[#allocation2 + $0x2b] sm:$0xff] }
 0x247   : > { %v1167_v44 = vpop.permute.xlu0 %1166  ;;  %v3527_v15 = vmul.f32 %v7286_v10, %v7619_v27  ;;  %v9513_v42 = vld [vmem:[#allocation98_spill] sm:$0xff]  ;;  %v9519_v36 = vld [vmem:[#allocation24_spill] sm:$0xff]  ;;  %v1592_v61 = vld [vmem:[#allocation2 + $0x5a] sm:$0xff] }
 0x248   : > { %v1288_v59 = vmax.f32 %v1263_v43, 0.0  ;;  %v1299_v13 = vmax.f32 %v1274_v30, 0.0  ;;  %v1230_v34 = vmax.f32 %v7293_v33, %v1167_v44  ;;  %1566 = vst.msk [vmem:[#allocation3 + $0xa0] sm:$0xff] %vm728_vm0, %v1541_v9  ;;  %v1542_v33 = vmul.f32 %v7624_v57, %v7464_v7  ;;  %v3197_v38 = vld [vmem:[#allocation2 + $0x3e] sm:$0xff] }
 0x249   : > { %1966 = vrot.lane.b32.xlu0 %v1912_v31, %s9501_s0  ;;  %3552 = vst.msk [vmem:[#allocation3 + $0x78] sm:$0xff] %vm728_vm0, %v3527_v15  ;;  %v3528_v56 = vmul.f32 %v9513_v42, %v7629_v63  ;;  %v1913_v30 = vmul.f32 %v9519_v36, %v1738_v17  ;;  %v1588_v44 = vld [vmem:[#allocation2 + $0x3a] sm:$0xff] }
 0x24a   : > { %2447 = vrot.lane.b32.xlu1 %v2392_v51, %s9502_s2  ;;  %1343 = vst.msk [vmem:[#allocation2 + $0x70] sm:$0xff] %vm728_vm0, %v1288_v59  ;;  %1354 = vst.msk [vmem:[#allocation2 + $0xc8] sm:$0xff] %vm728_vm0, %v1299_v13  ;;  %v1262_v10 = vadd.f32 %v7334_v19, %v1230_v34  ;;  %v1587_v59 = vld [vmem:[#allocation2 + $0x32] sm:$0xff]  ;;  %v2394_v51 = vld [vmem:[#allocation2 + $0x48] sm:$0xff] }
 0x24b   : > { %v1193_v24 = vpop.permute.xlu0 %1192  ;;  %1567 = vst.msk [vmem:[#allocation3 + $0xb0] sm:$0xff] %vm728_vm0, %v1542_v33  ;;  %3553 = vst.msk [vmem:[#allocation3 + $0x88] sm:$0xff] %vm728_vm0, %v3528_v56  ;;  %v2869_v13 = vld [vmem:[#allocation2 + $0x35] sm:$0xff]  ;;  %v2393_v56 = vld [vmem:[#allocation2 + $0x40] sm:$0xff] }
 0x24c   : > { %v1287_v37 = vmax.f32 %v1262_v10, 0.0  ;;  %v1243_v46 = vmax.f32 %v9515_v29, %v1193_v24  ;;  %v2871_v10 = vld [vmem:[#allocation2 + $0x45] sm:$0xff]  ;;  %v3200_v24 = vld [vmem:[#allocation2 + $0x56] sm:$0xff] }
 0x24d   : > { %2445 = vrot.lane.b32.xlu0 %v2391_v22, %s9502_s2  ;;  %v2396_v29 = vld [vmem:[#allocation2 + $0x58] sm:$0xff]  ;;  %v9526_v22 = vld [vmem:[#allocation35_spill] sm:$0xff] }
 0x24e   : > { %2295 = vrot.lane.b32.xlu1 %v2240_v3, %s9505_s1  ;;  %1342 = vst.msk [vmem:[#allocation2 + $0x68] sm:$0xff] %vm728_vm0, %v1287_v37  ;;  %v1275_v7 = vadd.f32 %v7334_v19, %v1243_v46  ;;  %v9524_v3 = vld [vmem:[#allocation21_spill] sm:$0xff]  ;;  %v2722_v1 = vmul.f32 %v9526_v22, %v7615_v54  ;;  %v1589_v54 = vld [vmem:[#allocation2 + $0x42] sm:$0xff] }
 0x24f   : > { %v3045_v37 = vmul.f32 %v9524_v3, %v2870_v55  ;;  %v9531_v17 = vld [vmem:[#allocation37_spill] sm:$0xff]  ;;  %v2872_v55 = vld [vmem:[#allocation2 + $0x4d] sm:$0xff] }
 0x250   : > { %v1300_v35 = vmax.f32 %v1275_v7, 0.0  ;;  %v9527_v7 = vld [vmem:[#allocation32_spill] sm:$0xff] }
 0x251   : > { %3095 = vrot.lane.b32.xlu0 %v3043_v4, %s9506_s3  ;;  %v7655_v39 = vld [vmem:[#allocation2 + $0x77] sm:$0xff]  ;;  %v1915_v2 = vmul.f32 %v9527_v7, %v1740_v18  ;;  %v9528_v4 = vld [vmem:[#allocation39_spill] sm:$0xff] }
 0x252   : > { %1970 = vrot.lane.b32.xlu1 %v1914_v48, %s9501_s0  ;;  %1355 = vst.msk [vmem:[#allocation2 + $0xd0] sm:$0xf] %vm1329_vm4, %v1300_v35  ;;  %v3531_v21 = vmul.f32 %v7451_v47, %v7655_v39  ;;  %v7662_v19 = vld [vmem:[#allocation2 + $0x71] sm:$0xff]  ;;  %v2244_v62 = vmul.f32 %v9528_v4, %v7619_v27  ;;  %v9529_v35 = vld [vmem:[#allocation41_spill] sm:$0xff] }
 0x253   : > { %v1545_v14 = vmul.f32 %v7662_v19, %v7595_v8  ;;  %v1743_v48 = vld [vmem:[#allocation2 + $0x53] sm:$0xff]  ;;  %v9530_v27 = vld [vmem:[#allocation27_spill] sm:$0xff] }
 0x254   : > { %3556 = vst.msk [vmem:[#allocation3 + $0xb8] sm:$0xff] %vm728_vm0, %v3531_v21  ;;  %v3198_v21 = vld [vmem:[#allocation2 + $0x46] sm:$0xff] }
 0x255   : > { %2770 = vrot.lane.b32.xlu0 %v2717_v60, %s9507_s5  ;;  %v7669_v20 = vld [vmem:[#allocation2 + $0x67] sm:$0xff]  ;;  %1570 = vst.msk [vmem:[#allocation3 + $0xe0] sm:$0xff] %vm728_vm0, %v1545_v14  ;;  %v7681_v11 = vld [vmem:[#allocation2 + $0x6f] sm:$0xff]  ;;  %v2874_v60 = vld [vmem:[#allocation2 + $0x5d] sm:$0xff] }
 0x256   : > { %3251 = vrot.lane.b32.xlu1 %v3197_v38, %s9503_s24  ;;  %v7671_v43 = vld [vmem:[#allocation2 + $0x69] sm:$0xff]  ;;  %v3529_v47 = vmul.f32 %v7356_v32, %v7669_v20  ;;  %v7677_v9 = vld [vmem:[#allocation2 + $0x61] sm:$0xff]  ;;  %v3530_v32 = vmul.f32 %v7516_v16, %v7681_v11  ;;  %v2720_v38 = vmul.f32 %v9530_v27, %v7570_v5  ;;  %v3049_v14 = vmul.f32 %v9531_v17, %v2874_v60  ;;  %v9542_v27 = vld [vmem:[#allocation40_spill] sm:$0xff] }
 0x257   : > { %v1544_v8 = vmul.f32 %v7671_v43, %v7533_v53  ;;  %v1543_v31 = vmul.f32 %v7677_v9, %v7425_v45  ;;  %v9520_v53 = vld [vmem:[#allocation23_spill] sm:$0xff]  ;;  %v9521_v45 = vld [vmem:[#allocation18_spill] sm:$0xff]  ;;  %v9534_v5 = vld [vmem:[#allocation33_spill] sm:$0xff] }
 0x258   : > { %3554 = vst.msk [vmem:[#allocation3 + $0x98] sm:$0xff] %vm728_vm0, %v3529_v47  ;;  %v2719_v15 = vmul.f32 %v9520_v53, %v7539_v49  ;;  %3555 = vst.msk [vmem:[#allocation3 + $0xa8] sm:$0xff] %vm728_vm0, %v3530_v32  ;;  %v3044_v34 = vmul.f32 %v9521_v45, %v2869_v13  ;;  %v9522_v16 = vld [vmem:[#allocation19_spill] sm:$0xff]  ;;  %v9523_v49 = vld [vmem:[#allocation25_spill] sm:$0xff] }
 0x259   : > { %1968 = vrot.lane.b32.xlu0 %v1913_v30, %s9501_s0  ;;  %1569 = vst.msk [vmem:[#allocation3 + $0xd0] sm:$0xff] %vm728_vm0, %v1544_v8  ;;  %1568 = vst.msk [vmem:[#allocation3 + $0xc0] sm:$0xff] %vm728_vm0, %v1543_v31  ;;  %v2718_v33 = vmul.f32 %v9522_v16, %v7403_v50  ;;  %v3046_v42 = vmul.f32 %v9523_v49, %v2871_v10  ;;  %v9525_v50 = vld [vmem:[#allocation30_spill] sm:$0xff]  ;;  %v9532_v47 = vld [vmem:[#allocation31_spill] sm:$0xff] }
 0x25a   : > { %1645 = vrot.lane.b32.xlu1 %v1588_v44, %s9504_s25  ;;  %v2241_v46 = vmul.f32 %v9525_v50, %v7543_v28  ;;  %v1918_v28 = vmul.f32 %v9529_v35, %v1743_v48  ;;  %v2242_v36 = vmul.f32 %v9532_v47, %v7572_v40  ;;  %v9533_v30 = vld [vmem:[#allocation42_spill] sm:$0xff]  ;;  %v3199_v45 = vld [vmem:[#allocation2 + $0x4e] sm:$0xff]  ;;  %v3204_v17 = vld [vmem:[#allocation2 + $0x76] sm:$0xff] }
 0x25b   : > { %v2723_v8 = vmul.f32 %v9533_v30, %v7624_v57  ;;  %v1741_v44 = vld [vmem:[#allocation2 + $0x43] sm:$0xff]  ;;  %v2395_v10 = vld [vmem:[#allocation2 + $0x50] sm:$0xff] }
 0x25c   : > { %v1916_v53 = vmul.f32 %v9534_v5, %v1741_v44  ;;  %v2398_v16 = vld [vmem:[#allocation2 + $0x68] sm:$0xff]  ;;  %v1591_v47 = vld [vmem:[#allocation2 + $0x52] sm:$0xff] }
 0x25d   : > { %1643 = vrot.lane.b32.xlu0 %v1587_v59, %s9504_s25  ;;  %v9535_v59 = vld [vmem:[#allocation47_spill] sm:$0xff]  ;;  %v2873_v30 = vld [vmem:[#allocation2 + $0x55] sm:$0xff] }
 0x25e   : > { %2774 = vrot.lane.b32.xlu1 %v2719_v15, %s9507_s5  ;;  %v3202_v15 = vld [vmem:[#allocation2 + $0x66] sm:$0xff]  ;;  %v2246_v13 = vmul.f32 %v9535_v59, %v7669_v20 }
 0x261   : > { %3097 = vrot.lane.b32.xlu0 %v3044_v34, %s9506_s3 }
 0x262   : > { %2451 = vrot.lane.b32.xlu1 %v2394_v51, %s9502_s2 }
 0x265   : > { %2772 = vrot.lane.b32.xlu0 %v2718_v33, %s9507_s5  ;;  %v2876_v33 = vld [vmem:[#allocation2 + $0x6d] sm:$0xff] }
 0x266   : > { %3101 = vrot.lane.b32.xlu1 %v3046_v42, %s9506_s3  ;;  %v9536_v42 = vld [vmem:[#allocation45_spill] sm:$0xff] }
 0x269   : > { %2449 = vrot.lane.b32.xlu0 %v2393_v56, %s9502_s2  ;;  %v3051_v56 = vmul.f32 %v9536_v42, %v2876_v33 }
 0x26a   : > { %3257 = vrot.lane.b32.xlu1 %v3200_v24, %s9503_s24  ;;  %v1590_v24 = vld [vmem:[#allocation2 + $0x4a] sm:$0xff] }
 0x26d   : > { %3099 = vrot.lane.b32.xlu0 %v3045_v37, %s9506_s3 }
 0x26e   : > { %2455 = vrot.lane.b32.xlu1 %v2396_v29, %s9502_s2  ;;  %v9537_v29 = vld [vmem:[#allocation29_spill] sm:$0xff] }
 0x26f   : > { %v3047_v50 = vmul.f32 %v9537_v29, %v2872_v55  ;;  %v2400_v55 = vld [vmem:[#allocation2 + $0x78] sm:$0xff] }
 0x271   : > { %2297 = vrot.lane.b32.xlu0 %v2241_v46, %s9505_s1  ;;  %v9538_v46 = vld [vmem:[#allocation50_spill] sm:$0xff] }
 0x272   : > { %2780 = vrot.lane.b32.xlu1 %v2722_v1, %s9507_s5  ;;  %v2725_v22 = vmul.f32 %v9538_v46, %v7671_v43  ;;  %v1745_v1 = vld [vmem:[#allocation2 + $0x63] sm:$0xff]  ;;  %v1396_v43 = vld [vmem:[%s9408_s8 + $0x78] sm:$0xff] }
 0x275   : > { %1972 = vrot.lane.b32.xlu0 %v1915_v2, %s9501_s0  ;;  %v9539_v2 = vld [vmem:[#allocation34_spill] sm:$0xff] }
 0x276   : > { %2303 = vrot.lane.b32.xlu1 %v2244_v62, %s9505_s1  ;;  %v2721_v4 = vmul.f32 %v9539_v2, %v7591_v23  ;;  %v9540_v62 = vld [vmem:[#allocation49_spill] sm:$0xff]  ;;  %v1742_v23 = vld [vmem:[#allocation2 + $0x4b] sm:$0xff] }
 0x277   : > { %v1920_v48 = vmul.f32 %v9540_v62, %v1745_v1  ;;  %v3575_v2 = vld [vmem:[#allocation3 + $0x28] sm:$0xff] }
 0x279   : > { %3253 = vrot.lane.b32.xlu0 %v3198_v21, %s9503_s24  ;;  %v9541_v21 = vld [vmem:[#allocation38_spill] sm:$0xff] }
 0x27a   : > { %1978 = vrot.lane.b32.xlu1 %v1918_v28, %s9501_s0 }
 0x27d   : > { %1647 = vrot.lane.b32.xlu0 %v1589_v54, %s9504_s25  ;;  %v2243_v54 = vmul.f32 %v9541_v21, %v7593_v12  ;;  %v1398_v21 = vld [vmem:[%s9408_s8 + $0x88] sm:$0xff] }
 0x27e   : > { %1653 = vrot.lane.b32.xlu1 %v1592_v61, %s9504_s25 }
 0x281   : > { %2776 = vrot.lane.b32.xlu0 %v2720_v38, %s9507_s5  ;;  %v1917_v38 = vmul.f32 %v9542_v27, %v1742_v23 }
 0x282   : > { %3107 = vrot.lane.b32.xlu1 %v3049_v14, %s9506_s3 }
 0x285   : > { %2299 = vrot.lane.b32.xlu0 %v2242_v36, %s9505_s1  ;;  %v1594_v36 = vld [vmem:[#allocation2 + $0x6a] sm:$0xff] }
 0x286   : > { %2782 = vrot.lane.b32.xlu1 %v2723_v8, %s9507_s5  ;;  %v3384_v8 = vld [vmem:[%s9348_s9 + $0x70] sm:$0xff] }
 0x287   : > { %v2438_v32 = vpop.permute.xlu0 %2437 }
 0x288   : > { %v1634_v31 = vpop.permute.xlu1 %1633 }
 0x289   : > { %1708 = vst.msk [vmem:[#allocation3 + $0x10] sm:$0xff] %vm1706_vm2, %v1634_v31  ;;  %1974 = vrot.lane.b32.xlu0 %v1916_v53, %s9501_s0 }
 0x28a   : > { %3261 = vrot.lane.b32.xlu1 %v3202_v15, %s9503_s24  ;;  %v2878_v15 = vld [vmem:[#allocation2 + $0x7d] sm:$0xff] }
 0x28b   : > { %v2286_v57 = vpop.permute.xlu0 %2285 }
 0x28c   : > { %v1636_v40 = vpop.permute.xlu1 %1635  ;;  %2361 = vst.msk [vmem:[#allocation3] sm:$0xff] %vm2360_vm5, %v2286_v57 }
 0x28d   : > { %1709 = vst.msk [vmem:[#allocation3 + $0x20] sm:$0xff] %vm1706_vm2, %v1636_v40  ;;  %3255 = vrot.lane.b32.xlu0 %v3199_v45, %s9503_s24  ;;  %v3573_v40 = vld [vmem:[#allocation3 + $0x18] sm:$0xff] }
 0x28e   : > { %2307 = vrot.lane.b32.xlu1 %v2246_v13, %s9505_s1  ;;  %2513 = vst.msk [vmem:[#allocation3] sm:$0xff] %vm2512_vm6, %v2438_v32  ;;  %v9543_v32 = vld [vmem:[#allocation36_spill] sm:$0xff]  ;;  %v9544_v13 = vld [vmem:[#allocation53_spill] sm:$0xff] }
 0x28f   : > { %v1961_v51 = vpop.permute.xlu0 %1960  ;;  %v3048_v5 = vmul.f32 %v9543_v32, %v2873_v30  ;;  %v3053_v45 = vmul.f32 %v9544_v13, %v2878_v15  ;;  %v2877_v15 = vld [vmem:[#allocation2 + $0x75] sm:$0xff] }
 0x290   : > { %v2288_v34 = vpop.permute.xlu1 %2287  ;;  %2035 = vst.msk [vmem:[#allocation3 + $0x10] sm:$0xff] %vm2033_vm3, %v1961_v51 }
 0x291   : > { %2362 = vst.msk [vmem:[#allocation3 + $0x10] sm:$0xff] %vm2360_vm5, %v2288_v34  ;;  %2453 = vrot.lane.b32.xlu0 %v2395_v10, %s9502_s2  ;;  %v3201_v34 = vld [vmem:[#allocation2 + $0x5e] sm:$0xff] }
 0x292   : > { %2459 = vrot.lane.b32.xlu1 %v2398_v16, %s9502_s2  ;;  %v9545_v16 = vld [vmem:[#allocation55_spill] sm:$0xff] }
 0x293   : > { %v2440_v49 = vpop.permute.xlu0 %2439  ;;  %v2248_v33 = vmul.f32 %v9545_v16, %v7655_v39  ;;  %v7812_v39 = vld [vmem:[#allocation2 + $0x79] sm:$0xff] }
 0x294   : > { %v3244_v20 = vpop.permute.xlu1 %3243  ;;  %2514 = vst.msk [vmem:[#allocation3 + $0x10] sm:$0xff] %vm2512_vm6, %v2440_v49 }
 0x295   : > { %1649 = vrot.lane.b32.xlu0 %v1590_v24, %s9504_s25 }
 0x296   : > { %3111 = vrot.lane.b32.xlu1 %v3051_v56, %s9506_s3  ;;  %v9546_v56 = vld [vmem:[#allocation46_spill] sm:$0xff] }
 0x297   : > { %v2765_v37 = vpop.permute.xlu0 %2764  ;;  %v2245_v24 = vmul.f32 %v9546_v56, %v7629_v63 }
 0x298   : > { %v1638_v3 = vpop.permute.xlu1 %1637  ;;  %2840 = vst.msk [vmem:[#allocation3] sm:$0xff] %vm2839_vm7, %v2765_v37 }
 0x299   : > { %1710 = vst.msk [vmem:[#allocation3 + $0x30] sm:$0xff] %vm1706_vm2, %v1638_v3  ;;  %3103 = vrot.lane.b32.xlu0 %v3047_v50, %s9506_s3  ;;  %v1744_v3 = vld [vmem:[#allocation2 + $0x5b] sm:$0xff]  ;;  %v9547_v50 = vld [vmem:[#allocation48_spill] sm:$0xff] }
 0x29a   : > { %2786 = vrot.lane.b32.xlu1 %v2725_v22, %s9507_s5  ;;  %v1919_v46 = vmul.f32 %v9547_v50, %v1744_v3  ;;  %v9548_v22 = vld [vmem:[#allocation57_spill] sm:$0xff]  ;;  %v2399_v3 = vld [vmem:[#allocation2 + $0x70] sm:$0xff] }
 0x29b   : > { %v1963_v7 = vpop.permute.xlu0 %1962  ;;  %v2727_v1 = vmul.f32 %v9548_v22, %v7812_v39  ;;  %v9556_v22 = vld [vmem:[#allocation65_spill] sm:$0xff] }
 0x29c   : > { %v2290_v18 = vpop.permute.xlu1 %2289  ;;  %2036 = vst.msk [vmem:[#allocation3 + $0x20] sm:$0xff] %vm2033_vm3, %v1963_v7  ;;  %v1747_v7 = vld [vmem:[#allocation2 + $0x73] sm:$0xff] }
 0x29d   : > { %2363 = vst.msk [vmem:[#allocation3 + $0x20] sm:$0xff] %vm2360_vm5, %v2290_v18  ;;  %2778 = vrot.lane.b32.xlu0 %v2721_v4, %s9507_s5  ;;  %v2875_v18 = vld [vmem:[#allocation2 + $0x65] sm:$0xff] }
 0x29e   : > { %1982 = vrot.lane.b32.xlu1 %v1920_v48, %s9501_s0  ;;  %v9549_v48 = vld [vmem:[#allocation44_spill] sm:$0xff] }
 0x29f   : > { %v2442_v28 = vpop.permute.xlu0 %2441 }
 0x2a0   : > { %v3246_v35 = vpop.permute.xlu1 %3245  ;;  %2515 = vst.msk [vmem:[#allocation3 + $0x20] sm:$0xff] %vm2512_vm6, %v2442_v28 }
 0x2a1   : > { %2301 = vrot.lane.b32.xlu0 %v2243_v54, %s9505_s1 }
 0x2a2   : > { %1483 = vperm.xlu1 %6151, %v1396_v43   ;;  %v3050_v43 = vmul.f32 %v9549_v48, %v2875_v18  ;;  %v9558_v48 = vld [vmem:[#allocation67_spill] sm:$0xff] }
 0x2a3   : > { %v3092_v60 = vpop.permute.xlu0 %3091 }
 0x2a4   : > { %v1640_v61 = vpop.permute.xlu1 %1639  ;;  %3167 = vst.msk [vmem:[#allocation3] sm:$0xff] %vm3166_vm8, %v3092_v60 }
 0x2a5   : > { %1711 = vst.msk [vmem:[#allocation3 + $0x40] sm:$0xff] %vm1706_vm2, %v1640_v61  ;;  %1976 = vrot.lane.b32.xlu0 %v1917_v38, %s9501_s0  ;;  %v9551_v61 = vld [vmem:[#allocation43_spill] sm:$0xff] }
 0x2a6   : > { %3319 = vst.msk [vmem:[#allocation3] sm:$0xff] %vm3318_vm9, %v3244_v20  ;;  %3265 = vrot.lane.b32.xlu1 %v3204_v17, %s9503_s24  ;;  %v2397_v20 = vld [vmem:[#allocation2 + $0x60] sm:$0xff]  ;;  %v2724_v60 = vmul.f32 %v9551_v61, %v7677_v9  ;;  %v3203_v17 = vld [vmem:[#allocation2 + $0x6e] sm:$0xff] }
 0x2a7   : > { %v2767_v14 = vpop.permute.xlu0 %2766 }
 0x2a8   : > { %v2292_v12 = vpop.permute.xlu1 %2291  ;;  %2841 = vst.msk [vmem:[#allocation3 + $0x10] sm:$0xff] %vm2839_vm7, %v2767_v14 }
 0x2a9   : > { %1651 = vrot.lane.b32.xlu0 %v1591_v47, %s9504_s25  ;;  %v1596_v47 = vld [vmem:[#allocation2 + $0x7a] sm:$0xff] }
 0x2aa   : > { %1657 = vrot.lane.b32.xlu1 %v1594_v36, %s9504_s25  ;;  %v1593_v36 = vld [vmem:[#allocation2 + $0x62] sm:$0xff] }
 0x2ab   : > { %v1965_v31 = vpop.permute.xlu0 %1964 }
 0x2ac   : > { %v7789_v44 = vpop.permute.xlu1 %3247  ;;  %2037 = vst.msk [vmem:[#allocation3 + $0x30] sm:$0xff] %vm2033_vm3, %v1965_v31  ;;  %v3383_v31 = vld [vmem:[%s9348_s9 + $0x68] sm:$0xff] }
 0x2ad   : > { %v3570_v53 = vld [vmem:[#allocation3] sm:$0xff]  ;;  %2364 = vst.msk [vmem:[#allocation3 + $0x30] sm:$0xff] %vm2360_vm5, %v2292_v12  ;;  %3105 = vrot.lane.b32.xlu0 %v3048_v5, %s9506_s3 }
 0x2ae   : > { %3467 = vperm.xlu1 %6151, %v3384_v8   ;;  %3785 = vmatmul.mubr.f32.vlgmr.msra.gmra.mrb[24].mxu1 %v3570_v53  ;;  %v3206_v12 = vld [vmem:[#allocation2 + $0x86] sm:$0xff] }
 0x2af   : > { %5495 = vmatprep.mubr.msk.f32.mxu1 %vm728_vm0, %v3573_v40  ;;  %v2444_v59 = vpop.permute.xlu0 %2443  ;;  %v3577_v8 = vld [vmem:[#allocation3 + $0x38] sm:$0xff]  ;;  %v2880_v53 = vld [vmem:[#allocation2 + $0x8d] sm:$0xff] }
 0x2b0   : > { %v1642_v57 = vpop.permute.xlu1 %1641  ;;  %2516 = vst.msk [vmem:[#allocation3 + $0x30] sm:$0xff] %vm2512_vm6, %v2444_v59  ;;  %v9552_v59 = vld [vmem:[#allocation63_spill] sm:$0xff] }
 0x2b1   : > { %1712 = vst.msk [vmem:[#allocation3 + $0x50] sm:$0xff] %vm1706_vm2, %v1642_v57  ;;  %3259 = vrot.lane.b32.xlu0 %v3201_v34, %s9503_s24  ;;  %v3055_v13 = vmul.f32 %v9552_v59, %v2880_v53  ;;  %v2879_v53 = vld [vmem:[#allocation2 + $0x85] sm:$0xff] }
 0x2b2   : > { %3115 = vrot.lane.b32.xlu1 %v3053_v45, %s9506_s3  ;;  %v9553_v45 = vld [vmem:[#allocation52_spill] sm:$0xff]  ;;  %v9560_v59 = vld [vmem:[#allocation71_spill] sm:$0xff] }
 0x2b3   : > { %v3094_v10 = vpop.permute.xlu0 %3093  ;;  %v3052_v34 = vmul.f32 %v9553_v45, %v2877_v15  ;;  %v3583_v15 = vld [vmem:[#allocation3 + $0x68] sm:$0xff]  ;;  %v9561_v45 = vld [vmem:[#allocation58_spill] sm:$0xff] }
 0x2b4   : > { %v2294_v51 = vpop.permute.xlu1 %2293  ;;  %3168 = vst.msk [vmem:[#allocation3 + $0x10] sm:$0xff] %vm3166_vm8, %v3094_v10 }
 0x2b5   : > { %3320 = vst.msk [vmem:[#allocation3 + $0x10] sm:$0xff] %vm3318_vm9, %v3246_v35  ;;  %2457 = vrot.lane.b32.xlu0 %v2397_v20, %s9502_s2  ;;  %v9550_v35 = vld [vmem:[#allocation59_spill] sm:$0xff] }
 0x2b6   : > { %2311 = vrot.lane.b32.xlu1 %v2248_v33, %s9505_s1  ;;  %v1922_v28 = vmul.f32 %v9550_v35, %v1747_v7  ;;  %v9554_v33 = vld [vmem:[#allocation64_spill] sm:$0xff]  ;;  %v1749_v7 = vld [vmem:[#allocation2 + $0x83] sm:$0xff] }
 0x2b7   : > { %v2769_v42 = vpop.permute.xlu0 %2768  ;;  %v9559_v35 = vld [vmem:[#allocation56_spill] sm:$0xff] }
 0x2b8   : > { %v7807_v49 = vpop.permute.xlu1 %3249  ;;  %2842 = vst.msk [vmem:[#allocation3 + $0x20] sm:$0xff] %vm2839_vm7, %v2769_v42  ;;  %v9555_v42 = vld [vmem:[#allocation54_spill] sm:$0xff] }
 0x2b9   : > { %2305 = vrot.lane.b32.xlu0 %v2245_v24, %s9505_s1  ;;  %v2247_v56 = vmul.f32 %v9555_v42, %v7681_v11  ;;  %v3579_v11 = vld [vmem:[#allocation3 + $0x48] sm:$0xff] }
 0x2ba   : > { %2463 = vrot.lane.b32.xlu1 %v2400_v55, %s9502_s2  ;;  %v2402_v55 = vld [vmem:[#allocation2 + $0x88] sm:$0xff]  ;;  %v9562_v42 = vld [vmem:[#allocation72_spill] sm:$0xff] }
 0x2bb   : > { %v1967_v29 = vpop.permute.xlu0 %1966 }
 0x2bc   : > { %v2448_v37 = vpop.permute.xlu1 %2447  ;;  %2038 = vst.msk [vmem:[#allocation3 + $0x40] sm:$0xff] %vm2033_vm3, %v1967_v29  ;;  %v3572_v63 = vld [vmem:[#allocation3 + $0x10] sm:$0xff]  ;;  %v7880_v29 = vld [vmem:[#allocation2 + $0x89] sm:$0xff] }
 0x2bd   : > { %2365 = vst.msk [vmem:[#allocation3 + $0x40] sm:$0xff] %vm2360_vm5, %v2294_v51  ;;  %1980 = vrot.lane.b32.xlu0 %v1919_v46, %s9501_s0  ;;  %3790 = vmatmul.mubr.f32.gmra.mrb[26].mxu1 %v3572_v63  ;;  %v7864_v51 = vld [vmem:[#allocation2 + $0x87] sm:$0xff] }
 0x2be   : > { %2790 = vrot.lane.b32.xlu1 %v2727_v1, %s9507_s5  ;;  %5496 = vmatprep.mubr.msk.f32.mxu1 %vm728_vm0, %v3575_v2  ;;  %v2250_v20 = vmul.f32 %v9554_v33, %v7864_v51  ;;  %v2729_v1 = vmul.f32 %v9556_v22, %v7880_v29  ;;  %v9557_v63 = vld [vmem:[#allocation51_spill] sm:$0xff]  ;;  %v2074_v33 = vld [vmem:[#allocation2 + $0x7f] sm:$0xff] }
 0x2bf   : > { %v2446_v62 = vpop.permute.xlu0 %2445  ;;  %v2726_v18 = vmul.f32 %v9557_v63, %v7662_v19  ;;  %v1746_v2 = vld [vmem:[#allocation2 + $0x6b] sm:$0xff]  ;;  %v1400_v19 = vld [vmem:[%s9408_s8 + $0x98] sm:$0xff]  ;;  %v7954_v22 = vld [vmem:[#allocation2 + $0x81] sm:$0xff] }
 0x2c0   : > { %v2296_v4 = vpop.permute.xlu1 %2295  ;;  %2517 = vst.msk [vmem:[#allocation3 + $0x40] sm:$0xff] %vm2512_vm6, %v2446_v62  ;;  %v9564_v63 = vld [vmem:[#allocation73_spill] sm:$0xff] }
 0x2c1   : > { %3109 = vrot.lane.b32.xlu0 %v3050_v43, %s9506_s3  ;;  %v1924_v43 = vmul.f32 %v9558_v48, %v1749_v7  ;;  %v9565_v7 = vld [vmem:[#allocation61_spill] sm:$0xff] }
 0x2c2   : > { %1986 = vrot.lane.b32.xlu1 %v1922_v28, %s9501_s0  ;;  %v1921_v28 = vmul.f32 %v9559_v35, %v1746_v2  ;;  %v2728_v2 = vmul.f32 %v9565_v7, %v7954_v22  ;;  %v1751_v48 = vld [vmem:[#allocation2 + $0x93] sm:$0xff] }
 0x2c3   : > { %v3096_v23 = vpop.permute.xlu0 %3095  ;;  %v8036_v7 = vld [vmem:[#allocation2 + $0x91] sm:$0xff] }
 0x2c4   : > { %v1971_v54 = vpop.permute.xlu1 %1970  ;;  %3169 = vst.msk [vmem:[#allocation3 + $0x20] sm:$0xff] %vm3166_vm8, %v3096_v23 }
 0x2c5   : > { %3321 = vst.msk [vmem:[#allocation3 + $0x20] sm:$0xff] %vm3318_vm9, %v7789_v44  ;;  %2784 = vrot.lane.b32.xlu0 %v2724_v60, %s9507_s5  ;;  %v3386_v44 = vld [vmem:[%s9348_s9 + $0x80] sm:$0xff] }
 0x2c6   : > { %1493 = vperm.xlu1 %6151, %v1398_v21   ;;  %v1397_v21 = vld [vmem:[%s9408_s8 + $0x80] sm:$0xff] }
 0x2c7   : > { %v2771_v38 = vpop.permute.xlu0 %2770  ;;  %v3581_v60 = vld [vmem:[#allocation3 + $0x58] sm:$0xff] }
 0x2c8   : > { %v7838_v27 = vpop.permute.xlu1 %3251  ;;  %2843 = vst.msk [vmem:[#allocation3 + $0x30] sm:$0xff] %vm2839_vm7, %v2771_v38 }
 0x2c9   : > { %3263 = vrot.lane.b32.xlu0 %v3203_v17, %s9503_s24  ;;  %v3208_v17 = vld [vmem:[#allocation2 + $0x96] sm:$0xff] }
 0x2ca   : > { %3269 = vrot.lane.b32.xlu1 %v3206_v12, %s9503_s24  ;;  %v3205_v12 = vld [vmem:[#allocation2 + $0x7e] sm:$0xff] }
 0x2cb   : > { %v1969_v14 = vpop.permute.xlu0 %1968 }
 0x2cc   : > { %v1646_v9 = vpop.permute.xlu1 %1645  ;;  %2039 = vst.msk [vmem:[#allocation3 + $0x50] sm:$0xff] %vm2033_vm3, %v1969_v14  ;;  %v3574_v30 = vld [vmem:[#allocation3 + $0x20] sm:$0xff] }
 0x2cd   : > { %1714 = vst.msk [vmem:[#allocation3 + $0x70] sm:$0xff] %vm1706_vm2, %v1646_v9  ;;  %1655 = vrot.lane.b32.xlu0 %v1593_v36, %s9504_s25  ;;  %3795 = vmatmul.mubr.f32.gmra.mrb[28].mxu1 %v3574_v30  ;;  %v1595_v36 = vld [vmem:[#allocation2 + $0x72] sm:$0xff] }
 0x2ce   : > { %2366 = vst.msk [vmem:[#allocation3 + $0x50] sm:$0xff] %vm2360_vm5, %v2296_v4  ;;  %1661 = vrot.lane.b32.xlu1 %v1596_v47, %s9504_s25  ;;  %5497 = vmatprep.mubr.msk.f32.mxu1 %vm728_vm0, %v3577_v8  ;;  %v1598_v47 = vld [vmem:[#allocation2 + $0x8a] sm:$0xff]  ;;  %v3385_v8 = vld [vmem:[%s9348_s9 + $0x78] sm:$0xff] }
 0x2cf   : > { %2518 = vst.msk [vmem:[#allocation3 + $0x50] sm:$0xff] %vm2512_vm6, %v2448_v37  ;;  %v1644_v5 = vpop.permute.xlu0 %1643  ;;  %v3388_v30 = vld [vmem:[%s9348_s9 + $0x90] sm:$0xff] }
 0x2d0   : > { %v2775_v32 = vpop.permute.xlu1 %2774  ;;  %1713 = vst.msk [vmem:[#allocation3 + $0x60] sm:$0xff] %vm1706_vm2, %v1644_v5  ;;  %v2882_v5 = vld [vmem:[#allocation2 + $0x9d] sm:$0xff] }
 0x2d1   : > { %2845 = vst.msk [vmem:[#allocation3 + $0x50] sm:$0xff] %vm2839_vm7, %v2775_v32  ;;  %3462 = vperm.xlu0 %6152, %v3383_v31  }
 0x2d2   : > { %2040 = vst.msk [vmem:[#allocation3 + $0x60] sm:$0xff] %vm2033_vm3, %v1971_v54  ;;  %3477 = vperm.xlu1 %6151, %v3386_v44  }
 0x2d3   : > { %v3098_v57 = vpop.permute.xlu0 %3097 }
 0x2d4   : > { %v7859_v40 = vpop.permute.xlu1 %2451  ;;  %3170 = vst.msk [vmem:[#allocation3 + $0x30] sm:$0xff] %vm3166_vm8, %v3098_v57 }
 0x2d5   : > { %3322 = vst.msk [vmem:[#allocation3 + $0x30] sm:$0xff] %vm3318_vm9, %v7807_v49  ;;  %3113 = vrot.lane.b32.xlu0 %v3052_v34, %s9506_s3  ;;  %v3054_v34 = vmul.f32 %v9561_v45, %v2879_v53  ;;  %v3390_v53 = vld [vmem:[%s9348_s9 + $0xa0] sm:$0xff] }
 0x2d6   : > { %3119 = vrot.lane.b32.xlu1 %v3055_v13, %s9506_s3  ;;  %v3057_v13 = vmul.f32 %v9560_v59, %v2882_v5  ;;  %v3585_v5 = vld [vmem:[#allocation3 + $0x78] sm:$0xff]  ;;  %v2884_v59 = vld [vmem:[#allocation2 + $0xad] sm:$0xff] }
 0x2d7   : > { %v2773_v16 = vpop.permute.xlu0 %2772 }
 0x2d8   : > { %v3102_v10 = vpop.permute.xlu1 %3101  ;;  %2844 = vst.msk [vmem:[#allocation3 + $0x40] sm:$0xff] %vm2839_vm7, %v2773_v16  ;;  %v7938_v16 = vld [vmem:[#allocation2 + $0x97] sm:$0xff] }
 0x2d9   : > { %3172 = vst.msk [vmem:[#allocation3 + $0x50] sm:$0xff] %vm3166_vm8, %v3102_v10  ;;  %2309 = vrot.lane.b32.xlu0 %v2247_v56, %s9505_s1  ;;  %v2252_v56 = vmul.f32 %v9562_v42, %v7938_v16  ;;  %v8015_v42 = vld [vmem:[#allocation2 + $0xa7] sm:$0xff] }
 0x2da   : > { %2315 = vrot.lane.b32.xlu1 %v2250_v20, %s9505_s1 }
 0x2db   : > { %v2450_v24 = vpop.permute.xlu0 %2449 }
 0x2dc   : > { %v7878_v49 = vpop.permute.xlu1 %3257  ;;  %v3576_v37 = vld [vmem:[#allocation3 + $0x30] sm:$0xff] }
 0x2dd   : > { %2461 = vrot.lane.b32.xlu0 %v2399_v3, %s9502_s2  ;;  %3800 = vmatmul.mubr.f32.gmra.mrb[30].mxu1 %v3576_v37 }
 0x2de   : > { %2467 = vrot.lane.b32.xlu1 %v2402_v55, %s9502_s2  ;;  %5498 = vmatprep.mubr.msk.f32.mxu1 %vm728_vm0, %v3579_v11  ;;  %v2404_v11 = vld [vmem:[#allocation2 + $0x98] sm:$0xff] }
 0x2df   : > { %v3100_v46 = vpop.permute.xlu0 %3099 }
 0x2e0   : > { %v7885_v50 = vpop.permute.xlu1 %2455  ;;  %3171 = vst.msk [vmem:[#allocation3 + $0x40] sm:$0xff] %vm3166_vm8, %v3100_v46  ;;  %v7952_v46 = vld [vmem:[#allocation2 + $0x99] sm:$0xff] }
 0x2e1   : > { %3323 = vst.msk [vmem:[#allocation3 + $0x40] sm:$0xff] %vm3318_vm9, %v7838_v27  ;;  %2788 = vrot.lane.b32.xlu0 %v2726_v18, %s9507_s5  ;;  %v2731_v18 = vmul.f32 %v9564_v63, %v7952_v46  ;;  %v2406_v63 = vld [vmem:[#allocation2 + $0xa8] sm:$0xff] }
 0x2e2   : > { %2794 = vrot.lane.b32.xlu1 %v2729_v1, %s9507_s5 }
 0x2e3   : > { %v2298_v62 = vpop.permute.xlu0 %2297 }
 0x2e4   : > { %v7896_v4 = vpop.permute.xlu1 %2780  ;;  %2367 = vst.msk [vmem:[#allocation3 + $0x60] sm:$0xff] %vm2360_vm5, %v2298_v62 }
 0x2e5   : > { %2519 = vst.msk [vmem:[#allocation3 + $0x60] sm:$0xff] %vm2512_vm6, %v2450_v24  ;;  %1984 = vrot.lane.b32.xlu0 %v1921_v28, %s9501_s0  ;;  %v9563_v24 = vld [vmem:[#allocation60_spill] sm:$0xff]  ;;  %v9566_v28 = vld [vmem:[#allocation74_spill] sm:$0xff] }
 0x2e6   : > { %1990 = vrot.lane.b32.xlu1 %v1924_v43, %s9501_s0  ;;  %v2249_v55 = vmul.f32 %v9563_v24, %v2074_v33  ;;  %v1748_v43 = vld [vmem:[#allocation2 + $0x7b] sm:$0xff]  ;;  %v9571_v24 = vld [vmem:[#allocation68_spill] sm:$0xff] }
 0x2e7   : > { %v1973_v23 = vpop.permute.xlu0 %1972 }
 0x2e8   : > { %v7910_v54 = vpop.permute.xlu1 %2303  ;;  %2041 = vst.msk [vmem:[#allocation3 + $0x70] sm:$0xff] %vm2033_vm3, %v1973_v23  ;;  %v3578_v61 = vld [vmem:[#allocation3 + $0x40] sm:$0xff] }
 0x2e9   : > { %1488 = vperm.xlu0 %6152, %v1397_v21   ;;  %3805 = vmatmul.mubr.f32.gmra.mrb[32].mxu1 %v3578_v61  ;;  %v9567_v21 = vld [vmem:[#allocation62_spill] sm:$0xff] }
 0x2ea   : > { %1503 = vperm.xlu1 %6151, %v1400_v19   ;;  %5499 = vmatprep.mubr.msk.f32.mxu1 %vm728_vm0, %v3581_v60  ;;  %v1926_v19 = vmul.f32 %v9566_v28, %v1751_v48  ;;  %v1923_v23 = vmul.f32 %v9567_v21, %v1748_v43  ;;  %v1402_v60 = vld [vmem:[%s9408_s8 + $0xa8] sm:$0xff]  ;;  %v9573_v48 = vld [vmem:[#allocation69_spill] sm:$0xff] }
 0x2eb   : > { %v3254_v38 = vpop.permute.xlu0 %3253  ;;  %v2730_v43 = vmul.f32 %v9573_v48, %v8036_v7  ;;  %v1750_v21 = vld [vmem:[#allocation2 + $0x8b] sm:$0xff]  ;;  %v3213_v48 = vld [vmem:[#allocation2 + $0xbe] sm:$0xff] }
 0x2ec   : > { %v7914_v27 = vpop.permute.xlu1 %1978  ;;  %3324 = vst.msk [vmem:[#allocation3 + $0x50] sm:$0xff] %vm3318_vm9, %v3254_v38  ;;  %v1399_v38 = vld [vmem:[%s9408_s8 + $0x90] sm:$0xff] }
 0x2ed   : > { %3267 = vrot.lane.b32.xlu0 %v3205_v12, %s9503_s24 }
 0x2ee   : > { %3273 = vrot.lane.b32.xlu1 %v3208_v17, %s9503_s24 }
 0x2ef   : > { %v1648_v14 = vpop.permute.xlu0 %1647 }
 0x2f0   : > { %v1654_v9 = vpop.permute.xlu1 %1653  ;;  %1715 = vst.msk [vmem:[#allocation3 + $0x80] sm:$0xff] %vm1706_vm2, %v1648_v14  ;;  %v3210_v14 = vld [vmem:[#allocation2 + $0xa6] sm:$0xff] }
 0x2f1   : > { %1718 = vst.msk [vmem:[#allocation3 + $0xb0] sm:$0xff] %vm1706_vm2, %v1654_v9  ;;  %1659 = vrot.lane.b32.xlu0 %v1595_v36, %s9504_s25 }
 0x2f2   : > { %1665 = vrot.lane.b32.xlu1 %v1598_v47, %s9504_s25  ;;  %v3207_v47 = vld [vmem:[#allocation2 + $0x8e] sm:$0xff] }
 0x2f3   : > { %v2777_v31 = vpop.permute.xlu0 %2776  ;;  %v3580_v32 = vld [vmem:[#allocation3 + $0x50] sm:$0xff] }
 0x2f4   : > { %v7929_v44 = vpop.permute.xlu1 %3107  ;;  %2846 = vst.msk [vmem:[#allocation3 + $0x60] sm:$0xff] %vm2839_vm7, %v2777_v31  ;;  %3810 = vmatmul.mubr.f32.gmra.mrb[34].mxu1 %v3580_v32 }
 0x2f5   : > { %3472 = vperm.xlu0 %6152, %v3385_v8   ;;  %5500 = vmatprep.mubr.msk.f32.mxu1 %vm728_vm0, %v3583_v15  ;;  %v1597_v8 = vld [vmem:[#allocation2 + $0x82] sm:$0xff] }
 0x2f6   : > { %3487 = vperm.xlu1 %6151, %v3388_v30   ;;  %v1600_v30 = vld [vmem:[#allocation2 + $0x9a] sm:$0xff]  ;;  %v3387_v15 = vld [vmem:[%s9348_s9 + $0x88] sm:$0xff] }
 0x2f7   : > { %v2300_v57 = vpop.permute.xlu0 %2299 }
 0x2f8   : > { %v7935_v10 = vpop.permute.xlu1 %2782  ;;  %2368 = vst.msk [vmem:[#allocation3 + $0x70] sm:$0xff] %vm2360_vm5, %v2300_v57 }
 0x2f9   : > { %2520 = vst.msk [vmem:[#allocation3 + $0x70] sm:$0xff] %vm2512_vm6, %v7859_v40  ;;  %3117 = vrot.lane.b32.xlu0 %v3054_v34, %s9506_s3  ;;  %v2401_v40 = vld [vmem:[#allocation2 + $0x80] sm:$0xff] }
 0x2fa   : > { %3123 = vrot.lane.b32.xlu1 %v3057_v13, %s9506_s3  ;;  %v9569_v34 = vld [vmem:[#allocation66_spill] sm:$0xff] }
 0x2fb   : > { %v1975_v20 = vpop.permute.xlu0 %1974 }
 0x2fc   : > { %2042 = vst.msk [vmem:[#allocation3 + $0x80] sm:$0xff] %vm2033_vm3, %v1975_v20  ;;  %v7950_v3 = vpop.permute.xlu1 %3261 }
 0x2fd   : > { %2313 = vrot.lane.b32.xlu0 %v2249_v55, %s9505_s1 }
 0x2fe   : > { %2319 = vrot.lane.b32.xlu1 %v2252_v56, %s9505_s1 }
 0x2ff   : > { %v3256_v37 = vpop.permute.xlu0 %3255 }
 0x300   : > { %v7962_v62 = vpop.permute.xlu1 %2307 }
 0x301   : > { %2465 = vrot.lane.b32.xlu0 %v2401_v40, %s9502_s2 }
 0x302   : > { %2471 = vrot.lane.b32.xlu1 %v2404_v11, %s9502_s2  ;;  %v2403_v11 = vld [vmem:[#allocation2 + $0x90] sm:$0xff] }
 0x303   : > { %v2454_v1 = vpop.permute.xlu0 %2453 }
 0x304   : > { %v7971_v61 = vpop.permute.xlu1 %2459 }
 0x305   : > { %2792 = vrot.lane.b32.xlu0 %v2728_v2, %s9507_s5 }
 0x306   : > { %2798 = vrot.lane.b32.xlu1 %v2731_v18, %s9507_s5  ;;  %v8034_v18 = vld [vmem:[#allocation2 + $0xa9] sm:$0xff] }
 0x307   : > { %v1650_v35 = vpop.permute.xlu0 %1649 }
 0x308   : > { %1716 = vst.msk [vmem:[#allocation3 + $0x90] sm:$0xff] %vm1706_vm2, %v1650_v35  ;;  %v7981_v9 = vpop.permute.xlu1 %3111 }
 0x309   : > { %1988 = vrot.lane.b32.xlu0 %v1923_v23, %s9501_s0  ;;  %v3587_v23 = vld [vmem:[#allocation3 + $0x88] sm:$0xff] }
 0x30a   : > { %1994 = vrot.lane.b32.xlu1 %v1926_v19, %s9501_s0  ;;  %v1753_v19 = vld [vmem:[#allocation2 + $0xa3] sm:$0xff] }
 0x30b   : > { %v3104_v17 = vpop.permute.xlu0 %3103 }
 0x30c   : > { %3173 = vst.msk [vmem:[#allocation3 + $0x60] sm:$0xff] %vm3166_vm8, %v3104_v17  ;;  %v7990_v32 = vpop.permute.xlu1 %2786 }
 0x30d   : > { %3325 = vst.msk [vmem:[#allocation3 + $0x60] sm:$0xff] %vm3318_vm9, %v3256_v37  ;;  %1498 = vperm.xlu0 %6152, %v1399_v38   ;;  %v9574_v38 = vld [vmem:[#allocation81_spill] sm:$0xff] }
 0x30e   : > { %1513 = vperm.xlu1 %6151, %v1402_v60   ;;  %v1928_v17 = vmul.f32 %v9574_v38, %v1753_v19  ;;  %v2405_v19 = vld [vmem:[#allocation2 + $0xa0] sm:$0xff] }
 0x30f   : > { %v2779_v12 = vpop.permute.xlu0 %2778  ;;  %v9580_v38 = vld [vmem:[#allocation77_spill] sm:$0xff] }
 0x310   : > { %2847 = vst.msk [vmem:[#allocation3 + $0x70] sm:$0xff] %vm2839_vm7, %v2779_v12  ;;  %v8012_v20 = vpop.permute.xlu1 %1982  ;;  %v9575_v12 = vld [vmem:[#allocation70_spill] sm:$0xff] }
 0x311   : > { %3271 = vrot.lane.b32.xlu0 %v3207_v47, %s9503_s24 }
 0x312   : > { %3277 = vrot.lane.b32.xlu1 %v3210_v14, %s9503_s24  ;;  %v1925_v14 = vmul.f32 %v9575_v12, %v1750_v21  ;;  %v8115_v21 = vld [vmem:[#allocation2 + $0xb9] sm:$0xff] }
 0x313   : > { %v2302_v36 = vpop.permute.xlu0 %2301 }
 0x314   : > { %2369 = vst.msk [vmem:[#allocation3 + $0x80] sm:$0xff] %vm2360_vm5, %v2302_v36  ;;  %v3582_v31 = vld [vmem:[#allocation3 + $0x60] sm:$0xff] }
 0x315   : > { %2521 = vst.msk [vmem:[#allocation3 + $0x80] sm:$0xff] %vm2512_vm6, %v2454_v1  ;;  %1663 = vrot.lane.b32.xlu0 %v1597_v8, %s9504_s25  ;;  %3815 = vmatmul.mubr.f32.gmra.mrb[36].mxu1 %v3582_v31  ;;  %v3589_v8 = vld [vmem:[#allocation3 + $0x98] sm:$0xff]  ;;  %v1404_v31 = vld [vmem:[%s9408_s8 + $0xb8] sm:$0xff] }
 0x316   : > { %1669 = vrot.lane.b32.xlu1 %v1600_v30, %s9504_s25  ;;  %2848 = vst.msk [vmem:[#allocation3 + $0x80] sm:$0xff] %vm2839_vm7, %v7896_v4  ;;  %5501 = vmatprep.mubr.msk.f32.mxu1 %vm728_vm0, %v3585_v5  ;;  %v2881_v4 = vld [vmem:[#allocation2 + $0x95] sm:$0xff]  ;;  %v1401_v5 = vld [vmem:[%s9408_s8 + $0xa0] sm:$0xff] }
 0x317   : > { %3175 = vst.msk [vmem:[#allocation3 + $0x80] sm:$0xff] %vm3166_vm8, %v7929_v44  ;;  %v1977_v57 = vpop.permute.xlu0 %1976  ;;  %v9568_v44 = vld [vmem:[#allocation80_spill] sm:$0xff]  ;;  %v3056_v33 = vmul.f32 %v9569_v34, %v2881_v4 }
 0x318   : > { %2043 = vst.msk [vmem:[#allocation3 + $0x90] sm:$0xff] %vm2033_vm3, %v1977_v57  ;;  %v3059_v45 = vmul.f32 %v9568_v44, %v2884_v59  ;;  %v3212_v4 = vld [vmem:[#allocation2 + $0xb6] sm:$0xff] }
 0x319   : > { %2370 = vst.msk [vmem:[#allocation3 + $0x90] sm:$0xff] %vm2360_vm5, %v7910_v54  ;;  %3482 = vperm.xlu0 %6152, %v3387_v15   ;;  %v2076_v54 = vld [vmem:[#allocation2 + $0x8f] sm:$0xff] }
 0x31a   : > { %3497 = vperm.xlu1 %6151, %v3390_v53   ;;  %2522 = vst.msk [vmem:[#allocation3 + $0x90] sm:$0xff] %vm2512_vm6, %v7885_v50  ;;  %v2251_v55 = vmul.f32 %v9571_v24, %v2076_v54  ;;  %v1599_v44 = vld [vmem:[#allocation2 + $0x92] sm:$0xff]  ;;  %v9576_v24 = vld [vmem:[#allocation86_spill] sm:$0xff] }
 0x31b   : > { %2849 = vst.msk [vmem:[#allocation3 + $0x90] sm:$0xff] %vm2839_vm7, %v7935_v10  ;;  %v1652_v13 = vpop.permute.xlu0 %1651  ;;  %v9570_v10 = vld [vmem:[#allocation79_spill] sm:$0xff] }
 0x31c   : > { %1717 = vst.msk [vmem:[#allocation3 + $0xa0] sm:$0xff] %vm1706_vm2, %v1652_v13  ;;  %v2254_v56 = vmul.f32 %v9570_v10, %v8015_v42  ;;  %v3209_v13 = vld [vmem:[#allocation2 + $0x9e] sm:$0xff]  ;;  %v3591_v10 = vld [vmem:[#allocation3 + $0xa8] sm:$0xff] }
 0x31d   : > { %2044 = vst.msk [vmem:[#allocation3 + $0xa0] sm:$0xff] %vm2033_vm3, %v7914_v27  ;;  %3121 = vrot.lane.b32.xlu0 %v3056_v33, %s9506_s3 }
 0x31e   : > { %3127 = vrot.lane.b32.xlu1 %v3059_v45, %s9506_s3  ;;  %v3389_v45 = vld [vmem:[%s9348_s9 + $0x98] sm:$0xff] }
 0x31f   : > { %v3106_v50 = vpop.permute.xlu0 %3105 }
 0x320   : > { %3174 = vst.msk [vmem:[#allocation3 + $0x70] sm:$0xff] %vm3166_vm8, %v3106_v50  ;;  %v2886_v50 = vld [vmem:[#allocation2 + $0xbd] sm:$0xff] }
 0x321   : > { %v1484_v37 = vpop.permute.xlu1 %1483  ;;  %3326 = vst.msk [vmem:[#allocation3 + $0x70] sm:$0xff] %vm3318_vm9, %v7878_v49  ;;  %2317 = vrot.lane.b32.xlu0 %v2251_v55, %s9505_s1  ;;  %v9572_v49 = vld [vmem:[#allocation82_spill] sm:$0xff]  ;;  %v3061_v55 = vmul.f32 %v9576_v24, %v2886_v50  ;;  %v3211_v50 = vld [vmem:[#allocation2 + $0xae] sm:$0xff] }
 0x322   : > { %v1546_v40 = vmul.f32 %v7812_v39, %v1484_v37  ;;  %2323 = vrot.lane.b32.xlu1 %v2254_v56, %s9505_s1  ;;  %v2733_v2 = vmul.f32 %v9572_v49, %v8034_v18  ;;  %v9577_v37 = vld [vmem:[#allocation76_spill] sm:$0xff] }
 0x323   : > { %v3260_v27 = vpop.permute.xlu0 %3259 }
 0x324   : > { %1571 = vst.msk [vmem:[#allocation3 + $0xf0] sm:$0xff] %vm728_vm0, %v1546_v40 }
 0x325   : > { %3327 = vst.msk [vmem:[#allocation3 + $0x80] sm:$0xff] %vm3318_vm9, %v3260_v27  ;;  %v8032_v1 = vpop.permute.xlu1 %3265  ;;  %2469 = vrot.lane.b32.xlu0 %v2403_v11, %s9502_s2  ;;  %v2078_v11 = vld [vmem:[#allocation2 + $0x9f] sm:$0xff] }
 0x326   : > { %2475 = vrot.lane.b32.xlu1 %v2406_v63, %s9502_s2 }
 0x327   : > { %v2458_v39 = vpop.permute.xlu0 %2457 }
 0x328   : > { %v3584_v28 = vld [vmem:[#allocation3 + $0x70] sm:$0xff] }
 0x329   : > { %v1658_v35 = vpop.permute.xlu1 %1657  ;;  %2796 = vrot.lane.b32.xlu0 %v2730_v43, %s9507_s5  ;;  %3820 = vmatmul.mubr.f32.gmra.mrb[38].mxu1 %v3584_v28 }
 0x32a   : > { %1720 = vst.msk [vmem:[#allocation3 + $0xd0] sm:$0xff] %vm1706_vm2, %v1658_v35  ;;  %2802 = vrot.lane.b32.xlu1 %v2733_v2, %s9507_s5  ;;  %5502 = vmatprep.mubr.msk.f32.mxu1 %vm728_vm0, %v3587_v23  ;;  %v3593_v35 = vld [vmem:[#allocation3 + $0xb8] sm:$0xff] }
 0x32b   : > { %v2306_v60 = vpop.permute.xlu0 %2305  ;;  %v8117_v23 = vld [vmem:[#allocation2 + $0xa1] sm:$0xff] }
 0x32c   : > { %v3586_v47 = vld [vmem:[#allocation3 + $0x80] sm:$0xff]  ;;  %2371 = vst.msk [vmem:[#allocation3 + $0xa0] sm:$0xff] %vm2360_vm5, %v2306_v60 }
 0x32d   : > { %v3468_v36 = vpop.permute.xlu1 %3467  ;;  %2523 = vst.msk [vmem:[#allocation3 + $0xa0] sm:$0xff] %vm2512_vm6, %v2458_v39  ;;  %1992 = vrot.lane.b32.xlu0 %v1925_v14, %s9501_s0  ;;  %3825 = vmatmul.mubr.f32.gmra.mrb[40].mxu1 %v3586_v47  ;;  %v9578_v39 = vld [vmem:[#allocation75_spill] sm:$0xff]  ;;  %v1755_v14 = vld [vmem:[#allocation2 + $0xb3] sm:$0xff]  ;;  %v1752_v47 = vld [vmem:[#allocation2 + $0x9b] sm:$0xff] }
 0x32e   : > { %v3534_v30 = vmul.f32 %v3468_v36, %v2076_v54  ;;  %1998 = vrot.lane.b32.xlu1 %v1928_v17, %s9501_s0  ;;  %5503 = vmatprep.mubr.msk.f32.mxu1 %vm728_vm0, %v3589_v8  ;;  %v2253_v49 = vmul.f32 %v9578_v39, %v2078_v11  ;;  %v2732_v17 = vmul.f32 %v9580_v38, %v8117_v23  ;;  %v9581_v36 = vld [vmem:[#allocation87_spill] sm:$0xff]  ;;  %v9582_v8 = vld [vmem:[#allocation78_spill] sm:$0xff]  ;;  %v9585_v39 = vld [vmem:[#allocation96_spill] sm:$0xff] }
 0x32f   : > { %v1981_v53 = vpop.permute.xlu0 %1980  ;;  %v2080_v38 = vld [vmem:[#allocation2 + $0xaf] sm:$0xff] }
 0x330   : > { %3559 = vst.msk [vmem:[#allocation3 + $0xe8] sm:$0xff] %vm728_vm0, %v3534_v30  ;;  %v1930_v30 = vmul.f32 %v9581_v36, %v1755_v14  ;;  %v2410_v36 = vld [vmem:[#allocation2 + $0xc8] sm:$0xff] }
 0x331   : > { %2045 = vst.msk [vmem:[#allocation3 + $0xb0] sm:$0xff] %vm2033_vm3, %v1981_v53  ;;  %v8063_v15 = vpop.permute.xlu1 %3115  ;;  %1508 = vperm.xlu0 %6152, %v1401_v5  }
 0x332   : > { %2372 = vst.msk [vmem:[#allocation3 + $0xb0] sm:$0xff] %vm2360_vm5, %v7962_v62  ;;  %1523 = vperm.xlu1 %6151, %v1404_v31   ;;  %v1927_v31 = vmul.f32 %v9582_v8, %v1752_v47 }
 0x333   : > { %2524 = vst.msk [vmem:[#allocation3 + $0xb0] sm:$0xff] %vm2512_vm6, %v7971_v61  ;;  %v3110_v57 = vpop.permute.xlu0 %3109 }
 0x334   : > { %2851 = vst.msk [vmem:[#allocation3 + $0xb0] sm:$0xff] %vm2839_vm7, %v7990_v32  ;;  %v1602_v32 = vld [vmem:[#allocation2 + $0xaa] sm:$0xff] }
 0x335   : > { %3176 = vst.msk [vmem:[#allocation3 + $0x90] sm:$0xff] %vm3166_vm8, %v3110_v57  ;;  %v8072_v59 = vpop.permute.xlu1 %2311  ;;  %3275 = vrot.lane.b32.xlu0 %v3209_v13, %s9503_s24  ;;  %v8129_v57 = vld [vmem:[#allocation2 + $0xbf] sm:$0xff] }
 0x336   : > { %3328 = vst.msk [vmem:[#allocation3 + $0x90] sm:$0xff] %vm3318_vm9, %v7950_v3  ;;  %3281 = vrot.lane.b32.xlu1 %v3212_v4, %s9503_s24  ;;  %v3392_v3 = vld [vmem:[%s9348_s9 + $0xb0] sm:$0xff] }
 0x337   : > { %v2785_v62 = vpop.permute.xlu0 %2784 }
 0x338   : > { %2850 = vst.msk [vmem:[#allocation3 + $0xa0] sm:$0xff] %vm2839_vm7, %v2785_v62  ;;  %v1403_v62 = vld [vmem:[%s9408_s8 + $0xb0] sm:$0xff] }
 0x339   : > { %v8079_v61 = vpop.permute.xlu1 %2463  ;;  %3177 = vst.msk [vmem:[#allocation3 + $0xa0] sm:$0xff] %vm3166_vm8, %v7981_v9  ;;  %1667 = vrot.lane.b32.xlu0 %v1599_v44, %s9504_s25  ;;  %v2883_v9 = vld [vmem:[#allocation2 + $0xa5] sm:$0xff] }
 0x33a   : > { %1673 = vrot.lane.b32.xlu1 %v1602_v32, %s9504_s25  ;;  %v3058_v40 = vmul.f32 %v9577_v37, %v2883_v9  ;;  %v9583_v32 = vld [vmem:[#allocation89_spill] sm:$0xff]  ;;  %v1601_v37 = vld [vmem:[#allocation2 + $0xa2] sm:$0xff] }
 0x33b   : > { %v3264_v34 = vpop.permute.xlu0 %3263  ;;  %v2257_v44 = vmul.f32 %v9583_v32, %v8129_v57  ;;  %v2561_v9 = vld [vmem:[#allocation2 + $0xc1] sm:$0xff] }
 0x33c   : > { %3329 = vst.msk [vmem:[#allocation3 + $0xa0] sm:$0xff] %vm3318_vm9, %v3264_v34 }
 0x33d   : > { %v8092_v33 = vpop.permute.xlu1 %2790  ;;  %v3588_v54 = vld [vmem:[#allocation3 + $0x90] sm:$0xff]  ;;  %3492 = vperm.xlu0 %6152, %v3389_v45  }
 0x33e   : > { %3507 = vperm.xlu1 %6151, %v3392_v3   ;;  %3830 = vmatmul.mubr.f32.gmra.mrb[42].mxu1 %v3588_v54  ;;  %v2409_v54 = vld [vmem:[#allocation2 + $0xc0] sm:$0xff] }
 0x33f   : > { %5504 = vmatprep.mubr.msk.f32.mxu1 %vm728_vm0, %v3591_v10  ;;  %v1656_v56 = vpop.permute.xlu0 %1655  ;;  %v9584_v10 = vld [vmem:[#allocation90_spill] sm:$0xff] }
 0x340   : > { %1719 = vst.msk [vmem:[#allocation3 + $0xc0] sm:$0xff] %vm1706_vm2, %v1656_v56  ;;  %v2736_v56 = vmul.f32 %v9584_v10, %v2561_v9  ;;  %v2563_v9 = vld [vmem:[#allocation2 + $0xd1] sm:$0xf]  ;;  %v8206_v10 = vld [vmem:[#allocation2 + $0xb7] sm:$0xff] }
 0x341   : > { %v8098_v27 = vpop.permute.xlu1 %1986  ;;  %2046 = vst.msk [vmem:[#allocation3 + $0xc0] sm:$0xff] %vm2033_vm3, %v8012_v20  ;;  %3125 = vrot.lane.b32.xlu0 %v3058_v40, %s9506_s3  ;;  %v1405_v20 = vld [vmem:[%s9408_s8 + $0xc0] sm:$0xf]  ;;  %v2888_v40 = vld [vmem:[#allocation2 + $0xcd] sm:$0xff]  ;;  %s5544_s8 = sshll.u32 %s6368_s4, 4  ;;  %s6231_s4 = smov [#allocation4]  }
 0x342   : > { %3131 = vrot.lane.b32.xlu1 %v3061_v55, %s9506_s3 }
 0x343   : > { %v3590_v63 = vld [vmem:[#allocation3 + $0xa0] sm:$0xff] }
 0x344   : > { %3835 = vmatmul.mubr.f32.gmra.mrb[44].mxu1 %v3590_v63  ;;  %v3391_v63 = vld [vmem:[%s9348_s9 + $0xa8] sm:$0xff] }
 0x345   : > { %v1494_v2 = vpop.permute.xlu1 %1493  ;;  %2321 = vrot.lane.b32.xlu0 %v2253_v49, %s9505_s1  ;;  %5505 = vmatprep.mubr.msk.f32.mxu1 %vm728_vm0, %v3593_v35  ;;  %v3063_v49 = vmul.f32 %v9585_v39, %v2888_v40  ;;  %v9586_v35 = vld [vmem:[#allocation83_spill] sm:$0xff] }
 0x346   : > { %v1548_v43 = vmul.f32 %v7880_v29, %v1494_v2  ;;  %3283 = vrot.lane.b32.xlu1 %v3213_v48, %s9503_s24  ;;  %v9579_v29 = vld [vmem:[#allocation94_spill] sm:$0xff] }
 0x347   : > { %v2735_v60 = vmul.f32 %v9579_v29, %v8115_v21 }
 0x348   : > { %1573 = vst.msk [vmem:[#allocation3 + $0x110] sm:$0xff] %vm728_vm0, %v1548_v43  ;;  %v2885_v43 = vld [vmem:[#allocation2 + $0xb5] sm:$0xff] }
 0x349   : > { %v8113_v28 = vpop.permute.xlu1 %3269  ;;  %2473 = vrot.lane.b32.xlu0 %v2405_v19, %s9502_s2 }
 0x34a   : > { %1528 = vperm.xlu1 %6151, %v1405_v20   ;;  %v3060_v20 = vmul.f32 %v9586_v35, %v2885_v43  ;;  %v1603_v35 = vld [vmem:[#allocation2 + $0xb2] sm:$0xff] }
 0x34d   : > { %v1662_v12 = vpop.permute.xlu1 %1661  ;;  %2800 = vrot.lane.b32.xlu0 %v2732_v17, %s9507_s5 }
 0x34e   : > { %1722 = vst.msk [vmem:[#allocation3 + $0xf0] sm:$0xff] %vm1706_vm2, %v1662_v12  ;;  %2806 = vrot.lane.b32.xlu1 %v2735_v60, %s9507_s5  ;;  %v3215_v60 = vld [vmem:[#allocation2 + $0xce] sm:$0xff] }
 0x34f   : > { %v2889_v12 = vld [vmem:[#allocation2 + $0xd5] sm:$0xff] }
 0x350   : > { %v3463_v53 = vpop.permute.xlu0 %3462 }
 0x351   : > { %v3478_v5 = vpop.permute.xlu1 %3477  ;;  %v3533_v13 = vmul.f32 %v3463_v53, %v7864_v51  ;;  %1996 = vrot.lane.b32.xlu0 %v1927_v31, %s9501_s0  ;;  %v2407_v31 = vld [vmem:[#allocation2 + $0xb0] sm:$0xff] }
 0x352   : > { %v3536_v4 = vmul.f32 %v3478_v5, %v2078_v11  ;;  %2002 = vrot.lane.b32.xlu1 %v1930_v30, %s9501_s0  ;;  %v3595_v11 = vld [vmem:[#allocation3 + $0xc8] sm:$0xff] }
 0x353   : > { %3558 = vst.msk [vmem:[#allocation3 + $0xd8] sm:$0xff] %vm728_vm0, %v3533_v13  ;;  %v8191_v5 = vld [vmem:[#allocation2 + $0xb1] sm:$0xff] }
 0x354   : > { %3561 = vst.msk [vmem:[#allocation3 + $0x108] sm:$0xff] %vm728_vm0, %v3536_v4  ;;  %v3114_v45 = vpop.permute.xlu0 %3113  ;;  %v2084_v13 = vld [vmem:[#allocation2 + $0xcf] sm:$0xf] }
 0x355   : > { %v8141_v3 = vpop.permute.xlu1 %3119  ;;  %3178 = vst.msk [vmem:[#allocation3 + $0xb0] sm:$0xff] %vm3166_vm8, %v3114_v45  ;;  %1518 = vperm.xlu0 %6152, %v1403_v62   ;;  %v1754_v62 = vld [vmem:[#allocation2 + $0xab] sm:$0xff]  ;;  %v2259_v32 = vmul.f32 %v7360_v41, %v2084_v13  ;;  %v2738_v41 = vmul.f32 %v7490_v26, %v2563_v9  ;;  %v2408_v26 = vld [vmem:[#allocation2 + $0xb8] sm:$0xff] }
 0x356   : > { %2329 = vrot.lane.b32.xlu1 %v2257_v44, %s9505_s1  ;;  %3330 = vst.msk [vmem:[#allocation3 + $0xb0] sm:$0xff] %vm3318_vm9, %v8032_v1  ;;  %v9589_v44 = vld [vmem:[#allocation85_spill] sm:$0xff]  ;;  %v8282_v9 = vld [vmem:[#allocation2 + $0xc7] sm:$0xff] }
 0x357   : > { %v1929_v45 = vmul.f32 %v9589_v44, %v1754_v62  ;;  %v1756_v13 = vld [vmem:[#allocation2 + $0xbb] sm:$0xff] }
 0x358   : > { %v2310_v34 = vpop.permute.xlu0 %2309 }
 0x359   : > { %v8147_v51 = vpop.permute.xlu1 %2315  ;;  %2373 = vst.msk [vmem:[#allocation3 + $0xc0] sm:$0xff] %vm2360_vm5, %v2310_v34  ;;  %3279 = vrot.lane.b32.xlu0 %v3211_v50, %s9503_s24 }
 0x35a   : > { %2481 = vrot.lane.b32.xlu1 %v2409_v54, %s9502_s2 }
 0x35c   : > { %v2462_v55 = vpop.permute.xlu0 %2461 }
 0x35d   : > { %v8153_v24 = vpop.permute.xlu1 %2467  ;;  %2525 = vst.msk [vmem:[#allocation3 + $0xc0] sm:$0xff] %vm2512_vm6, %v2462_v55  ;;  %1671 = vrot.lane.b32.xlu0 %v1601_v37, %s9504_s25  ;;  %v3592_v1 = vld [vmem:[#allocation3 + $0xb0] sm:$0xff]  ;;  %v3597_v37 = vld [vmem:[#allocation3 + $0xd8] sm:$0xff] }
 0x35e   : > { %2808 = vrot.lane.b32.xlu1 %v2736_v56, %s9507_s5  ;;  %3840 = vmatmul.mubr.f32.gmra.mrb[46].mxu1 %v3592_v1 }
 0x35f   : > { %5506 = vmatprep.mubr.msk.f32.mxu1 %vm728_vm0, %v3595_v11  ;;  %v3217_v11 = vld [vmem:[#allocation2 + $0xde] sm:$0xf] }
 0x360   : > { %v2789_v48 = vpop.permute.xlu0 %2788 }
 0x361   : > { %v8163_v2 = vpop.permute.xlu1 %2794  ;;  %2852 = vst.msk [vmem:[#allocation3 + $0xc0] sm:$0xff] %vm2839_vm7, %v2789_v48  ;;  %3502 = vperm.xlu0 %6152, %v3391_v63  }
 0x362   : > { %3135 = vrot.lane.b32.xlu1 %v3063_v49, %s9506_s3  ;;  %3179 = vst.msk [vmem:[#allocation3 + $0xc0] sm:$0xff] %vm3166_vm8, %v8063_v15  ;;  %v9587_v15 = vld [vmem:[#allocation84_spill] sm:$0xff]  ;;  %v4334_v49 = vld [vmem:[%s9354_s15 + $0x8] sm:$0xff] }
 0x363   : > { %v2255_v17 = vmul.f32 %v9587_v15, %v2080_v38  ;;  %v3393_v15 = vld [vmem:[%s9348_s9 + $0xb8] sm:$0xff] }
 0x364   : > { %v1985_v29 = vpop.permute.xlu0 %1984 }
 0x365   : > { %v8170_v19 = vpop.permute.xlu1 %1990  ;;  %2047 = vst.msk [vmem:[#allocation3 + $0xd0] sm:$0xff] %vm2033_vm3, %v1985_v29  ;;  %3129 = vrot.lane.b32.xlu0 %v3060_v20, %s9506_s3 }
 0x366   : > { %3287 = vrot.lane.b32.xlu1 %v3215_v60, %s9503_s24  ;;  %2374 = vst.msk [vmem:[#allocation3 + $0xd0] sm:$0xff] %vm2360_vm5, %v8072_v59  ;;  %v3064_v59 = vmul.f32 %v7346_v25, %v2889_v12  ;;  %v3599_v60 = vld [vmem:[#allocation3 + $0xe8] sm:$0xff] }
 0x367   : > { %2526 = vst.msk [vmem:[#allocation3 + $0xd0] sm:$0xff] %vm2512_vm6, %v8079_v61 }
 0x368   : > { %2853 = vst.msk [vmem:[#allocation3 + $0xd0] sm:$0xff] %vm2839_vm7, %v8092_v33  ;;  %v1489_v47 = vpop.permute.xlu0 %1488 }
 0x369   : > { %v1504_v14 = vpop.permute.xlu1 %1503  ;;  %v1547_v8 = vmul.f32 %v7954_v22, %v1489_v47  ;;  %2325 = vrot.lane.b32.xlu0 %v2255_v17, %s9505_s1  ;;  %v9588_v22 = vld [vmem:[#allocation91_spill] sm:$0xff] }
 0x36a   : > { %v1550_v30 = vmul.f32 %v7952_v46, %v1504_v14  ;;  %2483 = vrot.lane.b32.xlu1 %v2410_v36, %s9502_s2  ;;  %v3216_v46 = vld [vmem:[#allocation2 + $0xd6] sm:$0xff]  ;;  %v2734_v25 = vmul.f32 %v9588_v22, %v8191_v5  ;;  %v2887_v14 = vld [vmem:[#allocation2 + $0xc5] sm:$0xff]  ;;  %v8268_v22 = vld [vmem:[%s9592_s30] ss:$0 sm:$0xff] }
 0x36b   : > { %1572 = vst.msk [vmem:[#allocation3 + $0x100] sm:$0xff] %vm728_vm0, %v1547_v8  ;;  %v4264_v47 = vld [vmem:[%s9353_s14 + $0x8] sm:$0xff]  ;;  %v9591_v36 = vld [vmem:[#allocation88_spill] sm:$0xff] }
 0x36c   : > { %1575 = vst.msk [vmem:[#allocation3 + $0x130] sm:$0xff] %vm728_vm0, %v1550_v30  ;;  %v3268_v33 = vpop.permute.xlu0 %3267  ;;  %v3062_v30 = vmul.f32 %v9591_v36, %v2887_v14  ;;  %v2890_v36 = vld [vmem:[#allocation2 + $0xdd] sm:$0xf] }
 0x36d   : > { %v8189_v61 = vpop.permute.xlu1 %3273  ;;  %3331 = vst.msk [vmem:[#allocation3 + $0xc0] sm:$0xff] %vm3318_vm9, %v3268_v33  ;;  %2477 = vrot.lane.b32.xlu0 %v2407_v31, %s9502_s2 }
 0x36e   : > { %3137 = vrot.lane.b32.xlu1 %v3064_v59, %s9506_s3 }
 0x370   : > { %v1660_v4 = vpop.permute.xlu0 %1659 }
 0x371   : > { %v1666_v53 = vpop.permute.xlu1 %1665  ;;  %1721 = vst.msk [vmem:[#allocation3 + $0xe0] sm:$0xff] %vm1706_vm2, %v1660_v4  ;;  %2804 = vrot.lane.b32.xlu0 %v2734_v25, %s9507_s5  ;;  %v1604_v4 = vld [vmem:[#allocation2 + $0xba] sm:$0xff] }
 0x372   : > { %1724 = vst.msk [vmem:[#allocation3 + $0x110] sm:$0xff] %vm1706_vm2, %v1666_v53  ;;  %3289 = vrot.lane.b32.xlu1 %v3216_v46, %s9503_s24  ;;  %v3214_v46 = vld [vmem:[#allocation2 + $0xc6] sm:$0xff] }
 0x373   : > { %2048 = vst.msk [vmem:[#allocation3 + $0xe0] sm:$0xff] %vm2033_vm3, %v8098_v27  ;;  %v9590_v27 = vld [vmem:[#allocation93_spill] sm:$0xff] }
 0x374   : > { %v3473_v54 = vpop.permute.xlu0 %3472  ;;  %v3594_v50 = vld [vmem:[#allocation3 + $0xc0] sm:$0xff]  ;;  %v2256_v40 = vmul.f32 %v9590_v27, %v8206_v10 }
 0x375   : > { %v3488_v34 = vpop.permute.xlu1 %3487  ;;  %v3535_v55 = vmul.f32 %v3473_v54, %v7938_v16  ;;  %2000 = vrot.lane.b32.xlu0 %v1929_v45, %s9501_s0  ;;  %3845 = vmatmul.mubr.f32.gmra.mrb[48].mxu1 %v3594_v50 }
 0x376   : > { %v3538_v56 = vmul.f32 %v3488_v34, %v2080_v38  ;;  %2333 = vrot.lane.b32.xlu1 %v2259_v32, %s9505_s1  ;;  %5507 = vmatprep.mubr.msk.f32.mxu1 %vm728_vm0, %v3597_v37  ;;  %v4336_v38 = vld [vmem:[%s9354_s15 + $0x18] sm:$0xf]  ;;  %v9593_v32 = vld [vmem:[#allocation95_spill] sm:$0xff] }
 0x377   : > { %3560 = vst.msk [vmem:[#allocation3 + $0xf8] sm:$0xff] %vm728_vm0, %v3535_v55  ;;  %v1931_v44 = vmul.f32 %v9593_v32, %v1756_v13  ;;  %v9594_v55 = vld [vmem:[#allocation97_spill] sm:$0xff]  ;;  %v3367_v32 = vld [vmem:[#allocation2 + $0xcf] sm:$0xff] }
 0x378   : > { %3563 = vst.msk [vmem:[#allocation3 + $0x128] sm:$0xff] %vm728_vm0, %v3538_v56  ;;  %v3118_v16 = vpop.permute.xlu0 %3117  ;;  %v2258_v37 = vmul.f32 %v9594_v55, %v8282_v9 }
 0x379   : > { %v8217_v1 = vpop.permute.xlu1 %3123  ;;  %3180 = vst.msk [vmem:[#allocation3 + $0xd0] sm:$0xff] %vm3166_vm8, %v3118_v16  ;;  %2327 = vrot.lane.b32.xlu0 %v2256_v40, %s9505_s1 }
 0x37a   : > { %2812 = vrot.lane.b32.xlu1 %v2738_v41, %s9507_s5  ;;  %3332 = vst.msk [vmem:[#allocation3 + $0xd0] sm:$0xff] %vm3318_vm9, %v8113_v28 }
 0x37c   : > { %v2314_v39 = vpop.permute.xlu0 %2313 }
 0x37d   : > { %v8224_v63 = vpop.permute.xlu1 %2319  ;;  %2375 = vst.msk [vmem:[#allocation3 + $0xe0] sm:$0xff] %vm2360_vm5, %v2314_v39  ;;  %2479 = vrot.lane.b32.xlu0 %v2408_v26, %s9502_s2 }
 0x37e   : > { %3291 = vrot.lane.b32.xlu1 %v3217_v11, %s9503_s24  ;;  %v3601_v39 = vld [vmem:[#allocation3 + $0xf8] sm:$0xff] }
 0x380   : > { %v2466_v43 = vpop.permute.xlu0 %2465 }
 0x381   : > { %v8232_v48 = vpop.permute.xlu1 %2471  ;;  %v3786_v28 = vpop.f32.mrb[24].mxu1  ;;  %2527 = vst.msk [vmem:[#allocation3 + $0xe0] sm:$0xff] %vm2512_vm6, %v2466_v43  ;;  %1675 = vrot.lane.b32.xlu0 %v1603_v35, %s9504_s25  ;;  %v3596_v20 = vld [vmem:[#allocation3 + $0xd0] sm:$0xff] }
 0x382   : > { %4344 = vperm.xlu1 %6151, %v4334_v49   ;;  %v3788_v29 = vpop.f32.mrb[25].mxu1  ;;  %3850 = vmatmul.mubr.f32.gmra.mrb[50].mxu1 %v3596_v20 }
 0x383   : > { %5508 = vmatprep.mubr.msk.f32.mxu1 %vm728_vm0, %v3599_v60 }
 0x384   : > { %v2793_v12 = vpop.permute.xlu0 %2792 }
 0x385   : > { %v8243_v17 = vpop.permute.xlu1 %2798  ;;  %2854 = vst.msk [vmem:[#allocation3 + $0xe0] sm:$0xff] %vm2839_vm7, %v2793_v12  ;;  %3512 = vperm.xlu0 %6152, %v3393_v15   ;;  %v1757_v15 = vld [vmem:[#allocation2 + $0xc3] sm:$0xf] }
 0x386   : > { %4354 = vperm.xlu1 %6151, %v4336_v38   ;;  %3181 = vst.msk [vmem:[#allocation3 + $0xe0] sm:$0xff] %vm3166_vm8, %v8141_v3  ;;  %v4266_v3 = vld [vmem:[%s9353_s14 + $0x18] sm:$0xf]  ;;  %v1605_v38 = vld [vmem:[#allocation2 + $0xc2] sm:$0xf]  ;;  %v1932_v12 = vmul.f32 %v7351_v58, %v1757_v15  ;;  %v3065_v58 = vmul.f32 %v7412_v6, %v2890_v36 }
 0x388   : > { %v1989_v59 = vpop.permute.xlu0 %1988 }
 0x389   : > { %v8252_v8 = vpop.permute.xlu1 %1994  ;;  %2049 = vst.msk [vmem:[#allocation3 + $0xf0] sm:$0xff] %vm2033_vm3, %v1989_v59  ;;  %3133 = vrot.lane.b32.xlu0 %v3062_v30, %s9506_s3 }
 0x38a   : > { %4274 = vperm.xlu1 %6151, %v4264_v47   ;;  %2376 = vst.msk [vmem:[#allocation3 + $0xf0] sm:$0xff] %vm2360_vm5, %v8147_v51 }
 0x38b   : > { %2528 = vst.msk [vmem:[#allocation3 + $0xf0] sm:$0xff] %vm2512_vm6, %v8153_v24  ;;  %v3787_v24 = vadd.f32 %v8268_v22, %v3786_v28 }
 0x38c   : > { %2855 = vst.msk [vmem:[#allocation3 + $0xf0] sm:$0xff] %vm2839_vm7, %v8163_v2  ;;  %v1499_v31 = vpop.permute.xlu0 %1498 }
 0x38d   : > { %v1514_v33 = vpop.permute.xlu1 %1513  ;;  %v1549_v25 = vmul.f32 %v8036_v7, %v1499_v31  ;;  %3285 = vrot.lane.b32.xlu0 %v3214_v46, %s9503_s24  ;;  %v3910_v45 = vmax.f32 %v3787_v24, 0.0  ;;  %s9596_s24 = sld [smem:[#allocation105_spill]] }
 0x38e   : > { %v1552_v51 = vmul.f32 %v8034_v18, %v1514_v33  ;;  %4284 = vperm.xlu1 %6151, %v4266_v3   ;;  %v2411_v3 = vld [vmem:[#allocation2 + $0xd0] sm:$0xf] }
 0x38f   : > { %1574 = vst.msk [vmem:[#allocation3 + $0x120] sm:$0xff] %vm728_vm0, %v1549_v25 }
 0x390   : > { %1577 = vst.msk [vmem:[#allocation3 + $0x150] sm:$0xff] %vm728_vm0, %v1552_v51  ;;  %v3272_v53 = vpop.permute.xlu0 %3271  ;;  %v3791_v62 = vpop.f32.mrb[26].mxu1 }
 0x391   : > { %v8276_v2 = vpop.permute.xlu1 %3277  ;;  %3333 = vst.msk [vmem:[#allocation3 + $0xe0] sm:$0xff] %vm3318_vm9, %v3272_v53  ;;  %1677 = vrot.lane.b32.xlu0 %v1604_v4, %s9504_s25  ;;  %v3792_v18 = vadd.f32 %v8268_v22, %v3791_v62  ;;  %v3793_v7 = vpop.f32.mrb[27].mxu1  ;;  %v4335_v4 = vld [vmem:[%s9354_s15 + $0x10] sm:$0xff] }
 0x393   : > { %v3911_v34 = vmax.f32 %v3792_v18, 0.0  ;;  %v4263_v18 = vld [vmem:[%s9353_s14] sm:$0xff] }
 0x394   : > { %v1664_v50 = vpop.permute.xlu0 %1663 }
 0x395   : > { %v1670_v54 = vpop.permute.xlu1 %1669  ;;  %1723 = vst.msk [vmem:[#allocation3 + $0x100] sm:$0xff] %vm1706_vm2, %v1664_v50  ;;  %2004 = vrot.lane.b32.xlu0 %v1931_v44, %s9501_s0  ;;  %v5787_v56 = vpack.c.bf16 %v3911_v34, %v3910_v45 }
 0x396   : > { %1726 = vst.msk [vmem:[#allocation3 + $0x130] sm:$0xff] %vm1706_vm2, %v1670_v54 }
 0x397   : > { %2050 = vst.msk [vmem:[#allocation3 + $0x100] sm:$0xff] %vm2033_vm3, %v8170_v19  ;;  %5788 = vmatpush1.bf16.msra.mxu0 %v5787_v56  ;;  %v3394_v19 = vld [vmem:[%s9348_s9 + $0xc0] sm:$0xf] }
 0x398   : > { %v3483_v27 = vpop.permute.xlu0 %3482  ;;  %v3598_v40 = vld [vmem:[#allocation3 + $0xe0] sm:$0xff]  ;;  %5789 = vmatprep.subr.bf16.mxu0 %v9500_v52 }
 0x399   : > { %v3498_v41 = vpop.permute.xlu1 %3497  ;;  %v3537_v11 = vmul.f32 %v3483_v27, %v8015_v42  ;;  %2331 = vrot.lane.b32.xlu0 %v2258_v37, %s9505_s1  ;;  %3855 = vmatmul.mubr.f32.gmra.mrb[52].mxu1 %v3598_v40  ;;  %v2562_v42 = vld [vmem:[#allocation2 + $0xc9] sm:$0xff]  ;;  %s9597_s1 = sld [smem:[#allocation100_spill]] }
 0x39a   : > { %v3540_v16 = vmul.f32 %v3498_v41, %v8129_v57  ;;  %5509 = vmatprep.mubr.msk.f32.mxu1 %vm728_vm0, %v3601_v39  ;;  %v2737_v49 = vmul.f32 %v7337_v0, %v2562_v42  ;;  %v3603_v0 = vld [vmem:[#allocation3 + $0x108] sm:$0xff]  ;;  %v1380_v39 = vld [vmem:[#allocation2 + $0xc1] sm:$0xf] }
 0x39b   : > { %3562 = vst.msk [vmem:[#allocation3 + $0x118] sm:$0xff] %vm728_vm0, %v3537_v11 }
 0x39c   : > { %3565 = vst.msk [vmem:[#allocation3 + $0x148] sm:$0xff] %vm728_vm0, %v3540_v16  ;;  %v3122_v57 = vpop.permute.xlu0 %3121 }
 0x39d   : > { %v8301_v26 = vpop.permute.xlu1 %3127  ;;  %3182 = vst.msk [vmem:[#allocation3 + $0xf0] sm:$0xff] %vm3166_vm8, %v3122_v57  ;;  %3517 = vperm.xlu0 %6152, %v3394_v19  }
 0x39e   : > { %3334 = vst.msk [vmem:[#allocation3 + $0xf0] sm:$0xff] %vm3318_vm9, %v8189_v61 }
 0x3a0   : > { %v2318_v35 = vpop.permute.xlu0 %2317  ;;  %v3796_v28 = vpop.f32.mrb[28].mxu1 }
 0x3a1   : > { %v8307_v43 = vpop.permute.xlu1 %2323  ;;  %2377 = vst.msk [vmem:[#allocation3 + $0x100] sm:$0xff] %vm2360_vm5, %v2318_v35  ;;  %2810 = vrot.lane.b32.xlu0 %v2737_v49, %s9507_s5  ;;  %v3798_v20 = vpop.f32.mrb[29].mxu1  ;;  %v3797_v33 = vadd.f32 %v8268_v22, %v3796_v28  ;;  %s689_s5 = sand.u32 1, %s6207_s28  }
 0x3a2   : > { %v3605_v56 = vld [vmem:[#allocation3 + $0x118] sm:$0xff]  ;;  %s690_s27 = scalar_lea.vmem [#allocation4], %s689_s5 }
 0x3a3   : > { %s5393_s30 = sshll.u32 %s690_s27, 4  ;;  %s9299_s30 = int_to_ptr.vmem [resolvable:$true] %s5393_s30 }
 0x3a4   : > { %v2470_v60 = vpop.permute.xlu0 %2469 }
 0x3a5   : > { %v8311_v29 = vpop.permute.xlu1 %2475  ;;  %2529 = vst.msk [vmem:[#allocation3 + $0x100] sm:$0xff] %vm2512_vm6, %v2470_v60  ;;  %1679 = vrot.lane.b32.xlu0 %v1605_v38, %s9504_s25  ;;  %v3600_v61 = vld [vmem:[#allocation3 + $0xf0] sm:$0xff]  ;;  %s5381_s25 = scalar_lea.sflag [#allocation5], %s689_s5 }
 0x3a6   : > { %3860 = vmatmul.mubr.f32.gmra.mrb[54].mxu1 %v3600_v61 }
 0x3a7   : > { %5510 = vmatprep.mubr.msk.f32.mxu1 %vm728_vm0, %v3603_v0 }
 0x3a8   : > { %v2797_v47 = vpop.permute.xlu0 %2796 }
 0x3a9   : > { %v8317_v14 = vpop.permute.xlu1 %2802  ;;  %2856 = vst.msk [vmem:[#allocation3 + $0x100] sm:$0xff] %vm2839_vm7, %v2797_v47  ;;  %2006 = vrot.lane.b32.xlu0 %v1932_v12, %s9501_s0  ;;  %s9297_s0 = scalar_lea.hbm %s9361_s22, %s5544_s8 }
 0x3aa   : > { %3183 = vst.msk [vmem:[#allocation3 + $0x100] sm:$0xff] %vm3166_vm8, %v8217_v1 }
 0x3ac   : > { %v1993_v59 = vpop.permute.xlu0 %1992 }
 0x3ad   : > { %v8323_v30 = vpop.permute.xlu1 %1998  ;;  %2051 = vst.msk [vmem:[#allocation3 + $0x110] sm:$0xff] %vm2033_vm3, %v1993_v59  ;;  %2485 = vrot.lane.b32.xlu0 %v2411_v3, %s9502_s2  ;;  %s5547_s2 = sshll.u32 %s6475_s29, 5 }
 0x3ae   : > { %2378 = vst.msk [vmem:[#allocation3 + $0x110] sm:$0xff] %vm2360_vm5, %v8224_v63 }
 0x3af   : > { %2530 = vst.msk [vmem:[#allocation3 + $0x110] sm:$0xff] %vm2512_vm6, %v8232_v48  ;;  %v4333_v48 = vld [vmem:[%s9354_s15] sm:$0xff] }
 0x3b0   : > { %2857 = vst.msk [vmem:[#allocation3 + $0x110] sm:$0xff] %vm2839_vm7, %v8243_v17  ;;  %v1509_v31 = vpop.permute.xlu0 %1508  ;;  %v3801_v51 = vpop.f32.mrb[30].mxu1  ;;  %v3912_v17 = vmax.f32 %v3797_v33, 0.0 }
 0x3b1   : > { %v1524_v1 = vpop.permute.xlu1 %1523  ;;  %v1551_v25 = vmul.f32 %v8117_v23, %v1509_v31  ;;  %3139 = vrot.lane.b32.xlu0 %v3065_v58, %s9506_s3  ;;  %v3802_v63 = vadd.f32 %v8268_v22, %v3801_v51  ;;  %v3803_v6 = vpop.f32.mrb[31].mxu1  ;;  %v3611_v31 = vld [vmem:[#allocation3 + $0x148] sm:$0xff]  ;;  %s8500_s3 = scalar_lea.vmem %s9597_s1, %s5547_s2  ;;  %s6153_s1 = scalar_lea.vmem %s9299_s30, 16 }
 0x3b2   : > { %v1554_v46 = vmul.f32 %v8115_v21, %v1524_v1  ;;  %p6154_p11 = scmp.ne.s32.totalorder %s9299_s30, %s6153_s1 }
 0x3b3   : > { %1576 = vst.msk [vmem:[#allocation3 + $0x140] sm:$0xff] %vm728_vm0, %v1551_v25  ;;  %v3913_v24 = vmax.f32 %v3802_v63, 0.0 }
 0x3b4   : > { %1579 = vst.msk [vmem:[#allocation3 + $0x170] sm:$0xff] %vm728_vm0, %v1554_v46  ;;  %v3276_v21 = vpop.permute.xlu0 %3275  ;;  %p6155_p12 = pnand %p6154_p11, %p6385_p5 }
 0x3b5   : > { %v8344_v53 = vpop.permute.xlu1 %3281  ;;  %3335 = vst.msk [vmem:[#allocation3 + $0x100] sm:$0xff] %vm3318_vm9, %v3276_v21  ;;  %4339 = vperm.xlu0 %6152, %v4333_v48   ;;  %v5790_v23 = vpack.c.bf16 %v3913_v24, %v3912_v17 }
 0x3b6   : > { %p6156_p13 = pneg %p6155_p12 }
 0x3b7   : > { %5791 = vmatpush1.bf16.msra.mxu0 %v5790_v23 }
 0x3b8   : > { %v1668_v62 = vpop.permute.xlu0 %1667  ;;  %5792 = vmatprep.subr.bf16.mxu0 %v9500_v52 }
 0x3b9   : > { %v1674_v13 = vpop.permute.xlu1 %1673  ;;  %1725 = vst.msk [vmem:[#allocation3 + $0x120] sm:$0xff] %vm1706_vm2, %v1668_v62  ;;  %4349 = vperm.xlu0 %6152, %v4335_v4  }
 0x3ba   : > { %1728 = vst.msk [vmem:[#allocation3 + $0x150] sm:$0xff] %vm1706_vm2, %v1674_v13 }
 0x3bb   : > { %2052 = vst.msk [vmem:[#allocation3 + $0x120] sm:$0xff] %vm2033_vm3, %v8252_v8  ;;  %v4265_v8 = vld [vmem:[%s9353_s14 + $0x10] sm:$0xff] }
 0x3bc   : > { %v3493_v44 = vpop.permute.xlu0 %3492  ;;  %v3602_v45 = vld [vmem:[#allocation3 + $0x100] sm:$0xff]  ;;  %v3806_v54 = vpop.f32.mrb[32].mxu1 }
 0x3bd   : > { %v3508_v7 = vpop.permute.xlu1 %3507  ;;  %v3539_v50 = vmul.f32 %v3493_v44, %v8206_v10  ;;  %4269 = vperm.xlu0 %6152, %v4263_v18   ;;  %3865 = vmatmul.mubr.f32.gmra.mrb[56].mxu1 %v3602_v45  ;;  %v3808_v55 = vpop.f32.mrb[33].mxu1  ;;  %v3807_v40 = vadd.f32 %v8268_v22, %v3806_v54 }
 0x3be   : > { %v3542_v34 = vmul.f32 %v3508_v7, %v3367_v32  ;;  %5511 = vmatprep.mubr.msk.f32.mxu1 %vm728_vm0, %v3605_v56 }
 0x3bf   : > { %3564 = vst.msk [vmem:[#allocation3 + $0x138] sm:$0xff] %vm728_vm0, %v3539_v50  ;;  %v3914_v28 = vmax.f32 %v3807_v40, 0.0 }
 0x3c0   : > { %3567 = vst.msk [vmem:[#allocation3 + $0x168] sm:$0xff] %vm728_vm0, %v3542_v34  ;;  %v3126_v41 = vpop.permute.xlu0 %3125  ;;  %v3368_v34 = vld [vmem:[#allocation2 + $0xd7] sm:$0xff] }
 0x3c1   : > { %v8365_v37 = vpop.permute.xlu1 %3131  ;;  %3184 = vst.msk [vmem:[#allocation3 + $0x110] sm:$0xff] %vm3166_vm8, %v3126_v41  ;;  %4279 = vperm.xlu0 %6152, %v4265_v8  }
 0x3c2   : > { %3336 = vst.msk [vmem:[#allocation3 + $0x110] sm:$0xff] %vm3318_vm9, %v8276_v2  ;;  %v3607_v2 = vld [vmem:[#allocation3 + $0x128] sm:$0xff] }
 0x3c4   : > { %v2322_v27 = vpop.permute.xlu0 %2321 }
 0x3c5   : > { %v8370_v10 = vpop.permute.xlu1 %3283  ;;  %2379 = vst.msk [vmem:[#allocation3 + $0x120] sm:$0xff] %vm2360_vm5, %v2322_v27 }
 0x3c7   : > { %v3811_v16 = vpop.f32.mrb[34].mxu1 }
 0x3c8   : > { %v3812_v11 = vadd.f32 %v8268_v22, %v3811_v16  ;;  %v3813_v57 = vpop.f32.mrb[35].mxu1  ;;  %v2474_v49 = vpop.permute.xlu0 %2473 }
 0x3c9   : > { %v1529_v19 = vpop.permute.xlu1 %1528  ;;  %v3604_v35 = vld [vmem:[#allocation3 + $0x110] sm:$0xff]  ;;  %2531 = vst.msk [vmem:[#allocation3 + $0x120] sm:$0xff] %vm2512_vm6, %v2474_v49  ;;  %v3615_v49 = vld [vmem:[#allocation3 + $0x168] sm:$0xff] }
 0x3ca   : > { %v1555_v42 = vmul.f32 %v1529_v19, %v1380_v39  ;;  %v3915_v20 = vmax.f32 %v3812_v11, 0.0  ;;  %3870 = vmatmul.mubr.f32.gmra.mrb[58].mxu1 %v3604_v35 }
 0x3cb   : > { %5512 = vmatprep.mubr.msk.f32.mxu1 %vm728_vm0, %v3607_v2 }
 0x3cc   : > { %1580 = vst.msk [vmem:[#allocation3 + $0x180] sm:$0xf] %vm1329_vm4, %v1555_v42  ;;  %v5793_v60 = vpack.c.bf16 %v3915_v20, %v3914_v28  ;;  %v2801_v38 = vpop.permute.xlu0 %2800 }
 0x3cd   : > { %2858 = vst.msk [vmem:[#allocation3 + $0x120] sm:$0xff] %vm2839_vm7, %v2801_v38 }
 0x3ce   : > { %5794 = vmatpush1.bf16.msra.mxu0 %v5793_v60  ;;  %3185 = vst.msk [vmem:[#allocation3 + $0x120] sm:$0xff] %vm3166_vm8, %v8301_v26 }
 0x3cf   : > { %5795 = vmatprep.subr.bf16.mxu0 %v9500_v52 }
 0x3d0   : > { %v1997_v15 = vpop.permute.xlu0 %1996 }
 0x3d1   : > { %2053 = vst.msk [vmem:[#allocation3 + $0x130] sm:$0xff] %vm2033_vm3, %v1997_v15  ;;  %v3369_v15 = vld [vmem:[#allocation2 + $0xdf] sm:$0xf] }
 0x3d2   : > { %2380 = vst.msk [vmem:[#allocation3 + $0x130] sm:$0xff] %vm2360_vm5, %v8307_v43 }
 0x3d3   : > { %2532 = vst.msk [vmem:[#allocation3 + $0x130] sm:$0xff] %vm2512_vm6, %v8311_v29  ;;  %v2807_v29 = vpop.permute.xlu1 %2806 }
 0x3d4   : > { %2859 = vst.msk [vmem:[#allocation3 + $0x130] sm:$0xff] %vm2839_vm7, %v8317_v14  ;;  %v1519_v61 = vpop.permute.xlu0 %1518  ;;  %v3609_v14 = vld [vmem:[#allocation3 + $0x138] sm:$0xff] }
 0x3d5   : > { %v1553_v0 = vmul.f32 %v8191_v5, %v1519_v61 }
 0x3d7   : > { %1578 = vst.msk [vmem:[#allocation3 + $0x160] sm:$0xff] %vm728_vm0, %v1553_v0  ;;  %v2003_v59 = vpop.permute.xlu1 %2002 }
 0x3d8   : > { %v3280_v26 = vpop.permute.xlu0 %3279 }
 0x3d9   : > { %3337 = vst.msk [vmem:[#allocation3 + $0x120] sm:$0xff] %vm3318_vm9, %v3280_v26 }
 0x3dc   : > { %v1672_v12 = vpop.permute.xlu0 %1671 }
 0x3dd   : > { %1727 = vst.msk [vmem:[#allocation3 + $0x140] sm:$0xff] %vm1706_vm2, %v1672_v12 }
 0x3de   : > { %2054 = vst.msk [vmem:[#allocation3 + $0x140] sm:$0xff] %vm2033_vm3, %v8323_v30 }
 0x3e0   : > { %v3503_v43 = vpop.permute.xlu0 %3502  ;;  %v3606_v47 = vld [vmem:[#allocation3 + $0x120] sm:$0xff] }
 0x3e1   : > { %v3541_v36 = vmul.f32 %v3503_v43, %v8282_v9  ;;  %3875 = vmatmul.mubr.f32.gmra.mrb[60].mxu1 %v3606_v47  ;;  %v2330_v9 = vpop.permute.xlu1 %2329 }
 0x3e2   : > { %5513 = vmatprep.mubr.msk.f32.mxu1 %vm728_vm0, %v3609_v14 }
 0x3e3   : > { %3566 = vst.msk [vmem:[#allocation3 + $0x158] sm:$0xff] %vm728_vm0, %v3541_v36 }
 0x3e4   : > { %v3130_v5 = vpop.permute.xlu0 %3129 }
 0x3e5   : > { %3186 = vst.msk [vmem:[#allocation3 + $0x130] sm:$0xff] %vm3166_vm8, %v3130_v5  ;;  %v2482_v51 = vpop.permute.xlu1 %2481 }
 0x3e6   : > { %3338 = vst.msk [vmem:[#allocation3 + $0x130] sm:$0xff] %vm3318_vm9, %v8344_v53 }
 0x3e8   : > { %v3816_v3 = vpop.f32.mrb[36].mxu1  ;;  %v2326_v30 = vpop.permute.xlu0 %2325 }
 0x3e9   : > { %2381 = vst.msk [vmem:[#allocation3 + $0x140] sm:$0xff] %vm2360_vm5, %v2326_v30  ;;  %v3818_v58 = vpop.f32.mrb[37].mxu1  ;;  %v2809_v6 = vpop.permute.xlu1 %2808  ;;  %v3817_v17 = vadd.f32 %v8268_v22, %v3816_v3 }
 0x3ea   : > { %v3613_v24 = vld [vmem:[#allocation3 + $0x158] sm:$0xff] }
 0x3eb   : > { %v3916_v62 = vmax.f32 %v3817_v17, 0.0 }
 0x3ec   : > { %v2478_v33 = vpop.permute.xlu0 %2477 }
 0x3ed   : > { %2533 = vst.msk [vmem:[#allocation3 + $0x140] sm:$0xff] %vm2512_vm6, %v2478_v33  ;;  %v3608_v1 = vld [vmem:[#allocation3 + $0x130] sm:$0xff]  ;;  %v3136_v13 = vpop.permute.xlu1 %3135 }
 0x3ee   : > { %3880 = vmatmul.mubr.f32.gmra.mrb[62].mxu1 %v3608_v1 }
 0x3ef   : > { %5514 = vmatprep.mubr.msk.f32.mxu1 %vm728_vm0, %v3611_v31 }
 0x3f0   : > { %v2805_v46 = vpop.permute.xlu0 %2804 }
 0x3f1   : > { %2860 = vst.msk [vmem:[#allocation3 + $0x140] sm:$0xff] %vm2839_vm7, %v2805_v46  ;;  %v3288_v56 = vpop.permute.xlu1 %3287 }
 0x3f2   : > { %3187 = vst.msk [vmem:[#allocation3 + $0x140] sm:$0xff] %vm3166_vm8, %v8365_v37 }
 0x3f3   : > { %3339 = vst.msk [vmem:[#allocation3 + $0x140] sm:$0xff] %vm3318_vm9, %v8370_v10 }
 0x3f4   : > { %v2001_v25 = vpop.permute.xlu0 %2000 }
 0x3f5   : > { %2055 = vst.msk [vmem:[#allocation3 + $0x150] sm:$0xff] %vm2033_vm3, %v2001_v25  ;;  %v2484_v16 = vpop.permute.xlu1 %2483 }
 0x3f8   : > { %v2328_v63 = vpop.permute.xlu0 %2327 }
 0x3f9   : > { %2382 = vst.msk [vmem:[#allocation3 + $0x150] sm:$0xff] %vm2360_vm5, %v2328_v63  ;;  %v3138_v60 = vpop.permute.xlu1 %3137  ;;  %v9595_v63 = vmov 0.0  }
 0x3fa   : > { %v3610_v48 = vld [vmem:[#allocation3 + $0x140] sm:$0xff] }
 0x3fb   : > { %3885 = vmatmul.mubr.f32.gmra.mrb[64].mxu1 %v3610_v48 }
 0x3fc   : > { %v3821_v53 = vpop.f32.mrb[38].mxu1  ;;  %5515 = vmatprep.mubr.msk.f32.mxu1 %vm728_vm0, %v3613_v24  ;;  %v2480_v21 = vpop.permute.xlu0 %2479 }
 0x3fd   : > { %v3822_v23 = vadd.f32 %v8268_v22, %v3821_v53  ;;  %2534 = vst.msk [vmem:[#allocation3 + $0x150] sm:$0xff] %vm2512_vm6, %v2480_v21  ;;  %v3823_v4 = vpop.f32.mrb[39].mxu1  ;;  %v3290_v26 = vpop.permute.xlu1 %3289 }
 0x3fe   : > { %2861 = vst.msk [vmem:[#allocation3 + $0x150] sm:$0xff] %vm2839_vm7, %v2807_v29 }
 0x3ff   : > { %v3917_v18 = vmax.f32 %v3822_v23, 0.0 }
 0x400   : > { %v3826_v7 = vpop.f32.mrb[40].mxu1  ;;  %v1676_v32 = vpop.permute.xlu0 %1675 }
 0x401   : > { %v5796_v44 = vpack.c.bf16 %v3917_v18, %v3916_v62  ;;  %1729 = vst.msk [vmem:[#allocation3 + $0x160] sm:$0xff] %vm1706_vm2, %v1676_v32  ;;  %v3828_v45 = vpop.f32.mrb[41].mxu1  ;;  %v3827_v37 = vadd.f32 %v8268_v22, %v3826_v7  ;;  %v2334_v47 = vpop.permute.xlu1 %2333 }
 0x402   : > { %2056 = vst.msk [vmem:[#allocation3 + $0x160] sm:$0xff] %vm2033_vm3, %v2003_v59 }
 0x403   : > { %2383 = vst.msk [vmem:[#allocation3 + $0x160] sm:$0xff] %vm2360_vm5, %v2330_v9  ;;  %5797 = vmatpush1.bf16.msra.mxu0 %v5796_v44  ;;  %v3918_v11 = vmax.f32 %v3827_v37, 0.0 }
 0x404   : > { %2535 = vst.msk [vmem:[#allocation3 + $0x160] sm:$0xff] %vm2512_vm6, %v2482_v51  ;;  %v3513_v54 = vpop.permute.xlu0 %3512  ;;  %5798 = vmatprep.subr.bf16.mxu0 %v9500_v52 }
 0x405   : > { %2862 = vst.msk [vmem:[#allocation3 + $0x160] sm:$0xff] %vm2839_vm7, %v2809_v6  ;;  %v3543_v50 = vmul.f32 %v3513_v54, %v3368_v34  ;;  %v2813_v14 = vpop.permute.xlu1 %2812 }
 0x406   : > { %3189 = vst.msk [vmem:[#allocation3 + $0x160] sm:$0xff] %vm3166_vm8, %v3136_v13 }
 0x407   : > { %3341 = vst.msk [vmem:[#allocation3 + $0x160] sm:$0xff] %vm3318_vm9, %v3288_v56 }
 0x408   : > { %3568 = vst.msk [vmem:[#allocation3 + $0x178] sm:$0xff] %vm728_vm0, %v3543_v50  ;;  %v3134_v55 = vpop.permute.xlu0 %3133 }
 0x409   : > { %3188 = vst.msk [vmem:[#allocation3 + $0x150] sm:$0xff] %vm3166_vm8, %v3134_v55  ;;  %v3292_v33 = vpop.permute.xlu1 %3291 }
 0x40c   : > { %v3286_v8 = vpop.permute.xlu0 %3285 }
 0x40d   : > { %3340 = vst.msk [vmem:[#allocation3 + $0x150] sm:$0xff] %vm3318_vm9, %v3286_v8  ;;  %v6228_v8 = vmov 0.0051020407  }
 0x40e   : > { %v3614_v2 = vld [vmem:[#allocation3 + $0x160] sm:$0xff] }
 0x40f   : > { %v3617_v38 = vld [vmem:[#allocation3 + $0x178] sm:$0xff] }
 0x410   : > { %v1678_v10 = vpop.permute.xlu0 %1677 }
 0x411   : > { %v3831_v41 = vpop.f32.mrb[42].mxu1  ;;  %1730 = vst.msk [vmem:[#allocation3 + $0x170] sm:$0xff] %vm1706_vm2, %v1678_v10  ;;  %vm3343_vm2 = vcmask 1044352  }
 0x412   : > { %v3832_v27 = vadd.f32 %v8268_v22, %v3831_v41  ;;  %v3833_v40 = vpop.f32.mrb[43].mxu1 }
 0x414   : > { %v3919_v39 = vmax.f32 %v3832_v27, 0.0  ;;  %v2005_v19 = vpop.permute.xlu0 %2004  ;;  %v3612_v57 = vld [vmem:[#allocation3 + $0x150] sm:$0xff] }
 0x415   : > { %2057 = vst.msk [vmem:[#allocation3 + $0x170] sm:$0xff] %vm2033_vm3, %v2005_v19  ;;  %3890 = vmatmul.mubr.f32.gmra.mrb[66].mxu1 %v3612_v57  ;;  %vm3939_vm3 = vcmask 1043456  }
 0x416   : > { %v5799_v42 = vpack.c.bf16 %v3919_v39, %v3918_v11  ;;  %5516 = vmatprep.mubr.msk.f32.mxu1 %vm728_vm0, %v3615_v49 }
 0x417   : > { %v3836_v35 = vpop.f32.mrb[44].mxu1 }
 0x418   : > { %5800 = vmatpush1.bf16.msra.mxu0 %v5799_v42  ;;  %v3838_v28 = vpop.f32.mrb[45].mxu1  ;;  %v2332_v20 = vpop.permute.xlu0 %2331  ;;  %v3837_v3 = vadd.f32 %v8268_v22, %v3836_v35 }
 0x419   : > { %5801 = vmatprep.subr.bf16.mxu0 %v9500_v52  ;;  %2384 = vst.msk [vmem:[#allocation3 + $0x170] sm:$0xff] %vm2360_vm5, %v2332_v20  ;;  %3895 = vmatmul.mubr.f32.gmra.mrb[68].mxu1 %v3614_v2  ;;  %vm4103_vm5 = vcmask 1045504  }
 0x41a   : > { %2536 = vst.msk [vmem:[#allocation3 + $0x170] sm:$0xff] %vm2512_vm6, %v2484_v16  ;;  %5517 = vmatprep.mubr.msk.f32.mxu1 %vm728_vm0, %v3617_v38  ;;  %v3920_v31 = vmax.f32 %v3837_v3, 0.0  ;;  %vm4099_vm6 = vcmask 48128  }
 0x41c   : > { %v3518_v61 = vpop.permute.xlu0 %3517 }
 0x41d   : > { %v3544_v0 = vmul.f32 %v3518_v61, %v3369_v15 }
 0x41f   : > { %3569 = vst.msk [vmem:[#allocation3 + $0x188] sm:$0xf] %vm1329_vm4, %v3544_v0  ;;  %vm4018_vm4 = vcmask 261120  }
 0x420   : > { %v2811_v12 = vpop.permute.xlu0 %2810 }
 0x421   : > { %2863 = vst.msk [vmem:[#allocation3 + $0x170] sm:$0xff] %vm2839_vm7, %v2811_v12  ;;  %vm4403_vm7 = vcmask 228352  }
 0x422   : > { %3190 = vst.msk [vmem:[#allocation3 + $0x170] sm:$0xff] %vm3166_vm8, %v3138_v60 }
 0x423   : > { %3342 = vst.msk [vmem:[#allocation3 + $0x170] sm:$0xff] %vm3318_vm9, %v3290_v26 }
 0x424   : > { %v1680_v43 = vpop.permute.xlu0 %1679 }
 0x425   : > { %1732 = vst.msk [vmem:[#allocation3 + $0x180] sm:$0xf] %vm1731_vm10, %v1680_v43 }
 0x426   : > { %v3619_v5 = vld [vmem:[#allocation3 + $0x188] sm:$0xf] }
 0x428   : > { %v2007_v29 = vpop.permute.xlu0 %2006 }
 0x429   : > { %2059 = vst.msk [vmem:[#allocation3 + $0x180] sm:$0xf] %vm2058_vm11, %v2007_v29 }
 0x42a   : > { %v3616_v36 = vld [vmem:[#allocation3 + $0x170] sm:$0xff]  ;;  %2386 = vst.msk [vmem:[#allocation3 + $0x180] sm:$0xf] %vm2385_vm12, %v2334_v47 }
 0x42b   : > { %3900 = vmatmul.mubr.f32.gmra.mrb[70].mxu1 %v3616_v36 }
 0x42c   : > { %5518 = vmatprep.mubr.msk.f32.mxu1 %vm728_vm0, %v3619_v5  ;;  %v2486_v59 = vpop.permute.xlu0 %2485  ;;  %vm3935_vm0 = vcmask 556032  }
 0x42d   : > { %2538 = vst.msk [vmem:[#allocation3 + $0x180] sm:$0xf] %vm2537_vm13, %v2486_v59  ;;  %5520 = vmatprep.mubr.msk.f32.mxu0 %vm3935_vm0, %v6228_v8 }
 0x42e   : > { %2865 = vst.msk [vmem:[#allocation3 + $0x180] sm:$0xf] %vm2864_vm14, %v2813_v14 }
 0x430   : > { %v3140_v30 = vpop.permute.xlu0 %3139 }
 0x431   : > { %v3841_v58 = vpop.f32.mrb[46].mxu1  ;;  %3192 = vst.msk [vmem:[#allocation3 + $0x180] sm:$0xf] %vm3191_vm15, %v3140_v30 }
 0x432   : > { %v3842_v9 = vadd.f32 %v8268_v22, %v3841_v58  ;;  %v3843_v1 = vpop.f32.mrb[47].mxu1  ;;  %3344 = vst.msk [vmem:[#allocation3 + $0x180] sm:$0xf] %vm3343_vm2, %v3292_v33  ;;  %vm6229_vm2 = vmmov 1  }
 0x433   : > { %v4013_v1 = vld [vmem:[%s9596_s24] sm:$0xff]  ;;  %vm8520_vm0 = vmpackc.low %vm3939_vm3, %vm6229_vm2 }
 0x434   : > { %v3921_v46 = vmax.f32 %v3842_v9, 0.0 }
 0x436   : > { %v5802_v51 = vpack.c.bf16 %v3921_v46, %v3920_v31  ;;  %v4014_v31 = vld [vmem:[%s9596_s24 + $0x8] sm:$0xff] }
 0x438   : > { %5803 = vmatpush1.bf16.msra.mxu0 %v5802_v51 }
 0x439   : > { %5804 = vmatprep.subr.bf16.mxu0 %v9500_v52  ;;  %v3618_v25 = vld [vmem:[#allocation3 + $0x180] sm:$0xf] }
 0x43a   : > { %3905 = vmatmul.mubr.f32.gmra.mrb[72].mxu1 %v3618_v25 }
 0x43b   : > { %4745 = vmatprep.mubr.f32.mxu1 %v9595_v63 }
 0x448   : > { %v3846_v6 = vpop.f32.mrb[48].mxu1 }
 0x449   : > { %v3848_v48 = vpop.f32.mrb[49].mxu1  ;;  %v3847_v17 = vadd.f32 %v8268_v22, %v3846_v6  ;;  %v5823_v6 = vpack.c.bf16 %v4014_v31, %v4013_v1  ;;  %v4584_v1 = vld [vmem:[%s9355_s16] sm:$0xff] }
 0x44a   : > { %v4015_v48 = vld [vmem:[%s9596_s24 + $0x10] sm:$0xff] }
 0x44b   : > { %v3922_v23 = vmax.f32 %v3847_v17, 0.0  ;;  %v4016_v17 = vld [vmem:[%s9596_s24 + $0x18] sm:$0xff] }
 0x455   : > { %v3851_v24 = vpop.f32.mrb[50].mxu1 }
 0x456   : > { %v3852_v53 = vadd.f32 %v8268_v22, %v3851_v24  ;;  %v3853_v21 = vpop.f32.mrb[51].mxu1  ;;  %v5826_v24 = vpack.c.bf16 %v4016_v17, %v4015_v48  ;;  %v4594_v17 = vld [vmem:[%s9355_s16 + $0x50] sm:$0xff] }
 0x457   : > { %v4098_v21 = vld [vmem:[%s9349_s10] sm:$0x3f] }
 0x458   : > { %v3923_v4 = vmax.f32 %v3852_v53, 0.0 }
 0x45a   : > { %v5805_v13 = vpack.c.bf16 %v3923_v4, %v3922_v23  ;;  %v4017_v23 = vld [vmem:[%s9346_s7] sm:$0x1] }
 0x45c   : > { %5806 = vmatpush1.bf16.msra.mxu0 %v5805_v13 }
 0x45d   : > { %5807 = vmatprep.subr.bf16.mxu0 %v9500_v52 }
 0x46c   : > { %v3856_v62 = vpop.f32.mrb[52].mxu1 }
 0x46d   : > { %v3858_v18 = vpop.f32.mrb[53].mxu1  ;;  %v3857_v7 = vadd.f32 %v8268_v22, %v3856_v62 }
 0x46f   : > { %v3924_v34 = vmax.f32 %v3857_v7, 0.0  ;;  %v4177_v7 = vld [vmem:[%s9350_s11] sm:$0x3f] }
 0x479   : > { %v3861_v32 = vpop.f32.mrb[54].mxu1 }
 0x47a   : > { %v3862_v44 = vadd.f32 %v8268_v22, %v3861_v32  ;;  %v3863_v45 = vpop.f32.mrb[55].mxu1  ;;  %v4094_v32 = vld [vmem:[%s8500_s3] sm:$0xff] }
 0x47b   : > { %v4288_v45 = vlaneseq }
 0x47c   : > { %v3925_v54 = vmax.f32 %v3862_v44, 0.0  ;;  %v4255_v44 = vld [vmem:[%s9352_s13] sm:$0x1] }
 0x47e   : > { %v5808_v50 = vpack.c.bf16 %v3925_v54, %v3924_v34  ;;  %v4256_v34 = vmul.f32 0.5, %v4255_v44  ;;  %v8507_v54 = vshrl.u32 %v4288_v45, 7  ;;  %v4614_v44 = vld [vmem:[%s9355_s16 + $0xf0] sm:$0xff]  ;;  %v4619_v45 = vld [vmem:[%s9355_s16 + $0x118] sm:$0xff] }
 0x480   : > { %5809 = vmatpush1.bf16.msra.mxu0 %v5808_v50 }
 0x481   : > { %5810 = vmatprep.subr.bf16.mxu0 %v9500_v52 }
 0x490   : > { %v3866_v56 = vpop.f32.mrb[56].mxu1 }
 0x491   : > { %v3868_v55 = vpop.f32.mrb[57].mxu1  ;;  %v3867_v37 = vadd.f32 %v8268_v22, %v3866_v56 }
 0x493   : > { %v3926_v40 = vmax.f32 %v3867_v37, 0.0  ;;  %v8510_v37 = vsub.s32 0, %v8507_v54 }
 0x49d   : > { %v3871_v41 = vpop.f32.mrb[58].mxu1 }
 0x49e   : > { %v3872_v10 = vadd.f32 %v8268_v22, %v3871_v41  ;;  %v3873_v27 = vpop.f32.mrb[59].mxu1 }
 0x4a0   : > { %v3927_v16 = vmax.f32 %v3872_v10, 0.0  ;;  %v4340_v10 = vpop.permute.xlu0 %4339 }
 0x4a2   : > { %v5811_v11 = vpack.c.bf16 %v3927_v16, %v3926_v40  ;;  %v4345_v16 = vpop.permute.xlu1 %4344 }
 0x4a4   : > { %5812 = vmatpush1.bf16.msra.mxu0 %v5811_v11 }
 0x4a5   : > { %5813 = vmatprep.subr.bf16.mxu0 %v9500_v52 }
 0x4b4   : > { %v3876_v39 = vpop.f32.mrb[60].mxu1 }
 0x4b5   : > { %v3878_v19 = vpop.f32.mrb[61].mxu1  ;;  %v3877_v57 = vadd.f32 %v8268_v22, %v3876_v39 }
 0x4b7   : > { %v3928_v28 = vmax.f32 %v3877_v57, 0.0 }
 0x4c1   : > { %v3881_v42 = vpop.f32.mrb[62].mxu1 }
 0x4c2   : > { %v3882_v49 = vadd.f32 %v8268_v22, %v3881_v42  ;;  %v3883_v35 = vpop.f32.mrb[63].mxu1 }
 0x4c3   : > { %v4350_v35 = vpop.permute.xlu0 %4349 }
 0x4c4   : > { %v3929_v20 = vmax.f32 %v3882_v49, 0.0 }
 0x4c6   : > { %v5814_v2 = vpack.c.bf16 %v3929_v20, %v3928_v28  ;;  %v4355_v20 = vpop.permute.xlu1 %4354 }
 0x4c8   : > { %5815 = vmatpush1.bf16.msra.mxu0 %v5814_v2 }
 0x4c9   : > { %5816 = vmatprep.subr.bf16.mxu0 %v9500_v52 }
 0x4ce   : > { %v3886_v60 = vpop.f32.mrb[64].mxu1 }
 0x4cf   : > { %v3888_v38 = vpop.f32.mrb[65].mxu1  ;;  %v3887_v15 = vadd.f32 %v8268_v22, %v3886_v60 }
 0x4d1   : > { %v3930_v12 = vmax.f32 %v3887_v15, 0.0 }
 0x4e8   : > { %v3891_v61 = vpop.f32.mrb[66].mxu1 }
 0x4e9   : > { %v3892_v0 = vadd.f32 %v8268_v22, %v3891_v61  ;;  %v3893_v26 = vpop.f32.mrb[67].mxu1 }
 0x4eb   : > { %v3931_v43 = vmax.f32 %v3892_v0, 0.0 }
 0x4ec   : > { %v3896_v47 = vpop.f32.mrb[68].mxu1 }
 0x4ed   : > { %v5817_v29 = vpack.c.bf16 %v3931_v43, %v3930_v12  ;;  %v3898_v36 = vpop.f32.mrb[69].mxu1  ;;  %v3897_v14 = vadd.f32 %v8268_v22, %v3896_v47 }
 0x4ef   : > { %5818 = vmatpush1.bf16.msra.mxu0 %v5817_v29  ;;  %v3932_v30 = vmax.f32 %v3897_v14, 0.0 }
 0x4f0   : > { %5819 = vmatprep.subr.bf16.mxu0 %v9500_v52 }
 0x4fe   : > { %v3901_v5 = vpop.f32.mrb[70].mxu1 }
 0x4ff   : > { %v3902_v59 = vadd.f32 %v8268_v22, %v3901_v5  ;;  %v3903_v3 = vpop.f32.mrb[71].mxu1  ;;  %v4901_v5 = vld [vmem:[%s9357_s18 + $0x18] sm:$0xff] }
 0x500   : > { %v4095_v3 = vld [vmem:[%s8500_s3 + $0x8] sm:$0xff] }
 0x501   : > { %v3933_v58 = vmax.f32 %v3902_v59, 0.0 }
 0x503   : > { %v5820_v33 = vpack.c.bf16 %v3933_v58, %v3932_v30  ;;  %v4096_v30 = vld [vmem:[%s8500_s3 + $0x10] sm:$0xff]  ;;  %v4097_v58 = vld [vmem:[%s8500_s3 + $0x18] sm:$0xf]  ;;  %s6157_s3 = sshll.u32 %s6231_s4, 4  ;;  %s6158_s3 = int_to_ptr.vmem [resolvable:$false] %s6157_s3 }
 0x504   : > { %s6159_s26 = scalar_lea.vmem %s6158_s3, 32  ;;  %p6160_p0 = scmp.lt.s32.totalorder %s9299_s30, %s6158_s3 }
 0x505   : > { %5821 = vmatpush1.bf16.msra.mxu0 %v5820_v33  ;;  %v4585_v33 = vld [vmem:[%s9355_s16 + $0x8] sm:$0xff]  ;;  %p6161_p1 = scmp.lt.s32.totalorder %s6159_s26, %s6153_s1 }
 0x506   : > { %3991 = vmatprep.subr.mxu0 %v9595_v63 }
 0x507   : > { %p6162_p2 = por %p6161_p1, %p6160_p0 }
 0x509   : > { %p6163_p3 = pnand %p6162_p2, %p6156_p13 }
 0x50d   : > { %v3906_v9 = vpop.f32.mrb[72].mxu1 }
 0x50e   : > { %v3907_v46 = vadd.f32 %v8268_v22, %v3906_v9  ;;  %v3908_v51 = vpop.f32.mrb[73].mxu1  ;;  %v4590_v9 = vld [vmem:[%s9355_s16 + $0x30] sm:$0xff] }
 0x50f   : > { %v5845_v31 = vpack.c.bf16 %v4590_v9, %v4585_v33  ;;  %v4595_v51 = vld [vmem:[%s9355_s16 + $0x58] sm:$0xff] }
 0x510   : > { %v3934_v25 = vmax.f32 %v3907_v46, 0.0  ;;  %v4589_v46 = vld [vmem:[%s9355_s16 + $0x28] sm:$0xff] }
 0x511   : > { %5846 = vmatprep.subr.bf16.mxu1 %v5845_v31 }
 0x512   : > { %5519 = vmatpush1.msk.msra.mxu0 %vm3939_vm3, %v3934_v25  ;;  %v4600_v25 = vld [vmem:[%s9355_s16 + $0x80] sm:$0xff]  ;;  %vm4665_vm3 = vcmask 1042432  }
 0x513   : > { %4008 = vmatmul.mubr.f32.vlgmr.msra.gmra.mrb[26].mxu0 %v6228_v8  ;;  %5822 = vmatprep.subr.bf16.mxu0 %v9500_v52  ;;  %v5849_v48 = vpack.c.bf16 %v4600_v25, %v4595_v51 }
 0x514   : > { %5824 = vmatpush3.bf16.msra.mxu0 %v5823_v6  ;;  %5695 = vmatprep.mubr.msk.f32.mxu0 %vm6220_vm1, %v9595_v63  ;;  %v5847_v6 = vpack.c.bf16 %v4589_v46, %v4584_v1 }
 0x515   : > { %5825 = vmatprep.subr.bf16.mxu0 %v9500_v52 }
 0x516   : > { %5848 = vmatpush1.bf16.msra.mxu1 %v5847_v6 }
 0x517   : > { %5850 = vmatprep.subr.bf16.mxu1 %v5849_v48 }
 0x518   : > { %5827 = vmatpush3.bf16.msra.mxu0 %v5826_v24  ;;  %v4599_v24 = vld [vmem:[%s9355_s16 + $0x78] sm:$0xff] }
 0x519   : > { %5698 = vmatprep.subr.mxu0 %v9595_v63 }
 0x5e6   : > { %v4009_v22 = vpop.f32.mrb[26].mxu0 }
 0x5e7   : > { %5696 = vmatmul.mubr.msk.f32.vlgmr.msra.gmra.mrb[28].mxu0 %vm4018_vm4, %v4009_v22  ;;  %v4011_v53 = vpop.f32.mrb[27].mxu0  ;;  %v4605_v22 = vld [vmem:[%s9355_s16 + $0xa8] sm:$0xff]  ;;  %vm8598_vm4 = vmpackc.low %vm4665_vm3, %vm6229_vm2 }
 0x5e8   : > { %5700 = vmatprep.mubr.msk.f32.mxu0 %vm6220_vm1, %v9595_v63  ;;  %5699 = vmatpush3.msk.msra.mxu0 %vm4103_vm5, %v4098_v21  ;;  %v4610_v53 = vld [vmem:[%s9355_s16 + $0xd0] sm:$0xff]  ;;  %v5851_v21 = vpack.c.bf16 %v4599_v24, %v4594_v17  ;;  %v6230_v24 = vmov 1.0  }
 0x5e9   : > { %5703 = vmatprep.subr.mxu0 %v9595_v63 }
 0x5ea   : > { %5852 = vmatpush1.bf16.msra.mxu1 %v5851_v21 }
 0x6ba   : > { %v4088_v4 = vpop.f32.mrb[28].mxu0 }
 0x6bb   : > { %v4089_v13 = vadd.f32 %v4088_v4, %v4017_v23  ;;  %v5697_v62 = vpop.f32.mrb[29].mxu0  ;;  %v5853_v23 = vpack.c.bf16 %v4610_v53, %v4605_v22  ;;  %v4604_v4 = vld [vmem:[%s9355_s16 + $0xa0] sm:$0xff]  ;;  %v4587_v22 = vld [vmem:[%s9355_s16 + $0x18] sm:$0xff] }
 0x6bc   : > { %v4615_v62 = vld [vmem:[%s9355_s16 + $0xf8] sm:$0xff]  ;;  %v4592_v53 = vld [vmem:[%s9355_s16 + $0x40] sm:$0xff] }
 0x6bd   : > { %v5522_v18 = vclamps-f32 %v4089_v13, 1.0  ;;  %v4609_v13 = vld [vmem:[%s9355_s16 + $0xc8] sm:$0xff]  ;;  %5854 = vmatprep.subr.bf16.mxu1 %v5853_v23  ;;  %v5867_v21 = vpack.c.bf16 %v4592_v53, %v4587_v22  ;;  %v4934_v53 = vld [vmem:[%s9357_s18 + $0x120] sm:$0xff] }
 0x6be   : > { %v4899_v23 = vld [vmem:[%s9357_s18 + $0x8] sm:$0xff] }
 0x6bf   : > { %5701 = vmatmul.mubr.msk.f32.vlgmr.msra.gmra.mrb[30].mxu0 %vm4099_vm6, %v5522_v18 }
 0x6c0   : > { %5704 = vmatpush3.msk.msra.mxu0 %vm4103_vm5, %v4177_v7  ;;  %5705 = vmatprep.mubr.msk.f32.mxu0 %vm6220_vm1, %v9595_v63  ;;  %v5855_v7 = vpack.c.bf16 %v4609_v13, %v4604_v4  ;;  %v4898_v4 = vld [vmem:[%s9357_s18] sm:$0xff]  ;;  %v5905_v13 = vpack.c.bf16 %v4901_v5, %v4899_v23  ;;  %v4939_v23 = vld [vmem:[%s9357_s18 + $0x148] sm:$0xff]  ;;  %v4941_v5 = vld [vmem:[%s9357_s18 + $0x158] sm:$0xff] }
 0x6c2   : > { %5856 = vmatpush1.bf16.msra.mxu1 %v5855_v7  ;;  %v4905_v7 = vld [vmem:[%s9357_s18 + $0x38] sm:$0xff] }
 0x6c3   : > { %5706 = vmatmul.mubr.msk.f32.vlgmr.msra.gmra.mrb[32].mxu0 %vm4099_vm6, %v5522_v18  ;;  %v4620_v18 = vld [vmem:[%s9355_s16 + $0x120] sm:$0xff] }
 0x6c4   : > { %5716 = vmatprep.mubr.msk.f32.mxu0 %vm4403_vm7, %v4094_v32  ;;  %v5857_v32 = vpack.c.bf16 %v4620_v18, %v4615_v62  ;;  %v4900_v62 = vld [vmem:[%s9357_s18 + $0x10] sm:$0xff]  ;;  %v4903_v18 = vld [vmem:[%s9357_s18 + $0x28] sm:$0xff] }
 0x6c6   : > { %5858 = vmatprep.subr.bf16.mxu1 %v5857_v32  ;;  %v5907_v32 = vpack.c.bf16 %v4900_v62, %v4898_v4  ;;  %v4938_v62 = vld [vmem:[%s9357_s18 + $0x140] sm:$0xff] }
 0x792   : > { %v4173_v50 = vpop.f32.mrb[30].mxu0 }
 0x793   : > { %v4257_v56 = vadd.f32 %v4256_v34, %v4173_v50  ;;  %v5702_v55 = vpop.f32.mrb[31].mxu0  ;;  %v4625_v34 = vld [vmem:[%s9355_s16 + $0x148] sm:$0xff]  ;;  %v4630_v50 = vld [vmem:[%s9355_s16 + $0x170] sm:$0x7] }
 0x794   : > { %v5861_v55 = vpack.c.bf16 %v4630_v50, %v4625_v34  ;;  %v4904_v34 = vld [vmem:[%s9357_s18 + $0x30] sm:$0xff]  ;;  %v4907_v50 = vld [vmem:[%s9357_s18 + $0x48] sm:$0xff] }
 0x795   : > { %v4258_v8 = vmul.f32 13.5, %v4257_v56  ;;  %v5859_v56 = vpack.c.bf16 %v4619_v45, %v4614_v44  ;;  %v5909_v44 = vpack.c.bf16 %v4905_v7, %v4903_v18  ;;  %v4902_v45 = vld [vmem:[%s9357_s18 + $0x20] sm:$0xff]  ;;  %v4940_v18 = vld [vmem:[%s9357_s18 + $0x150] sm:$0xff]  ;;  %v4943_v7 = vld [vmem:[%s9357_s18 + $0x168] sm:$0xff] }
 0x796   : > { %v8512_v41 = vpop.f32.mrb[32].mxu0 }
 0x797   : > { %v4261_v27 = vfloor.f32 %v4258_v8  ;;  %v5707_v40 = vpop.f32.mrb[33].mxu0  ;;  %5860 = vmatpush1.bf16.msra.mxu1 %v5859_v56  ;;  %v4909_v56 = vld [vmem:[%s9357_s18 + $0x58] sm:$0xff] }
 0x798   : > { %5863 = vmatprep.subr.msk.bf16.mxu1 %vm8598_vm4, %v5861_v55  ;;  %v5911_v55 = vpack.c.bf16 %v4904_v34, %v4902_v45  ;;  %v4942_v34 = vld [vmem:[%s9357_s18 + $0x160] sm:$0xff] }
 0x799   : > { %v4262_v11 = vsub.f32 %v4258_v8, %v4261_v27  ;;  %v4361_v39 = vrot.slane %v4261_v27, %v8510_v37  ;;  %v4378_v19 = vadd.f32 1.0, %v4261_v27  ;;  %v4624_v8 = vld [vmem:[%s9355_s16 + $0x140] sm:$0xff]  ;;  %v4960_v27 = vld [vmem:[%s9357_s18 + $0x1f0] sm:$0xff] }
 0x79b   : > { %v4367_v57 = vsub.f32 1.0, %v4262_v11  ;;  %v4383_v42 = vrot.slane %v4378_v19, %v8510_v37  ;;  %v4393_v49 = vrot.slane %v4262_v11, %v8510_v37  ;;  %vm4363_vm8 = vcmp.eq.f32.partialorder %v4340_v10, %v4361_v39 }
 0x79c   : > { %vm4364_vm9 = vcmp.eq.f32.partialorder %v4345_v16, %v4361_v39  ;;  %vm4365_vm12 = vcmp.eq.f32.partialorder %v4350_v35, %v4361_v39  ;;  %vm4366_vm13 = vcmp.eq.f32.partialorder %v4355_v20, %v4361_v39 }
 0x79d   : > { %v4372_v28 = vrot.slane %v4367_v57, %v8510_v37  ;;  %vm4385_vm10 = vcmp.eq.f32.partialorder %v4340_v10, %v4383_v42  ;;  %vm4386_vm11 = vcmp.eq.f32.partialorder %v4345_v16, %v4383_v42  ;;  %vm4387_vm14 = vcmp.eq.f32.partialorder %v4350_v35, %v4383_v42  ;;  %v4629_v10 = vld [vmem:[%s9355_s16 + $0x168] sm:$0x7]  ;;  %v4251_v16 = vld [vmem:[%s9351_s12] sm:$0x1] }
 0x79e   : > { %vm4388_vm15 = vcmp.eq.f32.partialorder %v4355_v20, %v4383_v42  ;;  %v4395_v38 = vsel %vm4385_vm10, %v4393_v49, 0.0  ;;  %v4396_v15 = vsel %vm4386_vm11, %v4393_v49, 0.0  ;;  %v4397_v43 = vsel %vm4387_vm14, %v4393_v49, 0.0  ;;  %v4275_v20 = vpop.permute.xlu1 %4274 }
 0x79f   : > { %v4374_v2 = vsel %vm4363_vm8, %v4372_v28, 0.0  ;;  %v4375_v60 = vsel %vm4364_vm9, %v4372_v28, 0.0  ;;  %v4376_v61 = vsel %vm4365_vm12, %v4372_v28, 0.0  ;;  %v4377_v12 = vsel %vm4366_vm13, %v4372_v28, 0.0 }
 0x7a0   : > { %v4399_v0 = vadd.f32 %v4395_v38, %v4374_v2  ;;  %v4400_v26 = vadd.f32 %v4396_v15, %v4375_v60  ;;  %v4398_v47 = vsel %vm4388_vm15, %v4393_v49, 0.0  ;;  %v4401_v36 = vadd.f32 %v4397_v43, %v4376_v61  ;;  %v4270_v2 = vpop.permute.xlu0 %4269 }
 0x7a1   : > { %v4402_v14 = vadd.f32 %v4398_v47, %v4377_v12  ;;  %v5864_v40 = vpack.c.bf16 %v4629_v10, %v4624_v8  ;;  %v4252_v11 = vmul.f32 0.5, %v4251_v16  ;;  %v5913_v8 = vpack.c.bf16 %v4909_v56, %v4907_v50  ;;  %v4906_v10 = vld [vmem:[%s9357_s18 + $0x40] sm:$0xff]  ;;  %v4911_v16 = vld [vmem:[%s9357_s18 + $0x68] sm:$0xff]  ;;  %v4944_v50 = vld [vmem:[%s9357_s18 + $0x170] sm:$0xff] }
 0x7a2   : > { %v5828_v29 = vpack.c.bf16 %v4400_v26, %v4399_v0  ;;  %v4285_v61 = vpop.permute.xlu1 %4284  ;;  %v4947_v56 = vld [vmem:[%s9357_s18 + $0x188] sm:$0xff]  ;;  %vm5304_vm14 = vcmask 523264   ;;  %vm5378_vm15 = vcmask 73728  }
 0x7a3   : > { %v5832_v59 = vpack.c.bf16 %v4402_v14, %v4401_v36  ;;  %5866 = vmatpush1.bf16.msk.msra.mxu1 %vm8598_vm4, %v5864_v40  ;;  %v4253_v39 = vadd.f32 %v4252_v11, %v8512_v41  ;;  %v4908_v40 = vld [vmem:[%s9357_s18 + $0x50] sm:$0xff]  ;;  %v4913_v11 = vld [vmem:[%s9357_s18 + $0x78] sm:$0xff] }
 0x7a4   : > { %5829 = vmatprep.subr.bf16.mxu0 %v5828_v29  ;;  %v4280_v26 = vpop.permute.xlu0 %4279  ;;  %5868 = vmatprep.subr.bf16.mxu1 %v5867_v21  ;;  %v4936_v21 = vld [vmem:[%s9357_s18 + $0x130] sm:$0xff] }
 0x7a5   : > { %5831 = vmatpush3.bf16.msra.mxu0 %v5828_v29  ;;  %v4254_v19 = vmul.f32 13.5, %v4253_v39  ;;  %v5915_v39 = vpack.c.bf16 %v4908_v40, %v4906_v10  ;;  %v5943_v4 = vpack.c.bf16 %v4936_v21, %v4934_v53  ;;  %v4946_v40 = vld [vmem:[%s9357_s18 + $0x180] sm:$0xff]  ;;  %v4626_v53 = vld [vmem:[%s9355_s16 + $0x150] sm:$0xff]  ;;  %v4631_v21 = vld [vmem:[%s9355_s16 + $0x178] sm:$0x7] }
 0x7a6   : > { %5834 = vmatprep.subr.msk.bf16.mxu0 %vm8520_vm0, %v5832_v59 }
 0x7a7   : > { %v4259_v57 = vfloor.f32 %v4254_v19 }
 0x7a9   : > { %5837 = vmatpush3.bf16.msk.msra.mxu0 %vm8520_vm0, %v5832_v59  ;;  %v4260_v42 = vsub.f32 %v4254_v19, %v4259_v57  ;;  %v4308_v49 = vadd.f32 1.0, %v4259_v57  ;;  %v4291_v60 = vrot.slane %v4259_v57, %v8510_v37  ;;  %v5917_v19 = vpack.c.bf16 %v4913_v11, %v4911_v16  ;;  %v4910_v57 = vld [vmem:[%s9357_s18 + $0x60] sm:$0xff]  ;;  %v4948_v16 = vld [vmem:[%s9357_s18 + $0x190] sm:$0xff]  ;;  %v4951_v11 = vld [vmem:[%s9357_s18 + $0x1a8] sm:$0xff] }
 0x7aa   : > { %5838 = vmatprep.subr.bf16.mxu0 %v9500_v52 }
 0x7ab   : > { %v4297_v35 = vsub.f32 1.0, %v4260_v42  ;;  %v4313_v28 = vrot.slane %v4308_v49, %v8510_v37  ;;  %v4323_v15 = vrot.slane %v4260_v42, %v8510_v37  ;;  %vm4294_vm8 = vcmp.eq.f32.partialorder %v4275_v20, %v4291_v60  ;;  %v4912_v42 = vld [vmem:[%s9357_s18 + $0x70] sm:$0xff]  ;;  %v4915_v49 = vld [vmem:[%s9357_s18 + $0x88] sm:$0xff] }
 0x7ac   : > { %5717 = vmatmul.mubr.msk.f32.vlgmr.msra.gmra.mrb[34].mxu0 %vm4403_vm7, %v4095_v3  ;;  %vm4293_vm9 = vcmp.eq.f32.partialorder %v4270_v2, %v4291_v60  ;;  %vm4296_vm12 = vcmp.eq.f32.partialorder %v4285_v61, %v4291_v60  ;;  %vm4295_vm13 = vcmp.eq.f32.partialorder %v4280_v26, %v4291_v60  ;;  %v4916_v60 = vld [vmem:[%s9357_s18 + $0x90] sm:$0xff] }
 0x7ad   : > { %5719 = vmatprep.mubr.msk.f32.mxu0 %vm4403_vm7, %v4096_v30  ;;  %v4302_v38 = vrot.slane %v4297_v35, %v8510_v37  ;;  %vm4316_vm5 = vcmp.eq.f32.partialorder %v4275_v20, %v4313_v28  ;;  %vm4315_vm6 = vcmp.eq.f32.partialorder %v4270_v2, %v4313_v28  ;;  %vm4318_vm10 = vcmp.eq.f32.partialorder %v4285_v61, %v4313_v28  ;;  %v4917_v35 = vld [vmem:[%s9357_s18 + $0x98] sm:$0xff]  ;;  %v4914_v2 = vld [vmem:[%s9357_s18 + $0x80] sm:$0xff] }
 0x7ae   : > { %v4326_v0 = vsel %vm4316_vm5, %v4323_v15, 0.0  ;;  %v4325_v43 = vsel %vm4315_vm6, %v4323_v15, 0.0  ;;  %vm4317_vm11 = vcmp.eq.f32.partialorder %v4280_v26, %v4313_v28  ;;  %v4328_v59 = vsel %vm4318_vm10, %v4323_v15, 0.0  ;;  %v4920_v26 = vld [vmem:[%s9357_s18 + $0xb0] sm:$0xff] }
 0x7af   : > { %v4305_v41 = vsel %vm4294_vm8, %v4302_v38, 0.0  ;;  %v4304_v12 = vsel %vm4293_vm9, %v4302_v38, 0.0  ;;  %v4307_v14 = vsel %vm4296_vm12, %v4302_v38, 0.0  ;;  %v4327_v33 = vsel %vm4317_vm11, %v4323_v15, 0.0  ;;  %v4921_v15 = vld [vmem:[%s9357_s18 + $0xb8] sm:$0xff] }
 0x7b0   : > { %5720 = vmatmul.mubr.msk.f32.gmra.mrb[36].mxu0 %vm4403_vm7, %v4097_v58  ;;  %v4330_v47 = vadd.f32 %v4326_v0, %v4305_v41  ;;  %v4329_v36 = vadd.f32 %v4325_v43, %v4304_v12  ;;  %v4306_v58 = vsel %vm4295_vm13, %v4302_v38, 0.0  ;;  %v4332_v1 = vadd.f32 %v4328_v59, %v4307_v14  ;;  %v4919_v38 = vld [vmem:[%s9357_s18 + $0xa8] sm:$0xff]  ;;  %v4918_v0 = vld [vmem:[%s9357_s18 + $0xa0] sm:$0xff]  ;;  %v4925_v43 = vld [vmem:[%s9357_s18 + $0xd8] sm:$0xff] }
 0x7b1   : > { %5730 = vmatprep.mubr.msk.f32.mxu0 %vm6220_vm1, %v9595_v63  ;;  %v4331_v51 = vadd.f32 %v4327_v33, %v4306_v58  ;;  %v5919_v28 = vpack.c.bf16 %v4912_v42, %v4910_v57  ;;  %v5921_v20 = vpack.c.bf16 %v4917_v35, %v4915_v49  ;;  %v5923_v61 = vpack.c.bf16 %v4916_v60, %v4914_v2  ;;  %v4923_v12 = vld [vmem:[%s9357_s18 + $0xc8] sm:$0xff]  ;;  %v4924_v14 = vld [vmem:[%s9357_s18 + $0xd0] sm:$0xff]  ;;  %v4926_v33 = vld [vmem:[%s9357_s18 + $0xe0] sm:$0xff] }
 0x7b2   : > { %v5925_v41 = vpack.c.bf16 %v4921_v15, %v4919_v38  ;;  %v4927_v59 = vld [vmem:[%s9357_s18 + $0xe8] sm:$0xff]  ;;  %v4950_v42 = vld [vmem:[%s9357_s18 + $0x1a0] sm:$0xff]  ;;  %v4952_v49 = vld [vmem:[%s9357_s18 + $0x1b0] sm:$0xff] }
 0x7b3   : > { %v4955_v35 = vld [vmem:[%s9357_s18 + $0x1c8] sm:$0xff]  ;;  %v4954_v60 = vld [vmem:[%s9357_s18 + $0x1c0] sm:$0xff]  ;;  %v4956_v38 = vld [vmem:[%s9357_s18 + $0x1d0] sm:$0xff] }
 0x7b4   : > { %v5963_v15 = vpack.c.bf16 %v4956_v38, %v4954_v60  ;;  %v5282_v60 = vld [vmem:[%s9359_s20 + $0x18] sm:$0xff] }
 0x87f   : > { %v5718_v29 = vpop.f32.mrb[34].mxu0 }
 0x880   : > { %v4505_v3 = vmul.f32 %v5718_v29, %v4330_v47  ;;  %v4485_v30 = vpop.f32.mrb[35].mxu0  ;;  %v5927_v47 = vpack.c.bf16 %v4920_v26, %v4918_v0  ;;  %v5929_v29 = vpack.c.bf16 %v4925_v43, %v4923_v12  ;;  %v4597_v0 = vld [vmem:[%s9355_s16 + $0x68] sm:$0xff]  ;;  %v4602_v26 = vld [vmem:[%s9355_s16 + $0x90] sm:$0xff] }
 0x881   : > { %v4504_v9 = vmul.f32 %v4485_v30, %v4329_v36  ;;  %v4922_v36 = vld [vmem:[%s9357_s18 + $0xc0] sm:$0xff]  ;;  %v5871_v43 = vpack.c.bf16 %v4602_v26, %v4597_v0  ;;  %v5285_v0 = vld [vmem:[%s9359_s20 + $0x30] sm:$0xff]  ;;  %v5286_v26 = vld [vmem:[%s9359_s20 + $0x38] sm:$0xff] }
 0x882   : > { %v5931_v30 = vpack.c.bf16 %v4924_v14, %v4922_v36  ;;  %v4607_v14 = vld [vmem:[%s9355_s16 + $0xb8] sm:$0xff] }
 0x883   : > { %v5839_v31 = vpack.c.bf16 %v4505_v3, %v4504_v9  ;;  %v5721_v46 = vpop.f32.mrb[36].mxu0  ;;  %v4929_v3 = vld [vmem:[%s9357_s18 + $0xf8] sm:$0xff]  ;;  %v4928_v9 = vld [vmem:[%s9357_s18 + $0xf0] sm:$0xff] }
 0x884   : > { %v4507_v25 = vmul.f32 %v5721_v46, %v4332_v1  ;;  %v4495_v6 = vpop.f32.mrb[37].mxu0  ;;  %v5933_v58 = vpack.c.bf16 %v4929_v3, %v4927_v59  ;;  %v4931_v1 = vld [vmem:[%s9357_s18 + $0x108] sm:$0xff]  ;;  %v5935_v46 = vpack.c.bf16 %v4928_v9, %v4926_v33  ;;  %v4612_v59 = vld [vmem:[%s9355_s16 + $0xe0] sm:$0xff]  ;;  %v4606_v33 = vld [vmem:[%s9355_s16 + $0xb0] sm:$0xff] }
 0x885   : > { %v4506_v48 = vmul.f32 %v4495_v6, %v4331_v51  ;;  %5840 = vmatpush3.bf16.msra.mxu0 %v5839_v31  ;;  %v4933_v31 = vld [vmem:[%s9357_s18 + $0x118] sm:$0xff]  ;;  %v4932_v6 = vld [vmem:[%s9357_s18 + $0x110] sm:$0xff] }
 0x886   : > { %5841 = vmatprep.subr.bf16.mxu0 %v9500_v52  ;;  %v5937_v51 = vpack.c.bf16 %v4933_v31, %v4931_v1  ;;  %v4611_v9 = vld [vmem:[%s9355_s16 + $0xd8] sm:$0xff]  ;;  %v4617_v1 = vld [vmem:[%s9355_s16 + $0x108] sm:$0xff]  ;;  %v4622_v31 = vld [vmem:[%s9355_s16 + $0x130] sm:$0xff] }
 0x887   : > { %v5842_v17 = vpack.c.bf16 %v4507_v25, %v4506_v48  ;;  %v4930_v25 = vld [vmem:[%s9357_s18 + $0x100] sm:$0xff]  ;;  %v4935_v48 = vld [vmem:[%s9357_s18 + $0x128] sm:$0xff] }
 0x889   : > { %5844 = vmatpush3.bf16.msk.msra.mxu0 %vm8520_vm0, %v5842_v17  ;;  %v4937_v17 = vld [vmem:[%s9357_s18 + $0x138] sm:$0xff] }
 0x88a   : > { %5906 = vmatprep.subr.bf16.mxu0 %v5905_v13  ;;  %v5941_v22 = vpack.c.bf16 %v4937_v17, %v4935_v48  ;;  %v5945_v13 = vpack.c.bf16 %v4941_v5, %v4939_v23  ;;  %v4627_v48 = vld [vmem:[%s9355_s16 + $0x158] sm:$0xff]  ;;  %v4632_v17 = vld [vmem:[%s9355_s16 + $0x180] sm:$0x7]  ;;  %v5886_v23 = vpack.c.bf16 %v4631_v21, %v4626_v53 }
 0x88b   : > { %v4588_v5 = vld [vmem:[%s9355_s16 + $0x20] sm:$0xff] }
 0x88c   : > { %5731 = vmatmul.mubr.msk.f32.vlgmr.msra.gmra.mrb[38].mxu0 %vm4403_vm7, %v6230_v24  ;;  %v5939_v24 = vpack.c.bf16 %v4932_v6, %v4930_v25  ;;  %vm4661_vm7 = vcmask 613376   ;;  %v4616_v25 = vld [vmem:[%s9355_s16 + $0x100] sm:$0xff]  ;;  %v4621_v6 = vld [vmem:[%s9355_s16 + $0x128] sm:$0xff] }
 0x88d   : > { %5908 = vmatpush1.bf16.msra.mxu0 %v5907_v32  ;;  %v4945_v32 = vld [vmem:[%s9357_s18 + $0x178] sm:$0xff] }
 0x88e   : > { %5910 = vmatprep.subr.bf16.mxu0 %v5909_v44  ;;  %v5947_v44 = vpack.c.bf16 %v4940_v18, %v4938_v62  ;;  %v5949_v45 = vpack.c.bf16 %v4945_v32, %v4943_v7  ;;  %v4598_v62 = vld [vmem:[%s9355_s16 + $0x70] sm:$0xff]  ;;  %v4603_v18 = vld [vmem:[%s9355_s16 + $0x98] sm:$0xff]  ;;  %v4608_v32 = vld [vmem:[%s9355_s16 + $0xc0] sm:$0xff] }
 0x88f   : > { %v5893_v7 = vpack.c.bf16 %v4603_v18, %v4598_v62  ;;  %v4967_v18 = vld [vmem:[%s9357_s18 + $0x228] sm:$0xff] }
 0x891   : > { %5912 = vmatpush1.bf16.msra.mxu0 %v5911_v55  ;;  %v4949_v55 = vld [vmem:[%s9357_s18 + $0x198] sm:$0xff] }
 0x892   : > { %5914 = vmatprep.subr.bf16.mxu0 %v5913_v8  ;;  %v5951_v8 = vpack.c.bf16 %v4944_v50, %v4942_v34  ;;  %v5953_v10 = vpack.c.bf16 %v4949_v55, %v4947_v56  ;;  %v4618_v34 = vld [vmem:[%s9355_s16 + $0x110] sm:$0xff]  ;;  %v4623_v50 = vld [vmem:[%s9355_s16 + $0x138] sm:$0xff]  ;;  %v4628_v55 = vld [vmem:[%s9355_s16 + $0x160] sm:$0xff] }
 0x893   : > { %v5899_v56 = vpack.c.bf16 %v4623_v50, %v4618_v34  ;;  %v4966_v50 = vld [vmem:[%s9357_s18 + $0x220] sm:$0xff] }
 0x895   : > { %5916 = vmatpush1.bf16.msra.mxu0 %v5915_v39  ;;  %v4953_v39 = vld [vmem:[%s9357_s18 + $0x1b8] sm:$0xff] }
 0x896   : > { %5918 = vmatprep.subr.bf16.mxu0 %v5917_v19  ;;  %v5955_v19 = vpack.c.bf16 %v4948_v16, %v4946_v40  ;;  %v5957_v57 = vpack.c.bf16 %v4953_v39, %v4951_v11  ;;  %v4959_v40 = vld [vmem:[%s9357_s18 + $0x1e8] sm:$0xff]  ;;  %v4961_v16 = vld [vmem:[%s9357_s18 + $0x1f8] sm:$0xff]  ;;  %v4958_v11 = vld [vmem:[%s9357_s18 + $0x1e0] sm:$0xff] }
 0x897   : > { %v5965_v39 = vpack.c.bf16 %v4961_v16, %v4959_v40  ;;  %v4970_v16 = vld [vmem:[%s9357_s18 + $0x240] sm:$0xff] }
 0x899   : > { %5920 = vmatpush1.bf16.msra.mxu0 %v5919_v28  ;;  %v4957_v28 = vld [vmem:[%s9357_s18 + $0x1d8] sm:$0xff] }
 0x89a   : > { %5922 = vmatprep.subr.bf16.mxu0 %v5921_v20  ;;  %v5959_v20 = vpack.c.bf16 %v4952_v49, %v4950_v42  ;;  %v5961_v2 = vpack.c.bf16 %v4957_v28, %v4955_v35  ;;  %v4965_v42 = vld [vmem:[%s9357_s18 + $0x218] sm:$0xff]  ;;  %v5279_v35 = vld [vmem:[%s9359_s20] sm:$0xff]  ;;  %v5280_v28 = vld [vmem:[%s9359_s20 + $0x8] sm:$0xff] }
 0x89d   : > { %5924 = vmatpush1.bf16.msra.mxu0 %v5923_v61  ;;  %v4586_v61 = vld [vmem:[%s9355_s16 + $0x10] sm:$0xff] }
 0x89e   : > { %5926 = vmatprep.subr.bf16.mxu0 %v5925_v41  ;;  %v4591_v41 = vld [vmem:[%s9355_s16 + $0x38] sm:$0xff] }
 0x89f   : > { %v5869_v12 = vpack.c.bf16 %v4591_v41, %v4586_v61  ;;  %v5284_v61 = vld [vmem:[%s9359_s20 + $0x28] sm:$0xff] }
 0x8a1   : > { %5928 = vmatpush1.bf16.msra.mxu0 %v5927_v47  ;;  %v4596_v47 = vld [vmem:[%s9355_s16 + $0x60] sm:$0xff] }
 0x8a2   : > { %5930 = vmatprep.subr.bf16.mxu0 %v5929_v29  ;;  %v4601_v29 = vld [vmem:[%s9355_s16 + $0x88] sm:$0xff] }
 0x8a5   : > { %5932 = vmatpush1.bf16.msra.mxu0 %v5931_v30  ;;  %v5873_v30 = vpack.c.bf16 %v4601_v29, %v4596_v47  ;;  %v5288_v47 = vld [vmem:[%s9359_s20 + $0x48] sm:$0xff] }
 0x8a6   : > { %5934 = vmatprep.subr.bf16.mxu0 %v5933_v58  ;;  %v5875_v58 = vpack.c.bf16 %v4612_v59, %v4607_v14  ;;  %v5290_v14 = vld [vmem:[%s9359_s20 + $0x58] sm:$0xff] }
 0x8a9   : > { %5936 = vmatpush1.bf16.msra.mxu0 %v5935_v46  ;;  %v5877_v46 = vpack.c.bf16 %v4611_v9, %v4606_v33  ;;  %v5293_v33 = vld [vmem:[%s9359_s20 + $0x70] sm:$0xff]  ;;  %v5294_v9 = vld [vmem:[%s9359_s20 + $0x78] sm:$0xff] }
 0x8aa   : > { %5938 = vmatprep.subr.bf16.mxu0 %v5937_v51  ;;  %v5879_v51 = vpack.c.bf16 %v4622_v31, %v4617_v1  ;;  %v6075_v1 = vpack.c.bf16 %v5294_v9, %v5293_v33  ;;  %v5295_v31 = vld [vmem:[%s9359_s20 + $0x80] sm:$0xff] }
 0x8ab   : > { %v4986_v9 = vld [vmem:[%s9357_s18 + $0x2c0] sm:$0xff] }
 0x8ad   : > { %5940 = vmatpush1.bf16.msra.mxu0 %v5939_v24  ;;  %v5881_v24 = vpack.c.bf16 %v4621_v6, %v4616_v25  ;;  %v4642_v25 = vsub.s32 1, %v8507_v54 }
 0x8ae   : > { %5942 = vmatprep.subr.bf16.mxu0 %v5941_v22  ;;  %v5883_v22 = vpack.c.bf16 %v4632_v17, %v4627_v48  ;;  %v5297_v17 = vld [vmem:[%s9359_s20 + $0x90] sm:$0xff] }
 0x8b1   : > { %5944 = vmatpush1.bf16.msra.mxu0 %v5943_v4  ;;  %v4593_v4 = vld [vmem:[%s9355_s16 + $0x48] sm:$0xff] }
 0x8b2   : > { %5946 = vmatprep.subr.bf16.mxu0 %v5945_v13  ;;  %v5890_v13 = vpack.c.bf16 %v4593_v4, %v4588_v5  ;;  %v4962_v4 = vld [vmem:[%s9357_s18 + $0x200] sm:$0xff] }
 0x8b5   : > { %5948 = vmatpush1.bf16.msra.mxu0 %v5947_v44  ;;  %v4613_v44 = vld [vmem:[%s9355_s16 + $0xe8] sm:$0xff] }
 0x8b6   : > { %5950 = vmatprep.subr.bf16.mxu0 %v5949_v45  ;;  %v5896_v45 = vpack.c.bf16 %v4613_v44, %v4608_v32 }
 0x8b9   : > { %5952 = vmatpush1.bf16.msra.mxu0 %v5951_v8  ;;  %v4633_v8 = vld [vmem:[%s9355_s16 + $0x188] sm:$0x7] }
 0x8ba   : > { %5954 = vmatprep.subr.bf16.mxu0 %v5953_v10  ;;  %v5902_v10 = vpack.c.bf16 %v4633_v8, %v4628_v55  ;;  %v4971_v55 = vld [vmem:[%s9357_s18 + $0x248] sm:$0xff]  ;;  %v4973_v8 = vld [vmem:[%s9357_s18 + $0x258] sm:$0xff] }
 0x8bb   : > { %v5977_v40 = vpack.c.bf16 %v4973_v8, %v4971_v55 }
 0x8bd   : > { %5956 = vmatpush1.bf16.msra.mxu0 %v5955_v19  ;;  %v5967_v19 = vpack.c.bf16 %v4960_v27, %v4958_v11  ;;  %v4972_v11 = vld [vmem:[%s9357_s18 + $0x250] sm:$0xff]  ;;  %v4977_v27 = vld [vmem:[%s9357_s18 + $0x278] sm:$0xff] }
 0x8be   : > { %5958 = vmatprep.subr.bf16.mxu0 %v5957_v57  ;;  %v4963_v57 = vld [vmem:[%s9357_s18 + $0x208] sm:$0xff] }
 0x8bf   : > { %v5969_v49 = vpack.c.bf16 %v4965_v42, %v4963_v57  ;;  %v4974_v42 = vld [vmem:[%s9357_s18 + $0x260] sm:$0xff] }
 0x8c1   : > { %5960 = vmatpush1.bf16.msra.mxu0 %v5959_v20  ;;  %v5281_v20 = vld [vmem:[%s9359_s20 + $0x10] sm:$0xff] }
 0x8c2   : > { %5962 = vmatprep.subr.bf16.mxu0 %v5961_v2  ;;  %v6054_v2 = vpack.c.bf16 %v5280_v28, %v5279_v35  ;;  %v6057_v38 = vpack.c.bf16 %v5282_v60, %v5281_v20  ;;  %v4650_v35 = vsub.s32 3, %v8507_v54  ;;  %v4979_v28 = vld [vmem:[%s9357_s18 + $0x288] sm:$0xff]  ;;  %v4981_v20 = vld [vmem:[%s9357_s18 + $0x298] sm:$0xff] }
 0x8c3   : > { %v5985_v60 = vpack.c.bf16 %v4981_v20, %v4979_v28  ;;  %v5010_v20 = vld [vmem:[%s9357_s18 + $0x380] sm:$0xff] }
 0x8c5   : > { %5964 = vmatpush1.bf16.msra.mxu0 %v5963_v15  ;;  %v5283_v15 = vld [vmem:[%s9359_s20 + $0x20] sm:$0xff] }
 0x8c6   : > { %5966 = vmatprep.subr.bf16.mxu0 %v5965_v39  ;;  %v6060_v41 = vpack.c.bf16 %v5284_v61, %v5283_v15  ;;  %v4975_v39 = vld [vmem:[%s9357_s18 + $0x268] sm:$0xff]  ;;  %v4980_v15 = vld [vmem:[%s9357_s18 + $0x290] sm:$0xff] }
 0x8c7   : > { %v5981_v57 = vpack.c.bf16 %v4977_v27, %v4975_v39 }
 0x8c9   : > { %5968 = vmatpush1.bf16.msra.mxu0 %v5967_v19  ;;  %v5979_v19 = vpack.c.bf16 %v4972_v11, %v4970_v16  ;;  %v5007_v16 = vld [vmem:[%s9357_s18 + $0x368] sm:$0xff]  ;;  %v5009_v11 = vld [vmem:[%s9357_s18 + $0x378] sm:$0xff] }
 0x8ca   : > { %5970 = vmatprep.subr.bf16.mxu0 %v5969_v49  ;;  %v4976_v49 = vld [vmem:[%s9357_s18 + $0x270] sm:$0xff]  ;;  %v6013_v27 = vpack.c.bf16 %v5009_v11, %v5007_v16  ;;  %v5043_v16 = vld [vmem:[%s9357_s18 + $0x488] sm:$0xff]  ;;  %v5045_v11 = vld [vmem:[%s9357_s18 + $0x498] sm:$0xff] }
 0x95f   : > { %v4580_v36 = vpop.f32.mrb[38].mxu0 }
 0x960   : > { %5536 = vmatmul.mubr.msk.f32.vlgmr.msra.gmra.mrb[74].mxu1 %vm4661_vm7, %v4580_v36  ;;  %v5732_v3 = vpop.f32.mrb[39].mxu0 }
 0x961   : > { %5870 = vmatpush1.bf16.msra.mxu1 %v5869_v12  ;;  %4816 = vmatprep.mubr.f32.mxu1 %v9595_v63  ;;  %v6063_v12 = vpack.c.bf16 %v5286_v26, %v5285_v0  ;;  %v5291_v3 = vld [vmem:[%s9359_s20 + $0x60] sm:$0xff]  ;;  %v4985_v0 = vld [vmem:[%s9357_s18 + $0x2b8] sm:$0xff] }
 0x962   : > { %5872 = vmatprep.subr.bf16.mxu1 %v5871_v43  ;;  %v5287_v43 = vld [vmem:[%s9359_s20 + $0x40] sm:$0xff] }
 0x963   : > { %v6066_v29 = vpack.c.bf16 %v5288_v47, %v5287_v43 }
 0x965   : > { %5874 = vmatpush1.bf16.msra.mxu1 %v5873_v30  ;;  %v5292_v30 = vld [vmem:[%s9359_s20 + $0x68] sm:$0xff] }
 0x966   : > { %5876 = vmatprep.subr.bf16.mxu1 %v5875_v58  ;;  %v6072_v58 = vpack.c.bf16 %v5292_v30, %v5291_v3  ;;  %v4989_v3 = vld [vmem:[%s9357_s18 + $0x2d8] sm:$0xff] }
 0x969   : > { %5878 = vmatpush1.bf16.msra.mxu1 %v5877_v46  ;;  %v5296_v46 = vld [vmem:[%s9359_s20 + $0x88] sm:$0xff] }
 0x96a   : > { %5880 = vmatprep.subr.bf16.mxu1 %v5879_v51  ;;  %v8988_v51 = vld [vmem:[%s9356_s17] sm:$0x1f]  ;;  %v6078_v6 = vpack.c.bf16 %v5296_v46, %v5295_v31  ;;  %v4991_v31 = vld [vmem:[%s9357_s18 + $0x2e8] sm:$0xff]  ;;  %v4993_v46 = vld [vmem:[%s9357_s18 + $0x2f8] sm:$0xff] }
 0x96b   : > { %v4639_v48 = vrot.slane %v8988_v51, %v8510_v37  ;;  %v4651_v61 = vrot.slane %v8988_v51, %v4650_v35 }
 0x96d   : > { %5882 = vmatpush1.bf16.msra.mxu1 %v5881_v24  ;;  %v5298_v24 = vld [vmem:[%s9359_s20 + $0x98] sm:$0xff] }
 0x96e   : > { %5885 = vmatprep.subr.msk.bf16.mxu1 %vm8598_vm4, %v5883_v22  ;;  %v4643_v22 = vrot.slane %v8988_v51, %v4642_v25  ;;  %v6081_v21 = vpack.c.bf16 %v5298_v24, %v5297_v17  ;;  %v4990_v17 = vld [vmem:[%s9357_s18 + $0x2e0] sm:$0xff]  ;;  %v4992_v24 = vld [vmem:[%s9357_s18 + $0x2f0] sm:$0xff] }
 0x971   : > { %5888 = vmatpush1.bf16.msk.msra.mxu1 %vm8598_vm4, %v5886_v23 }
 0x972   : > { %5889 = vmatprep.subr.bf16.mxu1 %v9500_v52 }
 0x974   : > { %5539 = vmatmul.mubr.msk.f32.vlgmr.msra.gmra.mrb[76].mxu1 %vm4661_vm7, %v4580_v36 }
 0x975   : > { %5891 = vmatpush3.bf16.msra.mxu1 %v5890_v13  ;;  %5753 = vmatprep.mubr.msk.f32.mxu1 %vm6220_vm1, %v9595_v63  ;;  %v4964_v13 = vld [vmem:[%s9357_s18 + $0x210] sm:$0xff]  ;;  %vm5060_vm1 = vcmask 719872  }
 0x976   : > { %5892 = vmatprep.subr.bf16.mxu1 %v9500_v52  ;;  %v5971_v44 = vpack.c.bf16 %v4964_v13, %v4962_v4  ;;  %v4996_v4 = vld [vmem:[%s9357_s18 + $0x310] sm:$0xff]  ;;  %v4999_v13 = vld [vmem:[%s9357_s18 + $0x328] sm:$0xff] }
 0x979   : > { %5894 = vmatpush3.bf16.msra.mxu1 %v5893_v7  ;;  %v4969_v7 = vld [vmem:[%s9357_s18 + $0x238] sm:$0xff] }
 0x97a   : > { %5895 = vmatprep.subr.bf16.mxu1 %v9500_v52  ;;  %v5973_v34 = vpack.c.bf16 %v4969_v7, %v4967_v18 }
 0x97d   : > { %5897 = vmatpush3.bf16.msra.mxu1 %v5896_v45 }
 0x97e   : > { %5898 = vmatprep.subr.bf16.mxu1 %v9500_v52 }
 0x981   : > { %5900 = vmatpush3.bf16.msra.mxu1 %v5899_v56  ;;  %v4968_v56 = vld [vmem:[%s9357_s18 + $0x230] sm:$0xff] }
 0x982   : > { %5901 = vmatprep.subr.bf16.mxu1 %v9500_v52 }
 0x985   : > { %5904 = vmatpush3.bf16.msk.msra.mxu1 %vm8598_vm4, %v5902_v10  ;;  %v5975_v10 = vpack.c.bf16 %v4968_v56, %v4966_v50 }
 0x986   : > { %6053 = vmatprep.subr.bf16.mxu1 %v9500_v52 }
 0x988   : > { %5754 = vmatmul.mubr.msk.f32.vlgmr.msra.gmra.mrb[78].mxu1 %vm4661_vm7, %v4580_v36  ;;  %v5289_v36 = vld [vmem:[%s9359_s20 + $0x50] sm:$0xff] }
 0x989   : > { %6055 = vmatpush1.bf16.msra.mxu1 %v6054_v2  ;;  %v6069_v59 = vpack.c.bf16 %v5290_v14, %v5289_v36  ;;  %v5983_v2 = vpack.c.bf16 %v4976_v49, %v4974_v42  ;;  %v4984_v36 = vld [vmem:[%s9357_s18 + $0x2b0] sm:$0xff]  ;;  %v5011_v42 = vld [vmem:[%s9357_s18 + $0x388] sm:$0xff]  ;;  %v5013_v49 = vld [vmem:[%s9357_s18 + $0x398] sm:$0xff] }
 0x98a   : > { %6056 = vmatprep.subr.bf16.mxu1 %v9500_v52  ;;  %v6017_v28 = vpack.c.bf16 %v5013_v49, %v5011_v42  ;;  %v5044_v42 = vld [vmem:[%s9357_s18 + $0x490] sm:$0xff] }
 0x98d   : > { %6058 = vmatpush1.bf16.msra.mxu1 %v6057_v38  ;;  %v4978_v38 = vld [vmem:[%s9357_s18 + $0x280] sm:$0xff] }
 0x98e   : > { %6059 = vmatprep.subr.bf16.mxu1 %v9500_v52 }
 0x991   : > { %6061 = vmatpush1.bf16.msra.mxu1 %v6060_v41  ;;  %v4983_v41 = vld [vmem:[%s9357_s18 + $0x2a8] sm:$0xff] }
 0x992   : > { %6062 = vmatprep.subr.bf16.mxu1 %v9500_v52  ;;  %v5989_v47 = vpack.c.bf16 %v4985_v0, %v4983_v41  ;;  %v5014_v41 = vld [vmem:[%s9357_s18 + $0x3a0] sm:$0xff]  ;;  %v5016_v0 = vld [vmem:[%s9357_s18 + $0x3b0] sm:$0xff] }
 0x995   : > { %6064 = vmatpush1.bf16.msra.mxu1 %v6063_v12  ;;  %v5987_v12 = vpack.c.bf16 %v4980_v15, %v4978_v38  ;;  %v5017_v38 = vld [vmem:[%s9357_s18 + $0x3b8] sm:$0xff] }
 0x996   : > { %6065 = vmatprep.subr.bf16.mxu1 %v9500_v52 }
 0x999   : > { %6067 = vmatpush1.bf16.msra.mxu1 %v6066_v29  ;;  %v4982_v29 = vld [vmem:[%s9357_s18 + $0x2a0] sm:$0xff] }
 0x99a   : > { %6068 = vmatprep.subr.bf16.mxu1 %v9500_v52 }
 0x99d   : > { %6070 = vmatpush1.bf16.msra.mxu1 %v6069_v59  ;;  %v4987_v59 = vld [vmem:[%s9357_s18 + $0x2c8] sm:$0xff] }
 0x99e   : > { %6071 = vmatprep.subr.bf16.mxu1 %v9500_v52  ;;  %v5993_v33 = vpack.c.bf16 %v4989_v3, %v4987_v59  ;;  %v5020_v59 = vld [vmem:[%s9357_s18 + $0x3d0] sm:$0xff]  ;;  %v5023_v3 = vld [vmem:[%s9357_s18 + $0x3e8] sm:$0xff] }
 0x9a1   : > { %6073 = vmatpush1.bf16.msra.mxu1 %v6072_v58  ;;  %v5991_v58 = vpack.c.bf16 %v4984_v36, %v4982_v29  ;;  %v4646_v29 = vsub.s32 2, %v8507_v54 }
 0x9a2   : > { %6074 = vmatprep.subr.bf16.mxu1 %v9500_v52 }
 0x9a5   : > { %6076 = vmatpush1.bf16.msra.mxu1 %v6075_v1  ;;  %v4988_v1 = vld [vmem:[%s9357_s18 + $0x2d0] sm:$0xff] }
 0x9a6   : > { %6077 = vmatprep.subr.bf16.mxu1 %v9500_v52 }
 0x9a9   : > { %6079 = vmatpush1.bf16.msra.mxu1 %v6078_v6  ;;  %v5995_v6 = vpack.c.bf16 %v4988_v1, %v4986_v9  ;;  %v5022_v1 = vld [vmem:[%s9357_s18 + $0x3e0] sm:$0xff] }
 0x9aa   : > { %6080 = vmatprep.subr.bf16.mxu1 %v9500_v52 }
 0x9ad   : > { %6082 = vmatpush1.bf16.msra.mxu1 %v6081_v21  ;;  %v5999_v21 = vpack.c.bf16 %v4992_v24, %v4990_v17 }
 0x9ae   : > { %6083 = vmatprep.subr.bf16.mxu1 %v9500_v52 }
 0xa33   : > { %v4747_v53 = vpop.f32.mrb[74].mxu1 }
 0xa34   : > { %v4748_v23 = vadd.f32 %v4747_v53, %v4639_v48  ;;  %v4749_v5 = vpop.f32.mrb[75].mxu1  ;;  %v5997_v48 = vpack.c.bf16 %v4993_v46, %v4991_v31  ;;  %v4997_v53 = vld [vmem:[%s9357_s18 + $0x318] sm:$0xff]  ;;  %v5024_v31 = vld [vmem:[%s9357_s18 + $0x3f0] sm:$0xff]  ;;  %v5027_v46 = vld [vmem:[%s9357_s18 + $0x408] sm:$0xff] }
 0xa35   : > { %v4750_v62 = vadd.f32 %v4749_v5, %v4643_v22  ;;  %v4995_v22 = vld [vmem:[%s9357_s18 + $0x308] sm:$0xff]  ;;  %v4994_v5 = vld [vmem:[%s9357_s18 + $0x300] sm:$0xff] }
 0xa36   : > { %v4893_v45 = vmax.f32 %v4748_v23, 0.0  ;;  %v6001_v23 = vpack.c.bf16 %v4997_v53, %v4995_v22  ;;  %v6003_v18 = vpack.c.bf16 %v4996_v4, %v4994_v5  ;;  %v5026_v22 = vld [vmem:[%s9357_s18 + $0x400] sm:$0xff]  ;;  %v5028_v53 = vld [vmem:[%s9357_s18 + $0x410] sm:$0xff] }
 0xa37   : > { %v4894_v32 = vmax.f32 %v4750_v62, 0.0  ;;  %v5001_v62 = vld [vmem:[%s9357_s18 + $0x338] sm:$0xff] }
 0xa38   : > { %v6005_v7 = vpack.c.bf16 %v5001_v62, %v4999_v13  ;;  %v5030_v13 = vld [vmem:[%s9357_s18 + $0x420] sm:$0xff]  ;;  %v5032_v62 = vld [vmem:[%s9357_s18 + $0x430] sm:$0xff] }
 0xa39   : > { %5128 = vmatprep.mubr.f32.mxu0 %v4894_v32  ;;  %v4998_v32 = vld [vmem:[%s9357_s18 + $0x320] sm:$0xff] }
 0xa3a   : > { %5129 = vmatmul.mubr.f32.vlgmr.msra.gmra.mrb[40].mxu0 %v4893_v45  ;;  %v5003_v45 = vld [vmem:[%s9357_s18 + $0x348] sm:$0xff] }
 0xa3b   : > { %5972 = vmatpush1.bf16.msra.mxu0 %v5971_v44  ;;  %v5000_v44 = vld [vmem:[%s9357_s18 + $0x330] sm:$0xff] }
 0xa3c   : > { %5974 = vmatprep.subr.bf16.mxu0 %v5973_v34  ;;  %v5005_v34 = vld [vmem:[%s9357_s18 + $0x358] sm:$0xff]  ;;  %v6007_v56 = vpack.c.bf16 %v5000_v44, %v4998_v32  ;;  %v6039_v32 = vpack.c.bf16 %v5032_v62, %v5030_v13 }
 0xa3d   : > { %v6009_v8 = vpack.c.bf16 %v5005_v34, %v5003_v45  ;;  %v5034_v45 = vld [vmem:[%s9357_s18 + $0x440] sm:$0xff]  ;;  %v5036_v34 = vld [vmem:[%s9357_s18 + $0x450] sm:$0xff] }
 0xa3f   : > { %5976 = vmatpush1.bf16.msra.mxu0 %v5975_v10  ;;  %v5002_v10 = vld [vmem:[%s9357_s18 + $0x340] sm:$0xff] }
 0xa40   : > { %5978 = vmatprep.subr.bf16.mxu0 %v5977_v40  ;;  %v5004_v40 = vld [vmem:[%s9357_s18 + $0x350] sm:$0xff] }
 0xa41   : > { %v6011_v39 = vpack.c.bf16 %v5004_v40, %v5002_v10  ;;  %v5038_v10 = vld [vmem:[%s9357_s18 + $0x460] sm:$0xff]  ;;  %v5040_v40 = vld [vmem:[%s9357_s18 + $0x470] sm:$0xff] }
 0xa43   : > { %5980 = vmatpush1.bf16.msra.mxu0 %v5979_v19  ;;  %v5006_v19 = vld [vmem:[%s9357_s18 + $0x360] sm:$0xff] }
 0xa44   : > { %5982 = vmatprep.subr.bf16.mxu0 %v5981_v57  ;;  %v5008_v57 = vld [vmem:[%s9357_s18 + $0x370] sm:$0xff] }
 0xa45   : > { %v6015_v35 = vpack.c.bf16 %v5008_v57, %v5006_v19  ;;  %v6049_v19 = vpack.c.bf16 %v5045_v11, %v5043_v16  ;;  %v5042_v57 = vld [vmem:[%s9357_s18 + $0x480] sm:$0xff] }
 0xa47   : > { %v9067_v26 = vpop.f32.mrb[76].mxu1  ;;  %5984 = vmatpush1.bf16.msra.mxu0 %v5983_v2  ;;  %v5012_v2 = vld [vmem:[%s9357_s18 + $0x390] sm:$0xff] }
 0xa48   : > { %v4820_v43 = vpop.f32.mrb[77].mxu1  ;;  %5986 = vmatprep.subr.bf16.mxu0 %v5985_v60  ;;  %v5015_v60 = vld [vmem:[%s9357_s18 + $0x3a8] sm:$0xff]  ;;  %v6019_v15 = vpack.c.bf16 %v5012_v2, %v5010_v20  ;;  %v5046_v2 = vld [vmem:[%s9357_s18 + $0x4a0] sm:$0xff] }
 0xa49   : > { %v4821_v14 = vadd.f32 %v4820_v43, %v4651_v61  ;;  %v6021_v61 = vpack.c.bf16 %v5017_v38, %v5015_v60  ;;  %v5021_v43 = vld [vmem:[%s9357_s18 + $0x3d8] sm:$0xff]  ;;  %v5300_v38 = vld [vmem:[%s9359_s20 + $0xa8] sm:$0xff] }
 0xa4b   : > { %v4896_v30 = vmax.f32 %v4821_v14, 0.0  ;;  %5988 = vmatpush1.bf16.msra.mxu0 %v5987_v12  ;;  %v5019_v12 = vld [vmem:[%s9357_s18 + $0x3c8] sm:$0xff]  ;;  %v5018_v14 = vld [vmem:[%s9357_s18 + $0x3c0] sm:$0xff] }
 0xa4c   : > { %5990 = vmatprep.subr.bf16.mxu0 %v5989_v47  ;;  %v6023_v47 = vpack.c.bf16 %v5016_v0, %v5014_v41  ;;  %v6025_v36 = vpack.c.bf16 %v5021_v43, %v5019_v12  ;;  %v5048_v0 = vld [vmem:[%s9358_s19] sm:$0x3] }
 0xa4d   : > { %5199 = vmatprep.mubr.f32.mxu0 %v4896_v30  ;;  %v5025_v30 = vld [vmem:[%s9357_s18 + $0x3f8] sm:$0xff]  ;;  %v5053_v12 = vrot.slane %v5048_v0, %v8510_v37  ;;  %v5057_v43 = vrot.slane %v5048_v0, %v4642_v25 }
 0xa4e   : > { %v6029_v9 = vpack.c.bf16 %v5025_v30, %v5023_v3 }
 0xa4f   : > { %5992 = vmatpush1.bf16.msra.mxu0 %v5991_v58  ;;  %v6027_v58 = vpack.c.bf16 %v5020_v59, %v5018_v14 }
 0xa50   : > { %5994 = vmatprep.subr.bf16.mxu0 %v5993_v33  ;;  %v4647_v33 = vrot.slane %v8988_v51, %v4646_v29 }
 0xa52   : > { %v4819_v17 = vadd.f32 %v9067_v26, %v4647_v33  ;;  %v6035_v26 = vpack.c.bf16 %v5028_v53, %v5026_v22 }
 0xa53   : > { %5996 = vmatpush1.bf16.msra.mxu0 %v5995_v6  ;;  %v5029_v6 = vld [vmem:[%s9357_s18 + $0x418] sm:$0xff] }
 0xa54   : > { %5998 = vmatprep.subr.bf16.mxu0 %v5997_v48  ;;  %v6031_v48 = vpack.c.bf16 %v5024_v31, %v5022_v1  ;;  %v6033_v24 = vpack.c.bf16 %v5029_v6, %v5027_v46  ;;  %v4895_v5 = vmax.f32 %v4819_v17, 0.0 }
 0xa57   : > { %6000 = vmatpush1.bf16.msra.mxu0 %v5999_v21  ;;  %v5031_v21 = vld [vmem:[%s9357_s18 + $0x428] sm:$0xff] }
 0xa58   : > { %6002 = vmatprep.subr.bf16.mxu0 %v6001_v23  ;;  %v5033_v23 = vld [vmem:[%s9357_s18 + $0x438] sm:$0xff] }
 0xa59   : > { %v6037_v4 = vpack.c.bf16 %v5033_v23, %v5031_v21 }
 0xa5b   : > { %v9129_v50 = vpop.f32.mrb[78].mxu1  ;;  %6004 = vmatpush1.bf16.msra.mxu0 %v6003_v18  ;;  %v5035_v18 = vld [vmem:[%s9357_s18 + $0x448] sm:$0xff] }
 0xa5c   : > { %v5755_v55 = vpop.f32.mrb[79].mxu1  ;;  %6006 = vmatprep.subr.bf16.mxu0 %v6005_v7  ;;  %v5037_v7 = vld [vmem:[%s9357_s18 + $0x458] sm:$0xff] }
 0xa5d   : > { %v6041_v44 = vpack.c.bf16 %v5037_v7, %v5035_v18  ;;  %v5041_v55 = vld [vmem:[%s9357_s18 + $0x478] sm:$0xff] }
 0xa5f   : > { %6008 = vmatpush1.bf16.msra.mxu0 %v6007_v56  ;;  %v5039_v56 = vld [vmem:[%s9357_s18 + $0x468] sm:$0xff] }
 0xa60   : > { %6010 = vmatprep.subr.bf16.mxu0 %v6009_v8  ;;  %v6045_v8 = vpack.c.bf16 %v5041_v55, %v5039_v56 }
 0xa63   : > { %6012 = vmatpush1.bf16.msra.mxu0 %v6011_v39  ;;  %v4654_v39 = vsub.s32 4, %v8507_v54 }
 0xa64   : > { %6014 = vmatprep.subr.bf16.mxu0 %v6013_v27  ;;  %v6047_v27 = vpack.c.bf16 %v5040_v40, %v5038_v10 }
 0xa65   : > { %v4655_v49 = vrot.slane %v8988_v51, %v4654_v39  ;;  %v5299_v51 = vld [vmem:[%s9359_s20 + $0xa0] sm:$0xff] }
 0xa67   : > { %6016 = vmatpush1.bf16.msra.mxu0 %v6015_v35  ;;  %v6051_v35 = vpack.c.bf16 %v5044_v42, %v5042_v57  ;;  %v4890_v20 = vadd.f32 %v9129_v50, %v4655_v49  ;;  %v5301_v50 = vld [vmem:[%s9359_s20 + $0xb0] sm:$0xff] }
 0xa68   : > { %6018 = vmatprep.subr.bf16.mxu0 %v6017_v28  ;;  %v5047_v28 = vld [vmem:[%s9357_s18 + $0x4a8] sm:$0xff] }
 0xa69   : > { %v4897_v60 = vmax.f32 %v4890_v20, 0.0 }
 0xa6b   : > { %6020 = vmatpush1.bf16.msra.mxu0 %v6019_v15  ;;  %v6084_v15 = vpack.c.bf16 %v5300_v38, %v5299_v51 }
 0xa6c   : > { %6022 = vmatprep.subr.bf16.mxu0 %v6021_v61  ;;  %v5302_v61 = vld [vmem:[%s9359_s20 + $0xb8] sm:$0xff] }
 0xa6d   : > { %6085 = vmatpush1.bf16.msra.mxu1 %v6084_v15  ;;  %v6087_v41 = vpack.c.bf16 %v5302_v61, %v5301_v50 }
 0xa6e   : > { %6086 = vmatprep.subr.bf16.mxu1 %v9500_v52  ;;  %v5303_v52 = vld [vmem:[%s9360_s21] sm:$0x1] }
 0xa6f   : > { %6024 = vmatpush1.bf16.msra.mxu0 %v6023_v47 }
 0xa70   : > { %6026 = vmatprep.subr.bf16.mxu0 %v6025_v36 }
 0xa71   : > { %6088 = vmatpush1.bf16.msra.mxu1 %v6087_v41 }
 0xa73   : > { %6028 = vmatpush1.bf16.msra.mxu0 %v6027_v58 }
 0xa74   : > { %6030 = vmatprep.subr.bf16.mxu0 %v6029_v9 }
 0xa77   : > { %6032 = vmatpush1.bf16.msra.mxu0 %v6031_v48 }
 0xa78   : > { %6034 = vmatprep.subr.bf16.mxu0 %v6033_v24 }
 0xa7a   : > { %5200 = vmatmul.mubr.f32.vlgmr.msra.gmra.mrb[40].mxu0 %v4895_v5 }
 0xa7b   : > { %6036 = vmatpush1.bf16.msra.mxu0 %v6035_v26  ;;  %5270 = vmatprep.mubr.f32.mxu0 %v9595_v63  ;;  %v6043_v63 = vpack.c.bf16 %v5036_v34, %v5034_v45 }
 0xa7c   : > { %6038 = vmatprep.subr.bf16.mxu0 %v6037_v4 }
 0xa7f   : > { %6040 = vmatpush1.bf16.msra.mxu0 %v6039_v32 }
 0xa80   : > { %6042 = vmatprep.subr.bf16.mxu0 %v6041_v44 }
 0xa83   : > { %6044 = vmatpush1.bf16.msra.mxu0 %v6043_v63 }
 0xa84   : > { %6046 = vmatprep.subr.bf16.mxu0 %v6045_v8 }
 0xa87   : > { %6048 = vmatpush1.bf16.msra.mxu0 %v6047_v27 }
 0xa88   : > { %6050 = vmatprep.subr.bf16.mxu0 %v6049_v19 }
 0xa8b   : > { %6052 = vmatpush1.bf16.msra.mxu0 %v6051_v35 }
 0xa8c   : > { %5226 = vmatprep.subr.mxu0 %v5047_v28 }
 0xa8f   : > { %5227 = vmatpush1.msra.mxu0 %v5046_v2 }
 0xa90   : > { %5542 = vmatmul.mubr.msk.f32.vlgmr.msra.gmra.mrb[40].mxu0 %vm5060_vm1, %v4897_v60 }
 0xb63   : > { %v5272_v47 = vpop.f32.mrb[40].mxu0 }
 0xb64   : > { %v6091_v29 = vadd.f32 %v5272_v47, %v5053_v12  ;;  %v5274_v36 = vpop.f32.mrb[41].mxu0 }
 0xb65   : > { %v6092_v14 = vadd.f32 %v5274_v36, %v5057_v43 }
 0xb66   : > { %v5277_v3 = vmax.f32 %v6091_v29, 0.0 }
 0xb67   : > { %v5278_v59 = vmax.f32 %v6092_v14, 0.0 }
 0xb69   : > { %5543 = vmatprep.mubr.msk.f32.mxu1 %vm5304_vm14, %v5278_v59 }
 0xb6a   : > { %5373 = vmatmul.mubr.f32.vlgmr.msra.gmra.mrb[80].mxu1 %v5277_v3 }
 0xc3d   : > { %v5374_v54 = vpop.f32.mrb[80].mxu1 }
 0xc3e   : > { %v5375_v37 = vadd.f32 %v5374_v54, %v5303_v52  ;;  %v5376_v25 = vpop.f32.mrb[81].mxu1 }
 0xc40   : > { %5379 = vst.msk [vmem:[%s690_s27] sm:$0x1] %vm5378_vm15, %v5375_v37 }
 0xc41   : > { %6166 = shalt.err (!%p6163_p3)
}
 0xc42   : > { %s6167_s5 = scalar_lea.hbm %s9297_s0, 16  ;;  %s6171_s27 = scalar_lea.hbm %s9361_s22, 32 }
 0xc43   : > { %p6168_p4 = scmp.ne.s32.totalorder %s9297_s0, %s6167_s5  ;;  %p6172_p9 = scmp.lt.u32.totalorder %s9297_s0, %s9361_s22 }
 0xc44   : > { %p6173_p10 = scmp.lt.u32.totalorder %s6171_s27, %s6167_s5  ;;  %p6175_p12 = scmp.lt.u32.totalorder %s6167_s5, %s9297_s0 }
 0xc45   : > { %p6169_p7 = pnand %p6168_p4, %p6385_p5 }
 0xc46   : > { %p6174_p11 = por %p6173_p10, %p6172_p9 }
 0xc47   : > { %p6170_p8 = pneg %p6169_p7 }
 0xc48   : > { %p6176_p13 = por %p6175_p12, %p6174_p11 }
 0xc4a   : > { %p6177_p0 = pnand %p6176_p13, %p6170_p8 }
 0xc4c   : > { %6180 = shalt.err (!%p6177_p0)
}
 0xc4d   : > { %6098 = dma.vmem_to_hbm [thread:$0]  (%p6385_p5), %s9299_s30, 16, %s9297_s0, %s5381_s25  }
 0xc4e PF: > { %s9602_s1 = sld [smem:[#allocation9_spill]]  ;;  %s9603_s4 = sld [smem:[#allocation7_spill]] }
 0xc54   : > { %p6104_p1 = scmp.ge.s32.totalorder %s9602_s1, 2  ;;  %s5405_s26 = sand.u32 1, %s9603_s4  }
 0xc55   : > { %s5406_s29 = scalar_lea.sflag [#allocation5], %s5405_s26 }
 0xc56   : > { %p6101_p2 = pnand %p6104_p1, %p6389_p6 }
 0xc58   : > { %6198 = dma.done.wait (!%p6101_p2), %s5406_s29, 16  }
 0xc59   : > { %6200 = vsyncadd (!%p6101_p2), %s5406_s29, 4294967280  ;;  %s9605_s30 = sld [smem:[#allocation10_spill]]  ;;  %s9606_s5 = sld [smem:[#allocation8_spill]] }
 0xc5a   : > { %s9607_s29 = sld [smem:[#allocation11_spill]]  ;;  %s9608_s3 = smov %s6207_s28 }
 0xc5f   : > { %p32_p3 = scmp.ge.s32.totalorder %s9605_s30, 4   ;;  %s9609_s28 = smov %s9606_s5 }
 0xc61   :  { %34 = sbr.rel (!%p32_p3) target bundleno = 12 (0xc), region = 146 }
 0xc68   :  { %5410 = vsyncpa [#allocation5], 1 }
 0xc69   :  { %5412 = vsyncpa [#allocation5 + $0x1], 1 }

</bundles_post_ra>
